<compile_context>
chip_gen: v6e
topology: v6e:2x2x1
jax: 0.10.0
libtpu: 0.0.40
codegen_flags: <defaults>
</compile_context>

<pallas_src>
import jax
import jax.numpy as jnp
from jax.experimental import pallas as pl
from jax.experimental.pallas import tpu as pltpu

# ------------------------ tiny synthetic ViT config ------------------------
IMAGE = 16
PATCH = 8
CHANNELS = 3
HIDDEN = 32
LAYERS = 2
HEADS = 4
HEAD_DIM = HIDDEN // HEADS
INTERMEDIATE = 64
CLASSES = 2
LN_EPS = 1e-12
NUM_PATCHES = (IMAGE // PATCH) ** 2
SEQ = NUM_PATCHES + 1                      # +1 CLS token
PATCH_DIM = CHANNELS * PATCH * PATCH       # 192

H_PAD = 128                                # lane-dense padded width
NEG_BIG = -1e30


# ------------------------------- fused kernel -------------------------------
def _vit_fused_kernel(xp_ref, pw_ref, posc_ref,
                      wqkvo_ref, wmlp_ref, lvec_ref,
                      fvec_ref, fcw_ref,
                      hmask_ref, headmask_ref, bias_ref, sel_ref,
                      out_ref):
    hid_mask = hmask_ref[...]        # (1, H_PAD): 1.0 on the first HIDDEN lanes
    head_mask = headmask_ref[...]    # (HEADS, 1, H_PAD): per-head lane selector
    attn_bias = bias_ref[...]        # (B*S, B*S): 0 same-batch / -1e30 cross

    def layer_norm(v, g, b):
        # LayerNorm over the first HIDDEN lanes of a zero-padded (rows, H_PAD)
        # slab.  Padded lanes of v are zero, gamma/beta padded with zeros, so
        # the padded lanes of the output stay exactly zero.
        mu = jnp.sum(v, axis=-1, keepdims=True) * (1.0 / HIDDEN)
        cen = (v - mu) * hid_mask
        var = jnp.sum(cen * cen, axis=-1, keepdims=True) * (1.0 / HIDDEN)
        return cen * jax.lax.rsqrt(var + LN_EPS) * g + b

    # 1) Patch embedding + cls token + position embedding.
    #    CLS rows of xp are all zeros, and posc already contains
    #    (cls_token + pos[0]) for CLS rows and (patch_bias + pos[i]) otherwise.
    x = jnp.dot(xp_ref[...], pw_ref[...],
                preferred_element_type=jnp.float32) + posc_ref[...]   # (B*S, 128)

    bs = x.shape[0]
    n_heads = head_mask.shape[0]
    scale = 1.0 / (HEAD_DIM ** 0.5)

    # 2) Transformer encoder layers (static unrolled; LAYERS == 2).
    for l in range(LAYERS):
        ln1_g, ln1_b = lvec_ref[l, 0], lvec_ref[l, 1]
        bq, bk = lvec_ref[l, 2], lvec_ref[l, 3]
        bv, bo = lvec_ref[l, 4], lvec_ref[l, 5]
        ln2_g, ln2_b = lvec_ref[l, 6], lvec_ref[l, 7]
        b1, b2 = lvec_ref[l, 8], lvec_ref[l, 9]

        # ---- self-attention block (pre-LN) ----
        xn = layer_norm(x, ln1_g, ln1_b)
        q = jnp.dot(xn, wqkvo_ref[l, 0], preferred_element_type=jnp.float32) + bq
        k = jnp.dot(xn, wqkvo_ref[l, 1], preferred_element_type=jnp.float32) + bk
        v = jnp.dot(xn, wqkvo_ref[l, 2], preferred_element_type=jnp.float32) + bv

        # Head-batched attention: one dot_general for QK^T and one for PV.
        # Heads are separated by lane masks on q/v; batch elements are
        # separated by the additive block-diagonal bias on the scores.
        qh = q[None, :, :] * head_mask                                # (H, BS, 128)
        kh = jnp.broadcast_to(k[None, :, :], (n_heads, bs, H_PAD))    # (H, BS, 128)
        vh = v[None, :, :] * head_mask                                # (H, BS, 128)

        s = jnp.einsum("hqd,hkd->hqk", qh, kh,
                       preferred_element_type=jnp.float32) * scale    # (H, BS, BS)
        s = s + attn_bias[None, :, :]
        s = s - jnp.max(s, axis=-1, keepdims=True)
        p = jnp.exp(s)
        p = p * pl.reciprocal(jnp.sum(p, axis=-1, keepdims=True), approx=True)
        ctx = jnp.einsum("hqk,hkd->hqd", p, vh,
                         preferred_element_type=jnp.float32)           # (H, BS, 128)
        ctx = jnp.sum(ctx, axis=0)                                     # (BS, 128)

        attn = jnp.dot(ctx, wqkvo_ref[l, 3],
                       preferred_element_type=jnp.float32) + bo
        x = x + attn                                                   # residual

        # ---- MLP block (pre-LN) ----
        xn2 = layer_norm(x, ln2_g, ln2_b)
        h1 = jnp.dot(xn2, wmlp_ref[l, 0], preferred_element_type=jnp.float32) + b1
        # TODO(synk): HF ViT uses exact erf-GELU; tanh-approximate GELU used for Mosaic lowering.
        h1 = jax.nn.gelu(h1, approximate=True)
        h2 = jnp.dot(h1, wmlp_ref[l, 1], preferred_element_type=jnp.float32) + b2
        x = x + h2                                                     # residual

    # 3) Final LayerNorm on CLS tokens + classifier head (lane-padded logits).
    #    CLS rows are picked with a tiny one-hot selection matmul (no
    #    sublane-offset slicing / concat needed).
    x_cls = jnp.dot(sel_ref[...], x, preferred_element_type=jnp.float32)  # (B, 128)
    xn_f = layer_norm(x_cls, fvec_ref[0], fvec_ref[1])
    logits = jnp.dot(xn_f, fcw_ref[...],
                     preferred_element_type=jnp.float32) + fvec_ref[2]
    out_ref[...] = logits.astype(out_ref.dtype)


# ------------------------------- JAX glue -----------------------------------
def extract_patches(pixel_values):
    # NCHW -> (B, num_patches, C*p*p); patch flatten order (C, ph, pw) matches Conv2d.
    B, C, H, W = pixel_values.shape
    gh, gw = H // PATCH, W // PATCH
    x = pixel_values.reshape(B, C, gh, PATCH, gw, PATCH)
    x = x.transpose(0, 2, 4, 1, 3, 5)                 # (B, gh, gw, C, p, p)
    return x.reshape(B, gh * gw, C * PATCH * PATCH)


def vit_cls_forward(pixel_values, prep):
    B = pixel_values.shape[0]
    patches = extract_patches(pixel_values)                           # (B, N, K)
    # Zero row per batch element at the CLS position so the whole embedding is
    # one matmul + one add inside the fused kernel.
    xp = jnp.concatenate(
        [jnp.zeros((B, 1, PATCH_DIM), patches.dtype), patches], axis=1
    ).reshape(B * SEQ, PATCH_DIM)                                     # (B*S, K)

    ins = (xp, prep["pw"], prep["posc"], prep["wqkvo"], prep["wmlp"],
           prep["lvec"], prep["fvec"], prep["fcw"],
           prep["hid_mask"], prep["head_mask"], prep["attn_bias"], prep["sel"])
    in_specs = [pl.BlockSpec(a.shape, (lambda i, nd=a.ndim: (0,) * nd))
                for a in ins]

    logits_pad = pl.pallas_call(
        _vit_fused_kernel,
        out_shape=jax.ShapeDtypeStruct((B, H_PAD), jnp.float32),
        grid=(1,),
        in_specs=in_specs,
        out_specs=pl.BlockSpec((B, H_PAD), lambda i: (0, 0)),
        compiler_params=pltpu.CompilerParams(
            dimension_semantics=("arbitrary",)),
    )(*ins)
    return logits_pad[:, :CLASSES]                                    # (B, CLASSES)


# --------------------------- deterministic params ---------------------------
def init_params(key):
    keys = iter(jax.random.split(key, 64))

    def dense(k, shape, scale=0.02):
        return scale * jax.random.normal(k, shape, dtype=jnp.float32)

    params = {
        "patch_w": dense(next(keys), (PATCH_DIM, HIDDEN)),
        "patch_b": jnp.zeros((1, HIDDEN), jnp.float32),
        "cls_token": dense(next(keys), (1, 1, HIDDEN)),
        "pos_emb": dense(next(keys), (1, SEQ, HIDDEN)),
        "final_ln_g": jnp.ones((1, HIDDEN), jnp.float32),
        "final_ln_b": jnp.zeros((1, HIDDEN), jnp.float32),
        "fc_w": dense(next(keys), (HIDDEN, CLASSES)),
        "fc_b": jnp.zeros((1, CLASSES), jnp.float32),
        "layers": [],
    }
    for _ in range(LAYERS):
        params["layers"].append({
            "ln1_g": jnp.ones((1, HIDDEN), jnp.float32),
            "ln1_b": jnp.zeros((1, HIDDEN), jnp.float32),
            "wq": dense(next(keys), (HIDDEN, HIDDEN)),
            "bq": jnp.zeros((1, HIDDEN), jnp.float32),
            "wk": dense(next(keys), (HIDDEN, HIDDEN)),
            "bk": jnp.zeros((1, HIDDEN), jnp.float32),
            "wv": dense(next(keys), (HIDDEN, HIDDEN)),
            "bv": jnp.zeros((1, HIDDEN), jnp.float32),
            "wo": dense(next(keys), (HIDDEN, HIDDEN)),
            "bo": jnp.zeros((1, HIDDEN), jnp.float32),
            "ln2_g": jnp.ones((1, HIDDEN), jnp.float32),
            "ln2_b": jnp.zeros((1, HIDDEN), jnp.float32),
            "w1": dense(next(keys), (HIDDEN, INTERMEDIATE)),
            "b1": jnp.zeros((1, INTERMEDIATE), jnp.float32),
            "w2": dense(next(keys), (INTERMEDIATE, HIDDEN)),
            "b2": jnp.zeros((1, HIDDEN), jnp.float32),
        })
    return params


def _pad2(a, rows, cols):
    r, c = a.shape
    return jnp.pad(a, ((0, rows - r), (0, cols - c)))


def prepare_params(params, batch):
    """One-time padding / stacking of parameters into lane-dense kernel inputs."""
    # patch-embed weight, zero-padded to 128 output lanes
    pw = _pad2(params["patch_w"], PATCH_DIM, H_PAD)                   # (192, 128)

    # composite additive tensor: row 0 = cls + pos[0]; row i>0 = patch_b + pos[i]
    pos = params["pos_emb"][0]                                        # (S, H)
    row0 = pos[0:1] + params["cls_token"][0]                          # (1, H)
    rest = pos[1:] + params["patch_b"]                                # (N, H)
    pos_plus = _pad2(jnp.concatenate([row0, rest], axis=0), SEQ, H_PAD)
    posc = jnp.tile(pos_plus, (batch, 1))                             # (B*S, 128)

    # stacked per-layer weights (zero-padded to 128x128)
    wqkvo = jnp.stack([
        jnp.stack([_pad2(lp["wq"], H_PAD, H_PAD), _pad2(lp["wk"], H_PAD, H_PAD),
                   _pad2(lp["wv"], H_PAD, H_PAD), _pad2(lp["wo"], H_PAD, H_PAD)])
        for lp in params["layers"]])                                  # (L, 4, 128, 128)
    wmlp = jnp.stack([
        jnp.stack([_pad2(lp["w1"], H_PAD, H_PAD), _pad2(lp["w2"], H_PAD, H_PAD)])
        for lp in params["layers"]])                                  # (L, 2, 128, 128)
    vec_names = ("ln1_g", "ln1_b", "bq", "bk", "bv", "bo",
                 "ln2_g", "ln2_b", "b1", "b2")
    lvec = jnp.stack([
        jnp.stack([_pad2(lp[n], 1, H_PAD) for n in vec_names])
        for lp in params["layers"]])                                  # (L, 10, 1, 128)

    # final LN + classifier head
    fvec = jnp.stack([_pad2(params["final_ln_g"], 1, H_PAD),
                      _pad2(params["final_ln_b"], 1, H_PAD),
                      _pad2(params["fc_b"], 1, H_PAD)])               # (3, 1, 128)
    fcw = _pad2(params["fc_w"], H_PAD, H_PAD)                         # (128, 128)

    # static masks / selectors
    lane = jnp.arange(H_PAD)
    hid_mask = (lane[None, :] < HIDDEN).astype(jnp.float32)           # (1, 128)
    hidx = jnp.arange(HEADS)[:, None, None]
    head_mask = ((lane[None, None, :] >= hidx * HEAD_DIM) &
                 (lane[None, None, :] < (hidx + 1) * HEAD_DIM)
                 ).astype(jnp.float32)                                # (HEADS, 1, 128)
    tok = jnp.arange(batch * SEQ)
    same = (tok[:, None] // SEQ) == (tok[None, :] // SEQ)
    attn_bias = jnp.where(same, 0.0, NEG_BIG).astype(jnp.float32)     # (B*S, B*S)
    sel = (tok[None, :] == (jnp.arange(batch) * SEQ)[:, None]
           ).astype(jnp.float32)                                      # (B, B*S)

    return {"pw": pw, "posc": posc, "wqkvo": wqkvo, "wmlp": wmlp,
            "lvec": lvec, "fvec": fvec, "fcw": fcw,
            "hid_mask": hid_mask, "head_mask": head_mask,
            "attn_bias": attn_bias, "sel": sel}


# ----------------------------------- main ------------------------------------
if __name__ == "__main__":
    key = jax.random.PRNGKey(0)
    pkey, xkey = jax.random.split(key)
    params = init_params(pkey)

    BATCH = 2
    prep = prepare_params(params, BATCH)

    # pixel_values: NCHW, like the PyTorch module's forward input
    pixel_values = jax.random.normal(
        xkey, (BATCH, CHANNELS, IMAGE, IMAGE), dtype=jnp.float32)

    fwd = jax.jit(vit_cls_forward)
    logits = fwd(pixel_values, prep)
    logits = jax.block_until_ready(logits)

    assert logits.shape == (BATCH, CLASSES)
    assert bool(jnp.all(jnp.isfinite(logits)))
    print("KERNEL_OK")
</pallas_src>

<mosaic_0001>
module attributes {stable_mosaic.version = 11 : i64} {
  func.func @_vit_fused_kernel(%arg0: i32, %arg1: memref<10x192xf32, #tpu.memory_space<vmem>>, %arg2: memref<192x128xf32, #tpu.memory_space<vmem>>, %arg3: memref<10x128xf32, #tpu.memory_space<vmem>>, %arg4: memref<2x4x128x128xf32, #tpu.memory_space<vmem>>, %arg5: memref<2x2x128x128xf32, #tpu.memory_space<vmem>>, %arg6: memref<2x10x1x128xf32, #tpu.memory_space<vmem>>, %arg7: memref<3x1x128xf32, #tpu.memory_space<vmem>>, %arg8: memref<128x128xf32, #tpu.memory_space<vmem>>, %arg9: memref<1x128xf32, #tpu.memory_space<vmem>>, %arg10: memref<4x1x128xf32, #tpu.memory_space<vmem>>, %arg11: memref<10x10xf32, #tpu.memory_space<vmem>>, %arg12: memref<2x10xf32, #tpu.memory_space<vmem>>, %arg13: memref<2x128xf32, #tpu.memory_space<vmem>>) attributes {dimension_semantics = [#tpu.dimension_semantics<arbitrary>], iteration_bounds = array<i64: 1>, scalar_prefetch = 0 : i64, scratch_operands = 0 : i64, tpu.core_type = #tpu.core_type<tc>, window_params = [{pipeline_mode = #tpu.pipeline_mode<synchronous>, transform_indices = @transform_0, window_bounds = array<i64: 10, 192>}, {pipeline_mode = #tpu.pipeline_mode<synchronous>, transform_indices = @transform_1, window_bounds = array<i64: 192, 128>}, {pipeline_mode = #tpu.pipeline_mode<synchronous>, transform_indices = @transform_2, window_bounds = array<i64: 10, 128>}, {pipeline_mode = #tpu.pipeline_mode<synchronous>, transform_indices = @transform_3, window_bounds = array<i64: 2, 4, 128, 128>}, {pipeline_mode = #tpu.pipeline_mode<synchronous>, transform_indices = @transform_4, window_bounds = array<i64: 2, 2, 128, 128>}, {pipeline_mode = #tpu.pipeline_mode<synchronous>, transform_indices = @transform_5, window_bounds = array<i64: 2, 10, 1, 128>}, {pipeline_mode = #tpu.pipeline_mode<synchronous>, transform_indices = @transform_6, window_bounds = array<i64: 3, 1, 128>}, {pipeline_mode = #tpu.pipeline_mode<synchronous>, transform_indices = @transform_7, window_bounds = array<i64: 128, 128>}, {pipeline_mode = #tpu.pipeline_mode<synchronous>, transform_indices = @transform_8, window_bounds = array<i64: 1, 128>}, {pipeline_mode = #tpu.pipeline_mode<synchronous>, transform_indices = @transform_9, window_bounds = array<i64: 4, 1, 128>}, {pipeline_mode = #tpu.pipeline_mode<synchronous>, transform_indices = @transform_10, window_bounds = array<i64: 10, 10>}, {pipeline_mode = #tpu.pipeline_mode<synchronous>, transform_indices = @transform_11, window_bounds = array<i64: 2, 10>}, {pipeline_mode = #tpu.pipeline_mode<synchronous>, transform_indices = @transform_12, window_bounds = array<i64: 2, 128>}]} {
    %c0 = arith.constant 0 : index
    %c0_0 = arith.constant 0 : index
    %0 = vector.load %arg9[%c0, %c0_0] : memref<1x128xf32, #tpu.memory_space<vmem>>, vector<1x128xf32>
    %c0_1 = arith.constant 0 : index
    %c0_2 = arith.constant 0 : index
    %c0_3 = arith.constant 0 : index
    %1 = vector.load %arg10[%c0_1, %c0_2, %c0_3] : memref<4x1x128xf32, #tpu.memory_space<vmem>>, vector<4x1x128xf32>
    %c0_4 = arith.constant 0 : index
    %c0_5 = arith.constant 0 : index
    %2 = vector.load %arg11[%c0_4, %c0_5] : memref<10x10xf32, #tpu.memory_space<vmem>>, vector<10x10xf32>
    %c0_6 = arith.constant 0 : index
    %c0_7 = arith.constant 0 : index
    %3 = vector.load %arg1[%c0_6, %c0_7] : memref<10x192xf32, #tpu.memory_space<vmem>>, vector<10x192xf32>
    %c0_8 = arith.constant 0 : index
    %c0_9 = arith.constant 0 : index
    %4 = vector.load %arg2[%c0_8, %c0_9] : memref<192x128xf32, #tpu.memory_space<vmem>>, vector<192x128xf32>
    %cst = arith.constant dense<0.000000e+00> : vector<10x128xf32>
    %5 = tpu.matmul %3, %4, %cst {dimension_numbers = #tpu.dot_dimension_numbers<[1], [0], [0], [1], [0, 0, 1, 1], [], []>} : vector<10x192xf32>, vector<192x128xf32>, vector<10x128xf32> -> vector<10x128xf32>
    %c0_10 = arith.constant 0 : index
    %c0_11 = arith.constant 0 : index
    %6 = vector.load %arg3[%c0_10, %c0_11] : memref<10x128xf32, #tpu.memory_space<vmem>>, vector<10x128xf32>
    %7 = arith.addf %5, %6 : vector<10x128xf32>
    %c0_12 = arith.constant 0 : index
    %c0_13 = arith.constant 0 : index
    %c0_14 = arith.constant 0 : index
    %c0_15 = arith.constant 0 : index
    %8 = vector.load %arg6[%c0_12, %c0_13, %c0_14, %c0_15] : memref<2x10x1x128xf32, #tpu.memory_space<vmem>>, vector<1x1x1x128xf32>
    %9 = vector.shape_cast %8 : vector<1x1x1x128xf32> to vector<1x128xf32>
    %c0_16 = arith.constant 0 : index
    %c1 = arith.constant 1 : index
    %c0_17 = arith.constant 0 : index
    %c0_18 = arith.constant 0 : index
    %10 = vector.load %arg6[%c0_16, %c1, %c0_17, %c0_18] : memref<2x10x1x128xf32, #tpu.memory_space<vmem>>, vector<1x1x1x128xf32>
    %11 = vector.shape_cast %10 : vector<1x1x1x128xf32> to vector<1x128xf32>
    %c0_19 = arith.constant 0 : index
    %c2 = arith.constant 2 : index
    %c0_20 = arith.constant 0 : index
    %c0_21 = arith.constant 0 : index
    %12 = vector.load %arg6[%c0_19, %c2, %c0_20, %c0_21] : memref<2x10x1x128xf32, #tpu.memory_space<vmem>>, vector<1x1x1x128xf32>
    %13 = vector.shape_cast %12 : vector<1x1x1x128xf32> to vector<1x128xf32>
    %c0_22 = arith.constant 0 : index
    %c3 = arith.constant 3 : index
    %c0_23 = arith.constant 0 : index
    %c0_24 = arith.constant 0 : index
    %14 = vector.load %arg6[%c0_22, %c3, %c0_23, %c0_24] : memref<2x10x1x128xf32, #tpu.memory_space<vmem>>, vector<1x1x1x128xf32>
    %15 = vector.shape_cast %14 : vector<1x1x1x128xf32> to vector<1x128xf32>
    %c0_25 = arith.constant 0 : index
    %c4 = arith.constant 4 : index
    %c0_26 = arith.constant 0 : index
    %c0_27 = arith.constant 0 : index
    %16 = vector.load %arg6[%c0_25, %c4, %c0_26, %c0_27] : memref<2x10x1x128xf32, #tpu.memory_space<vmem>>, vector<1x1x1x128xf32>
    %17 = vector.shape_cast %16 : vector<1x1x1x128xf32> to vector<1x128xf32>
    %c0_28 = arith.constant 0 : index
    %c5 = arith.constant 5 : index
    %c0_29 = arith.constant 0 : index
    %c0_30 = arith.constant 0 : index
    %18 = vector.load %arg6[%c0_28, %c5, %c0_29, %c0_30] : memref<2x10x1x128xf32, #tpu.memory_space<vmem>>, vector<1x1x1x128xf32>
    %19 = vector.shape_cast %18 : vector<1x1x1x128xf32> to vector<1x128xf32>
    %c0_31 = arith.constant 0 : index
    %c6 = arith.constant 6 : index
    %c0_32 = arith.constant 0 : index
    %c0_33 = arith.constant 0 : index
    %20 = vector.load %arg6[%c0_31, %c6, %c0_32, %c0_33] : memref<2x10x1x128xf32, #tpu.memory_space<vmem>>, vector<1x1x1x128xf32>
    %21 = vector.shape_cast %20 : vector<1x1x1x128xf32> to vector<1x128xf32>
    %c0_34 = arith.constant 0 : index
    %c7 = arith.constant 7 : index
    %c0_35 = arith.constant 0 : index
    %c0_36 = arith.constant 0 : index
    %22 = vector.load %arg6[%c0_34, %c7, %c0_35, %c0_36] : memref<2x10x1x128xf32, #tpu.memory_space<vmem>>, vector<1x1x1x128xf32>
    %23 = vector.shape_cast %22 : vector<1x1x1x128xf32> to vector<1x128xf32>
    %c0_37 = arith.constant 0 : index
    %c8 = arith.constant 8 : index
    %c0_38 = arith.constant 0 : index
    %c0_39 = arith.constant 0 : index
    %24 = vector.load %arg6[%c0_37, %c8, %c0_38, %c0_39] : memref<2x10x1x128xf32, #tpu.memory_space<vmem>>, vector<1x1x1x128xf32>
    %25 = vector.shape_cast %24 : vector<1x1x1x128xf32> to vector<1x128xf32>
    %c0_40 = arith.constant 0 : index
    %c9 = arith.constant 9 : index
    %c0_41 = arith.constant 0 : index
    %c0_42 = arith.constant 0 : index
    %26 = vector.load %arg6[%c0_40, %c9, %c0_41, %c0_42] : memref<2x10x1x128xf32, #tpu.memory_space<vmem>>, vector<1x1x1x128xf32>
    %27 = vector.shape_cast %26 : vector<1x1x1x128xf32> to vector<1x128xf32>
    %cst_43 = arith.constant dense<0.000000e+00> : vector<10xf32>
    %28 = vector.multi_reduction <add>, %7, %cst_43 [1] : vector<10x128xf32> to vector<10xf32>
    %29 = vector.shape_cast %28 : vector<10xf32> to vector<10x1xf32>
    %cst_44 = arith.constant 3.125000e-02 : f32
    %30 = vector.broadcast %cst_44 : f32 to vector<10x1xf32>
    %31 = arith.mulf %29, %30 : vector<10x1xf32>
    %32 = vector.broadcast %31 : vector<10x1xf32> to vector<10x128xf32>
    %33 = arith.subf %7, %32 : vector<10x128xf32>
    %34 = vector.broadcast %0 : vector<1x128xf32> to vector<10x128xf32>
    %35 = arith.mulf %33, %34 : vector<10x128xf32>
    %36 = arith.mulf %35, %35 : vector<10x128xf32>
    %cst_45 = arith.constant dense<0.000000e+00> : vector<10xf32>
    %37 = vector.multi_reduction <add>, %36, %cst_45 [1] : vector<10x128xf32> to vector<10xf32>
    %38 = vector.shape_cast %37 : vector<10xf32> to vector<10x1xf32>
    %cst_46 = arith.constant 3.125000e-02 : f32
    %39 = vector.broadcast %cst_46 : f32 to vector<10x1xf32>
    %40 = arith.mulf %38, %39 : vector<10x1xf32>
    %cst_47 = arith.constant 9.99999996E-13 : f32
    %41 = vector.broadcast %cst_47 : f32 to vector<10x1xf32>
    %42 = arith.addf %40, %41 : vector<10x1xf32>
    %43 = math.rsqrt %42 : vector<10x1xf32>
    %44 = vector.broadcast %43 : vector<10x1xf32> to vector<10x128xf32>
    %45 = arith.mulf %35, %44 : vector<10x128xf32>
    %46 = vector.broadcast %9 : vector<1x128xf32> to vector<10x128xf32>
    %47 = arith.mulf %45, %46 : vector<10x128xf32>
    %48 = vector.broadcast %11 : vector<1x128xf32> to vector<10x128xf32>
    %49 = arith.addf %47, %48 : vector<10x128xf32>
    %c0_48 = arith.constant 0 : index
    %c0_49 = arith.constant 0 : index
    %c0_50 = arith.constant 0 : index
    %c0_51 = arith.constant 0 : index
    %50 = vector.load %arg4[%c0_48, %c0_49, %c0_50, %c0_51] : memref<2x4x128x128xf32, #tpu.memory_space<vmem>>, vector<1x1x128x128xf32>
    %51 = vector.shape_cast %50 : vector<1x1x128x128xf32> to vector<128x128xf32>
    %cst_52 = arith.constant dense<0.000000e+00> : vector<10x128xf32>
    %52 = tpu.matmul %49, %51, %cst_52 {dimension_numbers = #tpu.dot_dimension_numbers<[1], [0], [0], [1], [0, 0, 1, 1], [], []>} : vector<10x128xf32>, vector<128x128xf32>, vector<10x128xf32> -> vector<10x128xf32>
    %53 = vector.broadcast %13 : vector<1x128xf32> to vector<10x128xf32>
    %54 = arith.addf %52, %53 : vector<10x128xf32>
    %c0_53 = arith.constant 0 : index
    %c1_54 = arith.constant 1 : index
    %c0_55 = arith.constant 0 : index
    %c0_56 = arith.constant 0 : index
    %55 = vector.load %arg4[%c0_53, %c1_54, %c0_55, %c0_56] : memref<2x4x128x128xf32, #tpu.memory_space<vmem>>, vector<1x1x128x128xf32>
    %56 = vector.shape_cast %55 : vector<1x1x128x128xf32> to vector<128x128xf32>
    %cst_57 = arith.constant dense<0.000000e+00> : vector<10x128xf32>
    %57 = tpu.matmul %49, %56, %cst_57 {dimension_numbers = #tpu.dot_dimension_numbers<[1], [0], [0], [1], [0, 0, 1, 1], [], []>} : vector<10x128xf32>, vector<128x128xf32>, vector<10x128xf32> -> vector<10x128xf32>
    %58 = vector.broadcast %15 : vector<1x128xf32> to vector<10x128xf32>
    %59 = arith.addf %57, %58 : vector<10x128xf32>
    %c0_58 = arith.constant 0 : index
    %c2_59 = arith.constant 2 : index
    %c0_60 = arith.constant 0 : index
    %c0_61 = arith.constant 0 : index
    %60 = vector.load %arg4[%c0_58, %c2_59, %c0_60, %c0_61] : memref<2x4x128x128xf32, #tpu.memory_space<vmem>>, vector<1x1x128x128xf32>
    %61 = vector.shape_cast %60 : vector<1x1x128x128xf32> to vector<128x128xf32>
    %cst_62 = arith.constant dense<0.000000e+00> : vector<10x128xf32>
    %62 = tpu.matmul %49, %61, %cst_62 {dimension_numbers = #tpu.dot_dimension_numbers<[1], [0], [0], [1], [0, 0, 1, 1], [], []>} : vector<10x128xf32>, vector<128x128xf32>, vector<10x128xf32> -> vector<10x128xf32>
    %63 = vector.broadcast %17 : vector<1x128xf32> to vector<10x128xf32>
    %64 = arith.addf %62, %63 : vector<10x128xf32>
    %65 = vector.shape_cast %54 : vector<10x128xf32> to vector<1x10x128xf32>
    %66 = vector.broadcast %65 : vector<1x10x128xf32> to vector<4x10x128xf32>
    %67 = vector.broadcast %1 : vector<4x1x128xf32> to vector<4x10x128xf32>
    %68 = arith.mulf %66, %67 : vector<4x10x128xf32>
    %69 = vector.shape_cast %59 : vector<10x128xf32> to vector<1x10x128xf32>
    %70 = vector.shape_cast %69 : vector<1x10x128xf32> to vector<1x10x128xf32>
    %71 = vector.broadcast %70 : vector<1x10x128xf32> to vector<4x10x128xf32>
    %72 = vector.shape_cast %64 : vector<10x128xf32> to vector<1x10x128xf32>
    %73 = vector.broadcast %72 : vector<1x10x128xf32> to vector<4x10x128xf32>
    %74 = vector.broadcast %1 : vector<4x1x128xf32> to vector<4x10x128xf32>
    %75 = arith.mulf %73, %74 : vector<4x10x128xf32>
    "tpu.trace_start"() <{level = 10 : i32, message = "hqd,hkd->hqk"}> : () -> ()
    %cst_63 = arith.constant dense<0.000000e+00> : vector<4x10x10xf32>
    %76 = tpu.matmul %68, %71, %cst_63 {dimension_numbers = #tpu.dot_dimension_numbers<[2], [2], [1], [1], [0, 0, 0, 1, 1, 1], [0], [0]>} : vector<4x10x128xf32>, vector<4x10x128xf32>, vector<4x10x10xf32> -> vector<4x10x10xf32>
    "tpu.trace_stop"() : () -> ()
    %cst_64 = arith.constant 0.353553385 : f32
    %77 = vector.broadcast %cst_64 : f32 to vector<4x10x10xf32>
    %78 = arith.mulf %76, %77 : vector<4x10x10xf32>
    %79 = vector.shape_cast %2 : vector<10x10xf32> to vector<1x10x10xf32>
    %80 = vector.broadcast %79 : vector<1x10x10xf32> to vector<4x10x10xf32>
    %81 = arith.addf %78, %80 : vector<4x10x10xf32>
    %cst_65 = arith.constant dense<0xFF800000> : vector<4x10xf32>
    %82 = vector.multi_reduction <maximumf>, %81, %cst_65 [2] : vector<4x10x10xf32> to vector<4x10xf32>
    %83 = vector.shape_cast %82 : vector<4x10xf32> to vector<4x10x1xf32>
    %84 = vector.broadcast %83 : vector<4x10x1xf32> to vector<4x10x10xf32>
    %85 = arith.subf %81, %84 : vector<4x10x10xf32>
    %86 = math.exp %85 : vector<4x10x10xf32>
    %cst_66 = arith.constant dense<0.000000e+00> : vector<4x10xf32>
    %87 = vector.multi_reduction <add>, %86, %cst_66 [2] : vector<4x10x10xf32> to vector<4x10xf32>
    %88 = vector.shape_cast %87 : vector<4x10xf32> to vector<4x10x1xf32>
    %89 = tpu.reciprocal %88 {approx = true} : vector<4x10x1xf32> -> vector<4x10x1xf32>
    %90 = vector.broadcast %89 : vector<4x10x1xf32> to vector<4x10x10xf32>
    %91 = arith.mulf %86, %90 : vector<4x10x10xf32>
    "tpu.trace_start"() <{level = 10 : i32, message = "hqk,hkd->hqd"}> : () -> ()
    %cst_67 = arith.constant dense<0.000000e+00> : vector<4x10x128xf32>
    %92 = tpu.matmul %91, %75, %cst_67 {dimension_numbers = #tpu.dot_dimension_numbers<[2], [1], [1], [2], [0, 0, 0, 1, 1, 2], [0], [0]>} : vector<4x10x10xf32>, vector<4x10x128xf32>, vector<4x10x128xf32> -> vector<4x10x128xf32>
    "tpu.trace_stop"() : () -> ()
    %cst_68 = arith.constant dense<0.000000e+00> : vector<10x128xf32>
    %93 = vector.multi_reduction <add>, %92, %cst_68 [0] : vector<4x10x128xf32> to vector<10x128xf32>
    %c0_69 = arith.constant 0 : index
    %c3_70 = arith.constant 3 : index
    %c0_71 = arith.constant 0 : index
    %c0_72 = arith.constant 0 : index
    %94 = vector.load %arg4[%c0_69, %c3_70, %c0_71, %c0_72] : memref<2x4x128x128xf32, #tpu.memory_space<vmem>>, vector<1x1x128x128xf32>
    %95 = vector.shape_cast %94 : vector<1x1x128x128xf32> to vector<128x128xf32>
    %cst_73 = arith.constant dense<0.000000e+00> : vector<10x128xf32>
    %96 = tpu.matmul %93, %95, %cst_73 {dimension_numbers = #tpu.dot_dimension_numbers<[1], [0], [0], [1], [0, 0, 1, 1], [], []>} : vector<10x128xf32>, vector<128x128xf32>, vector<10x128xf32> -> vector<10x128xf32>
    %97 = vector.broadcast %19 : vector<1x128xf32> to vector<10x128xf32>
    %98 = arith.addf %96, %97 : vector<10x128xf32>
    %99 = arith.addf %7, %98 : vector<10x128xf32>
    %cst_74 = arith.constant dense<0.000000e+00> : vector<10xf32>
    %100 = vector.multi_reduction <add>, %99, %cst_74 [1] : vector<10x128xf32> to vector<10xf32>
    %101 = vector.shape_cast %100 : vector<10xf32> to vector<10x1xf32>
    %cst_75 = arith.constant 3.125000e-02 : f32
    %102 = vector.broadcast %cst_75 : f32 to vector<10x1xf32>
    %103 = arith.mulf %101, %102 : vector<10x1xf32>
    %104 = vector.broadcast %103 : vector<10x1xf32> to vector<10x128xf32>
    %105 = arith.subf %99, %104 : vector<10x128xf32>
    %106 = vector.broadcast %0 : vector<1x128xf32> to vector<10x128xf32>
    %107 = arith.mulf %105, %106 : vector<10x128xf32>
    %108 = arith.mulf %107, %107 : vector<10x128xf32>
    %cst_76 = arith.constant dense<0.000000e+00> : vector<10xf32>
    %109 = vector.multi_reduction <add>, %108, %cst_76 [1] : vector<10x128xf32> to vector<10xf32>
    %110 = vector.shape_cast %109 : vector<10xf32> to vector<10x1xf32>
    %cst_77 = arith.constant 3.125000e-02 : f32
    %111 = vector.broadcast %cst_77 : f32 to vector<10x1xf32>
    %112 = arith.mulf %110, %111 : vector<10x1xf32>
    %cst_78 = arith.constant 9.99999996E-13 : f32
    %113 = vector.broadcast %cst_78 : f32 to vector<10x1xf32>
    %114 = arith.addf %112, %113 : vector<10x1xf32>
    %115 = math.rsqrt %114 : vector<10x1xf32>
    %116 = vector.broadcast %115 : vector<10x1xf32> to vector<10x128xf32>
    %117 = arith.mulf %107, %116 : vector<10x128xf32>
    %118 = vector.broadcast %21 : vector<1x128xf32> to vector<10x128xf32>
    %119 = arith.mulf %117, %118 : vector<10x128xf32>
    %120 = vector.broadcast %23 : vector<1x128xf32> to vector<10x128xf32>
    %121 = arith.addf %119, %120 : vector<10x128xf32>
    %c0_79 = arith.constant 0 : index
    %c0_80 = arith.constant 0 : index
    %c0_81 = arith.constant 0 : index
    %c0_82 = arith.constant 0 : index
    %122 = vector.load %arg5[%c0_79, %c0_80, %c0_81, %c0_82] : memref<2x2x128x128xf32, #tpu.memory_space<vmem>>, vector<1x1x128x128xf32>
    %123 = vector.shape_cast %122 : vector<1x1x128x128xf32> to vector<128x128xf32>
    %cst_83 = arith.constant dense<0.000000e+00> : vector<10x128xf32>
    %124 = tpu.matmul %121, %123, %cst_83 {dimension_numbers = #tpu.dot_dimension_numbers<[1], [0], [0], [1], [0, 0, 1, 1], [], []>} : vector<10x128xf32>, vector<128x128xf32>, vector<10x128xf32> -> vector<10x128xf32>
    %125 = vector.broadcast %25 : vector<1x128xf32> to vector<10x128xf32>
    %126 = arith.addf %124, %125 : vector<10x128xf32>
    %127 = arith.mulf %126, %126 : vector<10x128xf32>
    %128 = arith.mulf %126, %127 : vector<10x128xf32>
    %cst_84 = arith.constant 4.471500e-02 : f32
    %129 = vector.broadcast %cst_84 : f32 to vector<10x128xf32>
    %130 = arith.mulf %129, %128 : vector<10x128xf32>
    %131 = arith.addf %126, %130 : vector<10x128xf32>
    %cst_85 = arith.constant 0.797884583 : f32
    %132 = vector.broadcast %cst_85 : f32 to vector<10x128xf32>
    %133 = arith.mulf %132, %131 : vector<10x128xf32>
    %134 = math.tanh %133 : vector<10x128xf32>
    %cst_86 = arith.constant 1.000000e+00 : f32
    %135 = vector.broadcast %cst_86 : f32 to vector<10x128xf32>
    %136 = arith.addf %135, %134 : vector<10x128xf32>
    %cst_87 = arith.constant 5.000000e-01 : f32
    %137 = vector.broadcast %cst_87 : f32 to vector<10x128xf32>
    %138 = arith.mulf %137, %136 : vector<10x128xf32>
    %139 = arith.mulf %126, %138 : vector<10x128xf32>
    %c0_88 = arith.constant 0 : index
    %c1_89 = arith.constant 1 : index
    %c0_90 = arith.constant 0 : index
    %c0_91 = arith.constant 0 : index
    %140 = vector.load %arg5[%c0_88, %c1_89, %c0_90, %c0_91] : memref<2x2x128x128xf32, #tpu.memory_space<vmem>>, vector<1x1x128x128xf32>
    %141 = vector.shape_cast %140 : vector<1x1x128x128xf32> to vector<128x128xf32>
    %cst_92 = arith.constant dense<0.000000e+00> : vector<10x128xf32>
    %142 = tpu.matmul %139, %141, %cst_92 {dimension_numbers = #tpu.dot_dimension_numbers<[1], [0], [0], [1], [0, 0, 1, 1], [], []>} : vector<10x128xf32>, vector<128x128xf32>, vector<10x128xf32> -> vector<10x128xf32>
    %143 = vector.broadcast %27 : vector<1x128xf32> to vector<10x128xf32>
    %144 = arith.addf %142, %143 : vector<10x128xf32>
    %145 = arith.addf %99, %144 : vector<10x128xf32>
    %c1_93 = arith.constant 1 : index
    %c0_94 = arith.constant 0 : index
    %c0_95 = arith.constant 0 : index
    %c0_96 = arith.constant 0 : index
    %146 = vector.load %arg6[%c1_93, %c0_94, %c0_95, %c0_96] : memref<2x10x1x128xf32, #tpu.memory_space<vmem>>, vector<1x1x1x128xf32>
    %147 = vector.shape_cast %146 : vector<1x1x1x128xf32> to vector<1x128xf32>
    %c1_97 = arith.constant 1 : index
    %c1_98 = arith.constant 1 : index
    %c0_99 = arith.constant 0 : index
    %c0_100 = arith.constant 0 : index
    %148 = vector.load %arg6[%c1_97, %c1_98, %c0_99, %c0_100] : memref<2x10x1x128xf32, #tpu.memory_space<vmem>>, vector<1x1x1x128xf32>
    %149 = vector.shape_cast %148 : vector<1x1x1x128xf32> to vector<1x128xf32>
    %c1_101 = arith.constant 1 : index
    %c2_102 = arith.constant 2 : index
    %c0_103 = arith.constant 0 : index
    %c0_104 = arith.constant 0 : index
    %150 = vector.load %arg6[%c1_101, %c2_102, %c0_103, %c0_104] : memref<2x10x1x128xf32, #tpu.memory_space<vmem>>, vector<1x1x1x128xf32>
    %151 = vector.shape_cast %150 : vector<1x1x1x128xf32> to vector<1x128xf32>
    %c1_105 = arith.constant 1 : index
    %c3_106 = arith.constant 3 : index
    %c0_107 = arith.constant 0 : index
    %c0_108 = arith.constant 0 : index
    %152 = vector.load %arg6[%c1_105, %c3_106, %c0_107, %c0_108] : memref<2x10x1x128xf32, #tpu.memory_space<vmem>>, vector<1x1x1x128xf32>
    %153 = vector.shape_cast %152 : vector<1x1x1x128xf32> to vector<1x128xf32>
    %c1_109 = arith.constant 1 : index
    %c4_110 = arith.constant 4 : index
    %c0_111 = arith.constant 0 : index
    %c0_112 = arith.constant 0 : index
    %154 = vector.load %arg6[%c1_109, %c4_110, %c0_111, %c0_112] : memref<2x10x1x128xf32, #tpu.memory_space<vmem>>, vector<1x1x1x128xf32>
    %155 = vector.shape_cast %154 : vector<1x1x1x128xf32> to vector<1x128xf32>
    %c1_113 = arith.constant 1 : index
    %c5_114 = arith.constant 5 : index
    %c0_115 = arith.constant 0 : index
    %c0_116 = arith.constant 0 : index
    %156 = vector.load %arg6[%c1_113, %c5_114, %c0_115, %c0_116] : memref<2x10x1x128xf32, #tpu.memory_space<vmem>>, vector<1x1x1x128xf32>
    %157 = vector.shape_cast %156 : vector<1x1x1x128xf32> to vector<1x128xf32>
    %c1_117 = arith.constant 1 : index
    %c6_118 = arith.constant 6 : index
    %c0_119 = arith.constant 0 : index
    %c0_120 = arith.constant 0 : index
    %158 = vector.load %arg6[%c1_117, %c6_118, %c0_119, %c0_120] : memref<2x10x1x128xf32, #tpu.memory_space<vmem>>, vector<1x1x1x128xf32>
    %159 = vector.shape_cast %158 : vector<1x1x1x128xf32> to vector<1x128xf32>
    %c1_121 = arith.constant 1 : index
    %c7_122 = arith.constant 7 : index
    %c0_123 = arith.constant 0 : index
    %c0_124 = arith.constant 0 : index
    %160 = vector.load %arg6[%c1_121, %c7_122, %c0_123, %c0_124] : memref<2x10x1x128xf32, #tpu.memory_space<vmem>>, vector<1x1x1x128xf32>
    %161 = vector.shape_cast %160 : vector<1x1x1x128xf32> to vector<1x128xf32>
    %c1_125 = arith.constant 1 : index
    %c8_126 = arith.constant 8 : index
    %c0_127 = arith.constant 0 : index
    %c0_128 = arith.constant 0 : index
    %162 = vector.load %arg6[%c1_125, %c8_126, %c0_127, %c0_128] : memref<2x10x1x128xf32, #tpu.memory_space<vmem>>, vector<1x1x1x128xf32>
    %163 = vector.shape_cast %162 : vector<1x1x1x128xf32> to vector<1x128xf32>
    %c1_129 = arith.constant 1 : index
    %c9_130 = arith.constant 9 : index
    %c0_131 = arith.constant 0 : index
    %c0_132 = arith.constant 0 : index
    %164 = vector.load %arg6[%c1_129, %c9_130, %c0_131, %c0_132] : memref<2x10x1x128xf32, #tpu.memory_space<vmem>>, vector<1x1x1x128xf32>
    %165 = vector.shape_cast %164 : vector<1x1x1x128xf32> to vector<1x128xf32>
    %cst_133 = arith.constant dense<0.000000e+00> : vector<10xf32>
    %166 = vector.multi_reduction <add>, %145, %cst_133 [1] : vector<10x128xf32> to vector<10xf32>
    %167 = vector.shape_cast %166 : vector<10xf32> to vector<10x1xf32>
    %cst_134 = arith.constant 3.125000e-02 : f32
    %168 = vector.broadcast %cst_134 : f32 to vector<10x1xf32>
    %169 = arith.mulf %167, %168 : vector<10x1xf32>
    %170 = vector.broadcast %169 : vector<10x1xf32> to vector<10x128xf32>
    %171 = arith.subf %145, %170 : vector<10x128xf32>
    %172 = vector.broadcast %0 : vector<1x128xf32> to vector<10x128xf32>
    %173 = arith.mulf %171, %172 : vector<10x128xf32>
    %174 = arith.mulf %173, %173 : vector<10x128xf32>
    %cst_135 = arith.constant dense<0.000000e+00> : vector<10xf32>
    %175 = vector.multi_reduction <add>, %174, %cst_135 [1] : vector<10x128xf32> to vector<10xf32>
    %176 = vector.shape_cast %175 : vector<10xf32> to vector<10x1xf32>
    %cst_136 = arith.constant 3.125000e-02 : f32
    %177 = vector.broadcast %cst_136 : f32 to vector<10x1xf32>
    %178 = arith.mulf %176, %177 : vector<10x1xf32>
    %cst_137 = arith.constant 9.99999996E-13 : f32
    %179 = vector.broadcast %cst_137 : f32 to vector<10x1xf32>
    %180 = arith.addf %178, %179 : vector<10x1xf32>
    %181 = math.rsqrt %180 : vector<10x1xf32>
    %182 = vector.broadcast %181 : vector<10x1xf32> to vector<10x128xf32>
    %183 = arith.mulf %173, %182 : vector<10x128xf32>
    %184 = vector.broadcast %147 : vector<1x128xf32> to vector<10x128xf32>
    %185 = arith.mulf %183, %184 : vector<10x128xf32>
    %186 = vector.broadcast %149 : vector<1x128xf32> to vector<10x128xf32>
    %187 = arith.addf %185, %186 : vector<10x128xf32>
    %c1_138 = arith.constant 1 : index
    %c0_139 = arith.constant 0 : index
    %c0_140 = arith.constant 0 : index
    %c0_141 = arith.constant 0 : index
    %188 = vector.load %arg4[%c1_138, %c0_139, %c0_140, %c0_141] : memref<2x4x128x128xf32, #tpu.memory_space<vmem>>, vector<1x1x128x128xf32>
    %189 = vector.shape_cast %188 : vector<1x1x128x128xf32> to vector<128x128xf32>
    %cst_142 = arith.constant dense<0.000000e+00> : vector<10x128xf32>
    %190 = tpu.matmul %187, %189, %cst_142 {dimension_numbers = #tpu.dot_dimension_numbers<[1], [0], [0], [1], [0, 0, 1, 1], [], []>} : vector<10x128xf32>, vector<128x128xf32>, vector<10x128xf32> -> vector<10x128xf32>
    %191 = vector.broadcast %151 : vector<1x128xf32> to vector<10x128xf32>
    %192 = arith.addf %190, %191 : vector<10x128xf32>
    %c1_143 = arith.constant 1 : index
    %c1_144 = arith.constant 1 : index
    %c0_145 = arith.constant 0 : index
    %c0_146 = arith.constant 0 : index
    %193 = vector.load %arg4[%c1_143, %c1_144, %c0_145, %c0_146] : memref<2x4x128x128xf32, #tpu.memory_space<vmem>>, vector<1x1x128x128xf32>
    %194 = vector.shape_cast %193 : vector<1x1x128x128xf32> to vector<128x128xf32>
    %cst_147 = arith.constant dense<0.000000e+00> : vector<10x128xf32>
    %195 = tpu.matmul %187, %194, %cst_147 {dimension_numbers = #tpu.dot_dimension_numbers<[1], [0], [0], [1], [0, 0, 1, 1], [], []>} : vector<10x128xf32>, vector<128x128xf32>, vector<10x128xf32> -> vector<10x128xf32>
    %196 = vector.broadcast %153 : vector<1x128xf32> to vector<10x128xf32>
    %197 = arith.addf %195, %196 : vector<10x128xf32>
    %c1_148 = arith.constant 1 : index
    %c2_149 = arith.constant 2 : index
    %c0_150 = arith.constant 0 : index
    %c0_151 = arith.constant 0 : index
    %198 = vector.load %arg4[%c1_148, %c2_149, %c0_150, %c0_151] : memref<2x4x128x128xf32, #tpu.memory_space<vmem>>, vector<1x1x128x128xf32>
    %199 = vector.shape_cast %198 : vector<1x1x128x128xf32> to vector<128x128xf32>
    %cst_152 = arith.constant dense<0.000000e+00> : vector<10x128xf32>
    %200 = tpu.matmul %187, %199, %cst_152 {dimension_numbers = #tpu.dot_dimension_numbers<[1], [0], [0], [1], [0, 0, 1, 1], [], []>} : vector<10x128xf32>, vector<128x128xf32>, vector<10x128xf32> -> vector<10x128xf32>
    %201 = vector.broadcast %155 : vector<1x128xf32> to vector<10x128xf32>
    %202 = arith.addf %200, %201 : vector<10x128xf32>
    %203 = vector.shape_cast %192 : vector<10x128xf32> to vector<1x10x128xf32>
    %204 = vector.broadcast %203 : vector<1x10x128xf32> to vector<4x10x128xf32>
    %205 = vector.broadcast %1 : vector<4x1x128xf32> to vector<4x10x128xf32>
    %206 = arith.mulf %204, %205 : vector<4x10x128xf32>
    %207 = vector.shape_cast %197 : vector<10x128xf32> to vector<1x10x128xf32>
    %208 = vector.shape_cast %207 : vector<1x10x128xf32> to vector<1x10x128xf32>
    %209 = vector.broadcast %208 : vector<1x10x128xf32> to vector<4x10x128xf32>
    %210 = vector.shape_cast %202 : vector<10x128xf32> to vector<1x10x128xf32>
    %211 = vector.broadcast %210 : vector<1x10x128xf32> to vector<4x10x128xf32>
    %212 = vector.broadcast %1 : vector<4x1x128xf32> to vector<4x10x128xf32>
    %213 = arith.mulf %211, %212 : vector<4x10x128xf32>
    "tpu.trace_start"() <{level = 10 : i32, message = "hqd,hkd->hqk"}> : () -> ()
    %cst_153 = arith.constant dense<0.000000e+00> : vector<4x10x10xf32>
    %214 = tpu.matmul %206, %209, %cst_153 {dimension_numbers = #tpu.dot_dimension_numbers<[2], [2], [1], [1], [0, 0, 0, 1, 1, 1], [0], [0]>} : vector<4x10x128xf32>, vector<4x10x128xf32>, vector<4x10x10xf32> -> vector<4x10x10xf32>
    "tpu.trace_stop"() : () -> ()
    %cst_154 = arith.constant 0.353553385 : f32
    %215 = vector.broadcast %cst_154 : f32 to vector<4x10x10xf32>
    %216 = arith.mulf %214, %215 : vector<4x10x10xf32>
    %217 = vector.shape_cast %2 : vector<10x10xf32> to vector<1x10x10xf32>
    %218 = vector.broadcast %217 : vector<1x10x10xf32> to vector<4x10x10xf32>
    %219 = arith.addf %216, %218 : vector<4x10x10xf32>
    %cst_155 = arith.constant dense<0xFF800000> : vector<4x10xf32>
    %220 = vector.multi_reduction <maximumf>, %219, %cst_155 [2] : vector<4x10x10xf32> to vector<4x10xf32>
    %221 = vector.shape_cast %220 : vector<4x10xf32> to vector<4x10x1xf32>
    %222 = vector.broadcast %221 : vector<4x10x1xf32> to vector<4x10x10xf32>
    %223 = arith.subf %219, %222 : vector<4x10x10xf32>
    %224 = math.exp %223 : vector<4x10x10xf32>
    %cst_156 = arith.constant dense<0.000000e+00> : vector<4x10xf32>
    %225 = vector.multi_reduction <add>, %224, %cst_156 [2] : vector<4x10x10xf32> to vector<4x10xf32>
    %226 = vector.shape_cast %225 : vector<4x10xf32> to vector<4x10x1xf32>
    %227 = tpu.reciprocal %226 {approx = true} : vector<4x10x1xf32> -> vector<4x10x1xf32>
    %228 = vector.broadcast %227 : vector<4x10x1xf32> to vector<4x10x10xf32>
    %229 = arith.mulf %224, %228 : vector<4x10x10xf32>
    "tpu.trace_start"() <{level = 10 : i32, message = "hqk,hkd->hqd"}> : () -> ()
    %cst_157 = arith.constant dense<0.000000e+00> : vector<4x10x128xf32>
    %230 = tpu.matmul %229, %213, %cst_157 {dimension_numbers = #tpu.dot_dimension_numbers<[2], [1], [1], [2], [0, 0, 0, 1, 1, 2], [0], [0]>} : vector<4x10x10xf32>, vector<4x10x128xf32>, vector<4x10x128xf32> -> vector<4x10x128xf32>
    "tpu.trace_stop"() : () -> ()
    %cst_158 = arith.constant dense<0.000000e+00> : vector<10x128xf32>
    %231 = vector.multi_reduction <add>, %230, %cst_158 [0] : vector<4x10x128xf32> to vector<10x128xf32>
    %c1_159 = arith.constant 1 : index
    %c3_160 = arith.constant 3 : index
    %c0_161 = arith.constant 0 : index
    %c0_162 = arith.constant 0 : index
    %232 = vector.load %arg4[%c1_159, %c3_160, %c0_161, %c0_162] : memref<2x4x128x128xf32, #tpu.memory_space<vmem>>, vector<1x1x128x128xf32>
    %233 = vector.shape_cast %232 : vector<1x1x128x128xf32> to vector<128x128xf32>
    %cst_163 = arith.constant dense<0.000000e+00> : vector<10x128xf32>
    %234 = tpu.matmul %231, %233, %cst_163 {dimension_numbers = #tpu.dot_dimension_numbers<[1], [0], [0], [1], [0, 0, 1, 1], [], []>} : vector<10x128xf32>, vector<128x128xf32>, vector<10x128xf32> -> vector<10x128xf32>
    %235 = vector.broadcast %157 : vector<1x128xf32> to vector<10x128xf32>
    %236 = arith.addf %234, %235 : vector<10x128xf32>
    %237 = arith.addf %145, %236 : vector<10x128xf32>
    %cst_164 = arith.constant dense<0.000000e+00> : vector<10xf32>
    %238 = vector.multi_reduction <add>, %237, %cst_164 [1] : vector<10x128xf32> to vector<10xf32>
    %239 = vector.shape_cast %238 : vector<10xf32> to vector<10x1xf32>
    %cst_165 = arith.constant 3.125000e-02 : f32
    %240 = vector.broadcast %cst_165 : f32 to vector<10x1xf32>
    %241 = arith.mulf %239, %240 : vector<10x1xf32>
    %242 = vector.broadcast %241 : vector<10x1xf32> to vector<10x128xf32>
    %243 = arith.subf %237, %242 : vector<10x128xf32>
    %244 = vector.broadcast %0 : vector<1x128xf32> to vector<10x128xf32>
    %245 = arith.mulf %243, %244 : vector<10x128xf32>
    %246 = arith.mulf %245, %245 : vector<10x128xf32>
    %cst_166 = arith.constant dense<0.000000e+00> : vector<10xf32>
    %247 = vector.multi_reduction <add>, %246, %cst_166 [1] : vector<10x128xf32> to vector<10xf32>
    %248 = vector.shape_cast %247 : vector<10xf32> to vector<10x1xf32>
    %cst_167 = arith.constant 3.125000e-02 : f32
    %249 = vector.broadcast %cst_167 : f32 to vector<10x1xf32>
    %250 = arith.mulf %248, %249 : vector<10x1xf32>
    %cst_168 = arith.constant 9.99999996E-13 : f32
    %251 = vector.broadcast %cst_168 : f32 to vector<10x1xf32>
    %252 = arith.addf %250, %251 : vector<10x1xf32>
    %253 = math.rsqrt %252 : vector<10x1xf32>
    %254 = vector.broadcast %253 : vector<10x1xf32> to vector<10x128xf32>
    %255 = arith.mulf %245, %254 : vector<10x128xf32>
    %256 = vector.broadcast %159 : vector<1x128xf32> to vector<10x128xf32>
    %257 = arith.mulf %255, %256 : vector<10x128xf32>
    %258 = vector.broadcast %161 : vector<1x128xf32> to vector<10x128xf32>
    %259 = arith.addf %257, %258 : vector<10x128xf32>
    %c1_169 = arith.constant 1 : index
    %c0_170 = arith.constant 0 : index
    %c0_171 = arith.constant 0 : index
    %c0_172 = arith.constant 0 : index
    %260 = vector.load %arg5[%c1_169, %c0_170, %c0_171, %c0_172] : memref<2x2x128x128xf32, #tpu.memory_space<vmem>>, vector<1x1x128x128xf32>
    %261 = vector.shape_cast %260 : vector<1x1x128x128xf32> to vector<128x128xf32>
    %cst_173 = arith.constant dense<0.000000e+00> : vector<10x128xf32>
    %262 = tpu.matmul %259, %261, %cst_173 {dimension_numbers = #tpu.dot_dimension_numbers<[1], [0], [0], [1], [0, 0, 1, 1], [], []>} : vector<10x128xf32>, vector<128x128xf32>, vector<10x128xf32> -> vector<10x128xf32>
    %263 = vector.broadcast %163 : vector<1x128xf32> to vector<10x128xf32>
    %264 = arith.addf %262, %263 : vector<10x128xf32>
    %265 = arith.mulf %264, %264 : vector<10x128xf32>
    %266 = arith.mulf %264, %265 : vector<10x128xf32>
    %cst_174 = arith.constant 4.471500e-02 : f32
    %267 = vector.broadcast %cst_174 : f32 to vector<10x128xf32>
    %268 = arith.mulf %267, %266 : vector<10x128xf32>
    %269 = arith.addf %264, %268 : vector<10x128xf32>
    %cst_175 = arith.constant 0.797884583 : f32
    %270 = vector.broadcast %cst_175 : f32 to vector<10x128xf32>
    %271 = arith.mulf %270, %269 : vector<10x128xf32>
    %272 = math.tanh %271 : vector<10x128xf32>
    %cst_176 = arith.constant 1.000000e+00 : f32
    %273 = vector.broadcast %cst_176 : f32 to vector<10x128xf32>
    %274 = arith.addf %273, %272 : vector<10x128xf32>
    %cst_177 = arith.constant 5.000000e-01 : f32
    %275 = vector.broadcast %cst_177 : f32 to vector<10x128xf32>
    %276 = arith.mulf %275, %274 : vector<10x128xf32>
    %277 = arith.mulf %264, %276 : vector<10x128xf32>
    %c1_178 = arith.constant 1 : index
    %c1_179 = arith.constant 1 : index
    %c0_180 = arith.constant 0 : index
    %c0_181 = arith.constant 0 : index
    %278 = vector.load %arg5[%c1_178, %c1_179, %c0_180, %c0_181] : memref<2x2x128x128xf32, #tpu.memory_space<vmem>>, vector<1x1x128x128xf32>
    %279 = vector.shape_cast %278 : vector<1x1x128x128xf32> to vector<128x128xf32>
    %cst_182 = arith.constant dense<0.000000e+00> : vector<10x128xf32>
    %280 = tpu.matmul %277, %279, %cst_182 {dimension_numbers = #tpu.dot_dimension_numbers<[1], [0], [0], [1], [0, 0, 1, 1], [], []>} : vector<10x128xf32>, vector<128x128xf32>, vector<10x128xf32> -> vector<10x128xf32>
    %281 = vector.broadcast %165 : vector<1x128xf32> to vector<10x128xf32>
    %282 = arith.addf %280, %281 : vector<10x128xf32>
    %283 = arith.addf %237, %282 : vector<10x128xf32>
    %c0_183 = arith.constant 0 : index
    %c0_184 = arith.constant 0 : index
    %284 = vector.load %arg12[%c0_183, %c0_184] : memref<2x10xf32, #tpu.memory_space<vmem>>, vector<2x10xf32>
    %cst_185 = arith.constant dense<0.000000e+00> : vector<2x128xf32>
    %285 = tpu.matmul %284, %283, %cst_185 {dimension_numbers = #tpu.dot_dimension_numbers<[1], [0], [0], [1], [0, 0, 1, 1], [], []>} : vector<2x10xf32>, vector<10x128xf32>, vector<2x128xf32> -> vector<2x128xf32>
    %c0_186 = arith.constant 0 : index
    %c0_187 = arith.constant 0 : index
    %c0_188 = arith.constant 0 : index
    %286 = vector.load %arg7[%c0_186, %c0_187, %c0_188] : memref<3x1x128xf32, #tpu.memory_space<vmem>>, vector<1x1x128xf32>
    %287 = vector.shape_cast %286 : vector<1x1x128xf32> to vector<1x128xf32>
    %c1_189 = arith.constant 1 : index
    %c0_190 = arith.constant 0 : index
    %c0_191 = arith.constant 0 : index
    %288 = vector.load %arg7[%c1_189, %c0_190, %c0_191] : memref<3x1x128xf32, #tpu.memory_space<vmem>>, vector<1x1x128xf32>
    %289 = vector.shape_cast %288 : vector<1x1x128xf32> to vector<1x128xf32>
    %cst_192 = arith.constant dense<0.000000e+00> : vector<2xf32>
    %290 = vector.multi_reduction <add>, %285, %cst_192 [1] : vector<2x128xf32> to vector<2xf32>
    %291 = vector.shape_cast %290 : vector<2xf32> to vector<2x1xf32>
    %cst_193 = arith.constant 3.125000e-02 : f32
    %292 = vector.broadcast %cst_193 : f32 to vector<2x1xf32>
    %293 = arith.mulf %291, %292 : vector<2x1xf32>
    %294 = vector.broadcast %293 : vector<2x1xf32> to vector<2x128xf32>
    %295 = arith.subf %285, %294 : vector<2x128xf32>
    %296 = vector.broadcast %0 : vector<1x128xf32> to vector<2x128xf32>
    %297 = arith.mulf %295, %296 : vector<2x128xf32>
    %298 = arith.mulf %297, %297 : vector<2x128xf32>
    %cst_194 = arith.constant dense<0.000000e+00> : vector<2xf32>
    %299 = vector.multi_reduction <add>, %298, %cst_194 [1] : vector<2x128xf32> to vector<2xf32>
    %300 = vector.shape_cast %299 : vector<2xf32> to vector<2x1xf32>
    %cst_195 = arith.constant 3.125000e-02 : f32
    %301 = vector.broadcast %cst_195 : f32 to vector<2x1xf32>
    %302 = arith.mulf %300, %301 : vector<2x1xf32>
    %cst_196 = arith.constant 9.99999996E-13 : f32
    %303 = vector.broadcast %cst_196 : f32 to vector<2x1xf32>
    %304 = arith.addf %302, %303 : vector<2x1xf32>
    %305 = math.rsqrt %304 : vector<2x1xf32>
    %306 = vector.broadcast %305 : vector<2x1xf32> to vector<2x128xf32>
    %307 = arith.mulf %297, %306 : vector<2x128xf32>
    %308 = vector.broadcast %287 : vector<1x128xf32> to vector<2x128xf32>
    %309 = arith.mulf %307, %308 : vector<2x128xf32>
    %310 = vector.broadcast %289 : vector<1x128xf32> to vector<2x128xf32>
    %311 = arith.addf %309, %310 : vector<2x128xf32>
    %c0_197 = arith.constant 0 : index
    %c0_198 = arith.constant 0 : index
    %312 = vector.load %arg8[%c0_197, %c0_198] : memref<128x128xf32, #tpu.memory_space<vmem>>, vector<128x128xf32>
    %cst_199 = arith.constant dense<0.000000e+00> : vector<2x128xf32>
    %313 = tpu.matmul %311, %312, %cst_199 {dimension_numbers = #tpu.dot_dimension_numbers<[1], [0], [0], [1], [0, 0, 1, 1], [], []>} : vector<2x128xf32>, vector<128x128xf32>, vector<2x128xf32> -> vector<2x128xf32>
    %c2_200 = arith.constant 2 : index
    %c0_201 = arith.constant 0 : index
    %c0_202 = arith.constant 0 : index
    %314 = vector.load %arg7[%c2_200, %c0_201, %c0_202] : memref<3x1x128xf32, #tpu.memory_space<vmem>>, vector<1x1x128xf32>
    %315 = vector.shape_cast %314 : vector<1x1x128xf32> to vector<1x128xf32>
    %316 = vector.broadcast %315 : vector<1x128xf32> to vector<2x128xf32>
    %317 = arith.addf %313, %316 : vector<2x128xf32>
    %c0_203 = arith.constant 0 : index
    %c0_204 = arith.constant 0 : index
    %318 = vector.load %arg13[%c0_203, %c0_204] : memref<2x128xf32, #tpu.memory_space<vmem>>, vector<2x128xf32>
    tpu.vector_store %arg13[%c0_203, %c0_204], %317 {strides = array<i32>} : memref<2x128xf32, #tpu.memory_space<vmem>>, vector<2x128xf32>,
    return
  }
  func.func @transform_0(%arg0: i32) -> (i32, i32) {
    %c0_i32 = arith.constant 0 : i32
    %c0_i32_0 = arith.constant 0 : i32
    %c0_i32_1 = arith.constant 0 : i32
    return %c0_i32, %c0_i32_0 : i32, i32
  }
  func.func @transform_1(%arg0: i32) -> (i32, i32) {
    %c0_i32 = arith.constant 0 : i32
    %c0_i32_0 = arith.constant 0 : i32
    %c0_i32_1 = arith.constant 0 : i32
    return %c0_i32, %c0_i32_0 : i32, i32
  }
  func.func @transform_2(%arg0: i32) -> (i32, i32) {
    %c0_i32 = arith.constant 0 : i32
    %c0_i32_0 = arith.constant 0 : i32
    %c0_i32_1 = arith.constant 0 : i32
    return %c0_i32, %c0_i32_0 : i32, i32
  }
  func.func @transform_3(%arg0: i32) -> (i32, i32, i32, i32) {
    %c0_i32 = arith.constant 0 : i32
    %c0_i32_0 = arith.constant 0 : i32
    %c0_i32_1 = arith.constant 0 : i32
    %c0_i32_2 = arith.constant 0 : i32
    %c0_i32_3 = arith.constant 0 : i32
    return %c0_i32, %c0_i32_0, %c0_i32_1, %c0_i32_2 : i32, i32, i32, i32
  }
  func.func @transform_4(%arg0: i32) -> (i32, i32, i32, i32) {
    %c0_i32 = arith.constant 0 : i32
    %c0_i32_0 = arith.constant 0 : i32
    %c0_i32_1 = arith.constant 0 : i32
    %c0_i32_2 = arith.constant 0 : i32
    %c0_i32_3 = arith.constant 0 : i32
    return %c0_i32, %c0_i32_0, %c0_i32_1, %c0_i32_2 : i32, i32, i32, i32
  }
  func.func @transform_5(%arg0: i32) -> (i32, i32, i32, i32) {
    %c0_i32 = arith.constant 0 : i32
    %c0_i32_0 = arith.constant 0 : i32
    %c0_i32_1 = arith.constant 0 : i32
    %c0_i32_2 = arith.constant 0 : i32
    %c0_i32_3 = arith.constant 0 : i32
    return %c0_i32, %c0_i32_0, %c0_i32_1, %c0_i32_2 : i32, i32, i32, i32
  }
  func.func @transform_6(%arg0: i32) -> (i32, i32, i32) {
    %c0_i32 = arith.constant 0 : i32
    %c0_i32_0 = arith.constant 0 : i32
    %c0_i32_1 = arith.constant 0 : i32
    %c0_i32_2 = arith.constant 0 : i32
    return %c0_i32, %c0_i32_0, %c0_i32_1 : i32, i32, i32
  }
  func.func @transform_7(%arg0: i32) -> (i32, i32) {
    %c0_i32 = arith.constant 0 : i32
    %c0_i32_0 = arith.constant 0 : i32
    %c0_i32_1 = arith.constant 0 : i32
    return %c0_i32, %c0_i32_0 : i32, i32
  }
  func.func @transform_8(%arg0: i32) -> (i32, i32) {
    %c0_i32 = arith.constant 0 : i32
    %c0_i32_0 = arith.constant 0 : i32
    %c0_i32_1 = arith.constant 0 : i32
    return %c0_i32, %c0_i32_0 : i32, i32
  }
  func.func @transform_9(%arg0: i32) -> (i32, i32, i32) {
    %c0_i32 = arith.constant 0 : i32
    %c0_i32_0 = arith.constant 0 : i32
    %c0_i32_1 = arith.constant 0 : i32
    %c0_i32_2 = arith.constant 0 : i32
    return %c0_i32, %c0_i32_0, %c0_i32_1 : i32, i32, i32
  }
  func.func @transform_10(%arg0: i32) -> (i32, i32) {
    %c0_i32 = arith.constant 0 : i32
    %c0_i32_0 = arith.constant 0 : i32
    %c0_i32_1 = arith.constant 0 : i32
    return %c0_i32, %c0_i32_0 : i32, i32
  }
  func.func @transform_11(%arg0: i32) -> (i32, i32) {
    %c0_i32 = arith.constant 0 : i32
    %c0_i32_0 = arith.constant 0 : i32
    %c0_i32_1 = arith.constant 0 : i32
    return %c0_i32, %c0_i32_0 : i32, i32
  }
  func.func @transform_12(%arg0: i32) -> (i32, i32) {
    %c0_i32 = arith.constant 0 : i32
    %c0_i32_0 = arith.constant 0 : i32
    %c0_i32_1 = arith.constant 0 : i32
    return %c0_i32, %c0_i32_0 : i32, i32
  }
}

</mosaic_0001>

<bundles_post_ra>
// kernel: vit_cls_forward.1
= control target key start
LH: loop header
LB: loop body
LE: loop exit
PB: predicated region body
PF: predicated region fallthrough
CT: control target
= control target key end

     0   :  { %17 = vsyncpa [#allocation3], 0  ;;  %s5312_s0 = inlined_call_operand.vmem [shape: f32[10,192], index: 0, kind: input, shape index: {}]   ;;  %s5313_s1 = inlined_call_operand.vmem [shape: f32[192,128], index: 1, kind: input, shape index: {}]   ;;  %s5314_s2 = inlined_call_operand.vmem [shape: f32[10,128], index: 2, kind: input, shape index: {}]   ;;  %s5315_s3 = inlined_call_operand.hbm [shape: f32[2,4,128,128], index: 3, kind: input, shape index: {}]   ;;  %s5316_s4 = inlined_call_operand.vmem [shape: f32[2,2,128,128], index: 4, kind: input, shape index: {}]   ;;  %s5317_s5 = inlined_call_operand.vmem [shape: f32[2,10,1,128], index: 5, kind: input, shape index: {}]   ;;  %s5318_s6 = inlined_call_operand.vmem [shape: f32[3,1,128], index: 6, kind: input, shape index: {}]   ;;  %s5319_s7 = inlined_call_operand.vmem [shape: f32[128,128], index: 7, kind: input, shape index: {}]   ;;  %s5320_s8 = inlined_call_operand.vmem [shape: f32[1,128], index: 8, kind: input, shape index: {}]   ;;  %s5321_s9 = inlined_call_operand.vmem [shape: f32[4,1,128], index: 9, kind: input, shape index: {}]   ;;  %s5322_s10 = inlined_call_operand.vmem [shape: f32[10,10], index: 10, kind: input, shape index: {}]   ;;  %s5323_s11 = inlined_call_operand.vmem [shape: f32[2,10], index: 11, kind: input, shape index: {}]   ;;  %s5324_s12 = inlined_call_operand.hbm [shape: f32[2,128], index: 12, kind: output, shape index: {}]  }
   0x1   :  { %18 = vsyncpa [#allocation4], 0  ;;  %s4530_s21 = smov [#allocation2]  }
   0x2   :  { %s30_s22 = sshll.u32 %s4530_s21, 4  ;;  %s31_s22 = int_to_ptr.vmem [resolvable:$true] %s30_s22 }
   0x3   :  { %s4494_s23 = scalar_lea.vmem %s31_s22, 16384  ;;  %p4499_p1 = scmp.lt.s32.totalorder %s31_s22, %s31_s22 }
   0x4   :  { %p4495_p0 = scmp.ne.s32.totalorder %s31_s22, %s4494_s23  ;;  %p4500_p2 = scmp.lt.s32.totalorder %s4494_s23, %s4494_s23 }
   0x6   :  { %p4501_p3 = por %p4500_p2, %p4499_p1 }
   0x8   :  { %p4502_p4 = pnand %p4501_p3, %p4495_p0 }
   0xa   :  { %4505 = shalt.err (!%p4502_p4)
}
   0xb   :  { %s4531_s24 = smov 128   ;;  %s4532_s25 = smov 8  }
   0xc   :  { %36 = dma.hbm_to_vmem [thread:$0]  %s5315_s3, 16384, %s31_s22, [#allocation3], %s4531_s24, %s4531_s24, %s4532_s25  }
   0xd   :  { %4526 = dma.done.wait [#allocation3], 16384  }
   0xe   :  { %4527 = vsyncadd [#allocation3], 4294950912  ;;  %v4533_v0 = vmov 0.0   ;;  %v82_v1 = vld [vmem:[%s5313_s1 + $0x78] sm:$0xff]  ;;  %v81_v2 = vld [vmem:[%s5313_s1 + $0x70] sm:$0xff]  ;;  %vm93_vm0 = vcmask 523264  }
   0xf   :  { %100 = vmatprep.subr.mxu0 %v4533_v0  ;;  %v80_v3 = vld [vmem:[%s5313_s1 + $0x68] sm:$0xff]  ;;  %v79_v4 = vld [vmem:[%s5313_s1 + $0x60] sm:$0xff]  ;;  %v78_v5 = vld [vmem:[%s5313_s1 + $0x58] sm:$0xff]  ;;  %vm196_vm1 = vcmask 1041408   ;;  %vm896_vm2 = vcmask 74752   ;;  %vm892_vm3 = vcmask 80896  }
  0x10   :  { %101 = vmatpush1.msra.mxu0 %v82_v1  ;;  %v77_v6 = vld [vmem:[%s5313_s1 + $0x50] sm:$0xff]  ;;  %v64_v7 = vld [vmem:[%s5312_s0 + $0x8] sm:$0xff]  ;;  %v75_v9 = vld [vmem:[%s5313_s1 + $0x40] sm:$0xff]  ;;  %vm4534_vm4 = vmmov 0  }
  0x11   :  { %102 = vmatprep.subr.mxu0 %v4533_v0  ;;  %3383 = vmatprep.mubr.msk.f32.mxu0 %vm93_vm0, %v64_v7  ;;  %v76_v8 = vld [vmem:[%s5313_s1 + $0x48] sm:$0xff]  ;;  %v74_v10 = vld [vmem:[%s5313_s1 + $0x38] sm:$0xff]  ;;  %v73_v11 = vld [vmem:[%s5313_s1 + $0x30] sm:$0xff] }
  0x12   :  { %103 = vmatpush1.msra.mxu0 %v81_v2  ;;  %v72_v12 = vld [vmem:[%s5313_s1 + $0x28] sm:$0xff]  ;;  %v71_v13 = vld [vmem:[%s5313_s1 + $0x20] sm:$0xff]  ;;  %v70_v14 = vld [vmem:[%s5313_s1 + $0x18] sm:$0xff] }
  0x13   :  { %104 = vmatprep.subr.mxu0 %v4533_v0  ;;  %v69_v15 = vld [vmem:[%s5313_s1 + $0x10] sm:$0xff]  ;;  %v68_v16 = vld [vmem:[%s5313_s1 + $0x8] sm:$0xff]  ;;  %v67_v17 = vld [vmem:[%s5313_s1] sm:$0xff] }
  0x14   :  { %105 = vmatpush1.msra.mxu0 %v80_v3  ;;  %v90_v18 = vld [vmem:[%s5313_s1 + $0xb8] sm:$0xff]  ;;  %v89_v19 = vld [vmem:[%s5313_s1 + $0xb0] sm:$0xff]  ;;  %v88_v20 = vld [vmem:[%s5313_s1 + $0xa8] sm:$0xff] }
  0x15   :  { %106 = vmatprep.subr.mxu0 %v4533_v0  ;;  %v87_v21 = vld [vmem:[%s5313_s1 + $0xa0] sm:$0xff]  ;;  %v86_v22 = vld [vmem:[%s5313_s1 + $0x98] sm:$0xff]  ;;  %v85_v23 = vld [vmem:[%s5313_s1 + $0x90] sm:$0xff] }
  0x16   :  { %107 = vmatpush1.msra.mxu0 %v79_v4  ;;  %v84_v24 = vld [vmem:[%s5313_s1 + $0x88] sm:$0xff]  ;;  %v83_v25 = vld [vmem:[%s5313_s1 + $0x80] sm:$0xff]  ;;  %v66_v27 = vld [vmem:[%s5312_s0 + $0x18] sm:$0x3] }
  0x17   :  { %108 = vmatprep.subr.mxu0 %v4533_v0  ;;  %v63_v26 = vld [vmem:[%s5312_s0] sm:$0xff]  ;;  %v65_v28 = vld [vmem:[%s5312_s0 + $0x10] sm:$0x3]  ;;  %v92_v33 = vld [vmem:[%s5314_s2 + $0x8] sm:$0x3]  ;;  %s4535_s0 = smov [#allocation5]  }
  0x18   :  { %109 = vmatpush1.msra.mxu0 %v78_v5  ;;  %v91_v29 = vld [vmem:[%s5314_s2] sm:$0xff]  ;;  %v258_v38 = vld [vmem:[#allocation2 + $0x78] sm:$0xff]  ;;  %v257_v40 = vld [vmem:[#allocation2 + $0x70] sm:$0xff]  ;;  %s3374_s2 = sshll.u32 %s4535_s0, 4  ;;  %s3375_s2 = int_to_ptr.vmem [resolvable:$true] %s3374_s2 }
  0x19   :  { %110 = vmatprep.subr.mxu0 %v4533_v0  ;;  %v454_v39 = vld [vmem:[#allocation2 + $0x178] sm:$0xff]  ;;  %3808 = vmatprep.subr.mxu1 %v258_v38  ;;  %v4730_v43 = vld [vmem:[%s5320_s8] ss:$0 sm:$0xff]  ;;  %v453_v53 = vld [vmem:[#allocation2 + $0x170] sm:$0xff]  ;;  %s4506_s30 = scalar_lea.vmem %s3375_s2, 32  ;;  %p4511_p6 = scmp.lt.s32.totalorder %s3375_s2, %s3375_s2 }
  0x1a   :  { %111 = vmatpush1.msra.mxu0 %v77_v6  ;;  %3809 = vmatpush3.msra.mxu1 %v258_v38  ;;  %v256_v54 = vld [vmem:[#allocation2 + $0x68] sm:$0xff]  ;;  %v255_v56 = vld [vmem:[#allocation2 + $0x60] sm:$0xff]  ;;  %v254_v58 = vld [vmem:[#allocation2 + $0x58] sm:$0xff]  ;;  %p4507_p5 = scmp.ne.s32.totalorder %s3375_s2, %s4506_s30  ;;  %p4512_p7 = scmp.lt.s32.totalorder %s4506_s30, %s4506_s30 }
  0x1b   :  { %112 = vmatprep.subr.mxu0 %v4533_v0  ;;  %3810 = vmatprep.subr.mxu1 %v257_v40  ;;  %v452_v55 = vld [vmem:[#allocation2 + $0x168] sm:$0xff]  ;;  %v451_v57 = vld [vmem:[#allocation2 + $0x160] sm:$0xff]  ;;  %v450_v59 = vld [vmem:[#allocation2 + $0x158] sm:$0xff] }
  0x1c   :  { %113 = vmatpush1.msra.mxu0 %v76_v8  ;;  %3811 = vmatpush3.msra.mxu1 %v257_v40  ;;  %v253_v60 = vld [vmem:[#allocation2 + $0x50] sm:$0xff]  ;;  %v252_v62 = vld [vmem:[#allocation2 + $0x48] sm:$0xff]  ;;  %v251_v1 = vld [vmem:[#allocation2 + $0x40] sm:$0xff]  ;;  %p4513_p8 = por %p4512_p7, %p4511_p6 }
  0x1d   :  { %114 = vmatprep.subr.mxu0 %v4533_v0  ;;  %3812 = vmatprep.subr.mxu1 %v256_v54  ;;  %v449_v61 = vld [vmem:[#allocation2 + $0x150] sm:$0xff]  ;;  %v448_v63 = vld [vmem:[#allocation2 + $0x148] sm:$0xff]  ;;  %v447_v2 = vld [vmem:[#allocation2 + $0x140] sm:$0xff] }
  0x1e   :  { %115 = vmatpush1.msra.mxu0 %v75_v9  ;;  %3813 = vmatpush3.msra.mxu1 %v256_v54  ;;  %v250_v3 = vld [vmem:[#allocation2 + $0x38] sm:$0xff]  ;;  %v249_v5 = vld [vmem:[#allocation2 + $0x30] sm:$0xff]  ;;  %v248_v7 = vld [vmem:[#allocation2 + $0x28] sm:$0xff]  ;;  %p4514_p9 = pnand %p4513_p8, %p4507_p5 }
  0x1f   :  { %116 = vmatprep.subr.mxu0 %v4533_v0  ;;  %3814 = vmatprep.subr.mxu1 %v255_v56  ;;  %v446_v4 = vld [vmem:[#allocation2 + $0x138] sm:$0xff]  ;;  %v445_v6 = vld [vmem:[#allocation2 + $0x130] sm:$0xff]  ;;  %v444_v8 = vld [vmem:[#allocation2 + $0x128] sm:$0xff] }
  0x20   :  { %117 = vmatpush1.msra.mxu0 %v74_v10  ;;  %3815 = vmatpush3.msra.mxu1 %v255_v56  ;;  %v247_v9 = vld [vmem:[#allocation2 + $0x20] sm:$0xff]  ;;  %v355_v38 = vld [vmem:[#allocation2 + $0xf0] sm:$0xff] }
  0x21   :  { %118 = vmatprep.subr.mxu0 %v4533_v0  ;;  %3816 = vmatprep.subr.mxu1 %v254_v58  ;;  %v443_v10 = vld [vmem:[#allocation2 + $0x120] sm:$0xff] }
  0x22   :  { %119 = vmatpush1.msra.mxu0 %v73_v11  ;;  %3817 = vmatpush3.msra.mxu1 %v254_v58  ;;  %v246_v11 = vld [vmem:[#allocation2 + $0x18] sm:$0xff]  ;;  %v353_v40 = vld [vmem:[#allocation2 + $0xe0] sm:$0xff] }
  0x23   :  { %120 = vmatprep.subr.mxu0 %v4533_v0  ;;  %3818 = vmatprep.subr.mxu1 %v253_v60  ;;  %v3400_v58 = vld [vmem:[%s5321_s9] ss:$0 sm:$0xff] }
  0x24   :  { %121 = vmatpush1.msra.mxu0 %v72_v12  ;;  %3819 = vmatpush3.msra.mxu1 %v253_v60  ;;  %v442_v12 = vld [vmem:[#allocation2 + $0x118] sm:$0xff] }
  0x25   :  { %122 = vmatprep.subr.mxu0 %v4533_v0  ;;  %3820 = vmatprep.subr.mxu1 %v252_v62 }
  0x26   :  { %123 = vmatpush1.msra.mxu0 %v71_v13  ;;  %3821 = vmatpush3.msra.mxu1 %v252_v62  ;;  %v245_v13 = vld [vmem:[#allocation2 + $0x10] sm:$0xff]  ;;  %v3398_v62 = vld [vmem:[%s5317_s5 + $0x3] ss:$0 sm:$0xff] }
  0x27   :  { %124 = vmatprep.subr.mxu0 %v4533_v0  ;;  %3822 = vmatprep.subr.mxu1 %v251_v1 }
  0x28   :  { %125 = vmatpush1.msra.mxu0 %v70_v14  ;;  %3823 = vmatpush3.msra.mxu1 %v251_v1  ;;  %v441_v14 = vld [vmem:[#allocation2 + $0x110] sm:$0xff]  ;;  %v3399_v1 = vld [vmem:[%s5317_s5 + $0x4] ss:$0 sm:$0xff] }
  0x29   :  { %126 = vmatprep.subr.mxu0 %v4533_v0  ;;  %3824 = vmatprep.subr.mxu1 %v250_v3 }
  0x2a   :  { %127 = vmatpush1.msra.mxu0 %v69_v15  ;;  %3825 = vmatpush3.msra.mxu1 %v250_v3  ;;  %v244_v15 = vld [vmem:[#allocation2 + $0x8] sm:$0xff] }
  0x2b   :  { %128 = vmatprep.subr.mxu0 %v4533_v0  ;;  %3826 = vmatprep.subr.mxu1 %v249_v5 }
  0x2c   :  { %129 = vmatpush1.msra.mxu0 %v68_v16  ;;  %3827 = vmatpush3.msra.mxu1 %v249_v5  ;;  %v440_v16 = vld [vmem:[#allocation2 + $0x108] sm:$0xff] }
  0x2d   :  { %130 = vmatprep.subr.mxu0 %v4533_v0  ;;  %3828 = vmatprep.subr.mxu1 %v248_v7 }
  0x2e   :  { %131 = vmatpush1.msra.mxu0 %v67_v17  ;;  %3829 = vmatpush3.msra.mxu1 %v248_v7  ;;  %v243_v17 = vld [vmem:[#allocation2] sm:$0xff] }
  0x2f   :  { %148 = vmatprep.subr.mxu0 %v4533_v0  ;;  %3830 = vmatprep.subr.mxu1 %v247_v9 }
  0x30   :  { %149 = vmatpush2.msra.mxu0 %v90_v18  ;;  %3831 = vmatpush3.msra.mxu1 %v247_v9  ;;  %v439_v18 = vld [vmem:[#allocation2 + $0x100] sm:$0xff] }
  0x31   :  { %150 = vmatprep.subr.mxu0 %v4533_v0  ;;  %3832 = vmatprep.subr.mxu1 %v246_v11 }
  0x32   :  { %151 = vmatpush2.msra.mxu0 %v89_v19  ;;  %3833 = vmatpush3.msra.mxu1 %v246_v11  ;;  %v356_v19 = vld [vmem:[#allocation2 + $0xf8] sm:$0xff] }
  0x33   :  { %152 = vmatprep.subr.mxu0 %v4533_v0  ;;  %3834 = vmatprep.subr.mxu1 %v245_v13 }
  0x34   :  { %153 = vmatpush2.msra.mxu0 %v88_v20  ;;  %3835 = vmatpush3.msra.mxu1 %v245_v13  ;;  %v3401_v13 = vld [vmem:[%s5321_s9 + $0x1] ss:$0 sm:$0xff] }
  0x35   :  { %154 = vmatprep.subr.mxu0 %v4533_v0  ;;  %3836 = vmatprep.subr.mxu1 %v244_v15 }
  0x36   :  { %155 = vmatpush2.msra.mxu0 %v87_v21  ;;  %3837 = vmatpush3.msra.mxu1 %v244_v15 }
  0x37   :  { %156 = vmatprep.subr.mxu0 %v4533_v0  ;;  %3838 = vmatprep.subr.mxu1 %v243_v17 }
  0x38   :  { %157 = vmatpush2.msra.mxu0 %v86_v22  ;;  %3839 = vmatpush3.msra.mxu1 %v243_v17 }
  0x39   :  { %158 = vmatprep.subr.mxu0 %v4533_v0  ;;  %3843 = vmatprep.subr.mxu1 %v356_v19 }
  0x3a   :  { %159 = vmatpush2.msra.mxu0 %v85_v23 }
  0x3b   :  { %160 = vmatprep.subr.mxu0 %v4533_v0 }
  0x3c   :  { %161 = vmatpush2.msra.mxu0 %v84_v24 }
  0x3d   :  { %162 = vmatprep.subr.mxu0 %v4533_v0 }
  0x3e   :  { %163 = vmatpush2.msra.mxu0 %v83_v25 }
  0x3f   :  { %165 = vmatmul.mubr.f32.vlgmr.msra.gmra.mxu0 %v63_v26  ;;  %3878 = vmatprep.subr.mxu0 %v454_v39 }
  0x40   :  { %3384 = vmatprep.mubr.msk.f32.mxu0 %vm93_vm0, %v66_v27  ;;  %3879 = vmatpush3.msra.mxu0 %v454_v39  ;;  %v3395_v27 = vld [vmem:[%s5317_s5] ss:$0 sm:$0xff]  ;;  %v354_v39 = vld [vmem:[#allocation2 + $0xe8] sm:$0xff] }
  0x41   :  { %3880 = vmatprep.subr.mxu0 %v453_v53 }
  0x42   :  { %3881 = vmatpush3.msra.mxu0 %v453_v53  ;;  %v341_v53 = vld [vmem:[#allocation2 + $0x80] sm:$0xff] }
  0x43   :  { %170 = vmatmul.mubr.f32.gmra.mxu0 %v65_v28  ;;  %3882 = vmatprep.subr.mxu0 %v452_v55 }
  0x44   :  { %3883 = vmatpush3.msra.mxu0 %v452_v55  ;;  %v3397_v55 = vld [vmem:[%s5317_s5 + $0x2] ss:$0 sm:$0xff] }
  0x45   :  { %3884 = vmatprep.subr.mxu0 %v451_v57 }
  0x46   :  { %3885 = vmatpush3.msra.mxu0 %v451_v57 }
  0x47   :  { %3886 = vmatprep.subr.mxu0 %v450_v59 }
  0x48   :  { %3887 = vmatpush3.msra.mxu0 %v450_v59  ;;  %v4762_v59 = vld [vmem:[%s5321_s9 + $0x2] ss:$0 sm:$0xff] }
  0x49   :  { %3888 = vmatprep.subr.mxu0 %v449_v61 }
  0x4a   :  { %3889 = vmatpush3.msra.mxu0 %v449_v61 }
  0x4b   :  { %3890 = vmatprep.subr.mxu0 %v448_v63 }
  0x4c   :  { %3891 = vmatpush3.msra.mxu0 %v448_v63 }
  0x4d   :  { %3892 = vmatprep.subr.mxu0 %v447_v2 }
  0x4e   :  { %3893 = vmatpush3.msra.mxu0 %v447_v2 }
  0x4f   :  { %3894 = vmatprep.subr.mxu0 %v446_v4 }
  0x50   :  { %3895 = vmatpush3.msra.mxu0 %v446_v4 }
  0x51   :  { %3896 = vmatprep.subr.mxu0 %v445_v6 }
  0x52   :  { %3897 = vmatpush3.msra.mxu0 %v445_v6 }
  0x53   :  { %3898 = vmatprep.subr.mxu0 %v444_v8 }
  0x54   :  { %3899 = vmatpush3.msra.mxu0 %v444_v8 }
  0x55   :  { %3900 = vmatprep.subr.mxu0 %v443_v10 }
  0x56   :  { %3901 = vmatpush3.msra.mxu0 %v443_v10 }
  0x57   :  { %3902 = vmatprep.subr.mxu0 %v442_v12 }
  0x58   :  { %3903 = vmatpush3.msra.mxu0 %v442_v12 }
  0x59   :  { %3904 = vmatprep.subr.mxu0 %v441_v14 }
  0x5a   :  { %3905 = vmatpush3.msra.mxu0 %v441_v14 }
  0x5b   :  { %3906 = vmatprep.subr.mxu0 %v440_v16 }
  0x5c   :  { %3907 = vmatpush3.msra.mxu0 %v440_v16 }
  0x5d   :  { %3908 = vmatprep.subr.mxu0 %v439_v18 }
  0x5e   :  { %3909 = vmatpush3.msra.mxu0 %v439_v18  ;;  %v4788_v18 = vld [vmem:[%s5321_s9 + $0x3] ss:$0 sm:$0xff] }
  0xff   :  { %v166_v30 = vpop.f32.mrf.mxu0 }
 0x100   :  { %v4717_v31 = vadd.f32 %v166_v30, %v91_v29  ;;  %v3396_v29 = vld [vmem:[%s5317_s5 + $0x1] ss:$0 sm:$0xff] }
 0x101   :  { %v168_v32 = vpop.f32.mrf.mxu0 }
 0x102   :  { %194 = vadd.xlane.f32.xlu0 %v4717_v31 }
 0x103   :  { %v171_v34 = vpop.f32.mrf.mxu0 }
 0x104   :  { %v4723_v35 = vadd.f32 %v171_v34, %v92_v33 }
 0x105   :  { %v173_v36 = vpop.f32.mrf.mxu0 }
 0x106   :  { %v197_v37 = vsel %vm196_vm1, %v4723_v35, 0.0 }
 0x107   :  { %198 = vadd.xlane.f32.xlu0 %v197_v37 }
 0x18b   :  { %v195_v41 = vpop.xlane.xlu0 %194 }
 0x18c   :  { %v200_v42 = vmul.f32 0.03125, %v195_v41  ;;  %v352_v41 = vld [vmem:[#allocation2 + $0xd8] sm:$0xff] }
 0x18e   :  { %v202_v44 = vsub.f32 %v4717_v31, %v200_v42  ;;  %v351_v42 = vld [vmem:[#allocation2 + $0xd0] sm:$0xff] }
 0x190   :  { %v199_v45 = vpop.xlane.xlu0 %198  ;;  %v4734_v46 = vmul.f32 %v4730_v43, %v202_v44  ;;  %v350_v44 = vld [vmem:[#allocation2 + $0xc8] sm:$0xff] }
 0x191   :  { %v201_v47 = vmul.f32 0.03125, %v199_v45  ;;  %v349_v45 = vld [vmem:[#allocation2 + $0xc0] sm:$0xff] }
 0x192   :  { %v212_v48 = vmul.f32 %v4734_v46, %v4734_v46 }
 0x193   :  { %v203_v49 = vsub.f32 %v4723_v35, %v201_v47  ;;  %v347_v47 = vld [vmem:[#allocation2 + $0xb0] sm:$0xff] }
 0x194   :  { %214 = vadd.xlane.f32.xlu1 %v212_v48  ;;  %v346_v48 = vld [vmem:[#allocation2 + $0xa8] sm:$0xff] }
 0x195   :  { %v4740_v50 = vmul.f32 %v4730_v43, %v203_v49  ;;  %v345_v49 = vld [vmem:[#allocation2 + $0xa0] sm:$0xff] }
 0x197   :  { %v213_v51 = vmul.f32 %v4740_v50, %v4740_v50 }
 0x199   :  { %v216_v52 = vsel %vm196_vm1, %v213_v51, 0.0  ;;  %v343_v51 = vld [vmem:[#allocation2 + $0x90] sm:$0xff] }
 0x19a   :  { %217 = vadd.xlane.f32.xlu1 %v216_v52  ;;  %v342_v52 = vld [vmem:[#allocation2 + $0x88] sm:$0xff] }
 0x21d   :  { %v215_v20 = vpop.xlane.xlu1 %214 }
 0x21e   :  { %v219_v21 = vmul.f32 0.03125, %v215_v20 }
 0x220   :  { %v221_v22 = vadd.f32 1e-12, %v219_v21 }
 0x222   :  { %4388 = vrsqrt.f32 %v221_v22 }
 0x223   :  { %v218_v23 = vpop.xlane.xlu1 %217 }
 0x224   :  { %v220_v24 = vmul.f32 0.03125, %v218_v23 }
 0x226   :  { %v222_v25 = vadd.f32 1e-12, %v220_v24 }
 0x228   :  { %4390 = vrsqrt.f32 %v222_v25 }
 0x22f   :  { %v4389_v26 = vpop.eup %4388 }
 0x230   :  { %v225_v28 = vmul.f32 %v4389_v26, %v4734_v46  ;;  %v348_v46 = vld [vmem:[#allocation2 + $0xb8] sm:$0xff]  ;;  %v62_v26 = vld [vmem:[%s5322_s10 + $0x8] sm:$0x3] }
 0x232   :  { %v233_v30 = vmul.f32 %v3395_v27, %v225_v28 }
 0x234   :  { %v241_v32 = vadd.f32 %v3396_v29, %v233_v30 }
 0x235   :  { %v4391_v33 = vpop.eup %4390 }
 0x236   :  { %3840 = vmatprep.mubr.f32.mxu1 %v241_v32  ;;  %3910 = vmatprep.mubr.f32.mxu0 %v241_v32  ;;  %v226_v34 = vmul.f32 %v4391_v33, %v4740_v50  ;;  %v344_v50 = vld [vmem:[#allocation2 + $0x98] sm:$0xff] }
 0x238   :  { %v234_v36 = vmul.f32 %v3395_v27, %v226_v34 }
 0x23a   :  { %v242_v37 = vadd.f32 %v3396_v29, %v234_v36 }
 0x23c   :  { %3841 = vmatmul.mubr.f32.vlgmr.msra.gmra.mxu1 %v242_v37  ;;  %3911 = vmatmul.mubr.f32.vlgmr.msra.gmra.mxu0 %v242_v37 }
 0x23d   :  { %3844 = vmatpush3.msra.mxu1 %v356_v19  ;;  %3875 = vmatprep.mubr.f32.mxu1 %v241_v32  ;;  %v61_v32 = vld [vmem:[%s5322_s10] sm:$0xff] }
 0x23e   :  { %3845 = vmatprep.subr.mxu1 %v355_v38 }
 0x23f   :  { %3846 = vmatpush3.msra.mxu1 %v355_v38 }
 0x240   :  { %3847 = vmatprep.subr.mxu1 %v354_v39 }
 0x241   :  { %3848 = vmatpush3.msra.mxu1 %v354_v39 }
 0x242   :  { %3849 = vmatprep.subr.mxu1 %v353_v40 }
 0x243   :  { %3850 = vmatpush3.msra.mxu1 %v353_v40 }
 0x244   :  { %3851 = vmatprep.subr.mxu1 %v352_v41 }
 0x245   :  { %3852 = vmatpush3.msra.mxu1 %v352_v41 }
 0x246   :  { %3853 = vmatprep.subr.mxu1 %v351_v42 }
 0x247   :  { %3854 = vmatpush3.msra.mxu1 %v351_v42 }
 0x248   :  { %3855 = vmatprep.subr.mxu1 %v350_v44 }
 0x249   :  { %3856 = vmatpush3.msra.mxu1 %v350_v44 }
 0x24a   :  { %3857 = vmatprep.subr.mxu1 %v349_v45 }
 0x24b   :  { %3858 = vmatpush3.msra.mxu1 %v349_v45 }
 0x24c   :  { %3859 = vmatprep.subr.mxu1 %v348_v46 }
 0x24d   :  { %3860 = vmatpush3.msra.mxu1 %v348_v46 }
 0x24e   :  { %3861 = vmatprep.subr.mxu1 %v347_v47 }
 0x24f   :  { %3862 = vmatpush3.msra.mxu1 %v347_v47 }
 0x250   :  { %3863 = vmatprep.subr.mxu1 %v346_v48 }
 0x251   :  { %3864 = vmatpush3.msra.mxu1 %v346_v48 }
 0x252   :  { %3865 = vmatprep.subr.mxu1 %v345_v49 }
 0x253   :  { %3866 = vmatpush3.msra.mxu1 %v345_v49 }
 0x254   :  { %3867 = vmatprep.subr.mxu1 %v344_v50 }
 0x255   :  { %3868 = vmatpush3.msra.mxu1 %v344_v50 }
 0x256   :  { %3869 = vmatprep.subr.mxu1 %v343_v51 }
 0x257   :  { %3870 = vmatpush3.msra.mxu1 %v343_v51 }
 0x258   :  { %3871 = vmatprep.subr.mxu1 %v342_v52 }
 0x259   :  { %3872 = vmatpush3.msra.mxu1 %v342_v52 }
 0x25a   :  { %3873 = vmatprep.subr.mxu1 %v341_v53 }
 0x25b   :  { %3874 = vmatpush3.msra.mxu1 %v341_v53 }
 0x25c   :  { %3876 = vmatmul.mubr.f32.vlgmr.msra.gmra.mxu1 %v242_v37 }
 0x2fc   :  { %v3842_v54 = vpop.f32.mrf.mxu1  ;;  %v3912_v63 = vpop.f32.mrf.mxu0 }
 0x2fd   :  { %v533_v5 = vadd.f32 %v3912_v63, %v3399_v1  ;;  %v337_v7 = vadd.f32 %v3842_v54, %v3397_v55 }
 0x2fe   :  { %v331_v56 = vpop.f32.mrf.mxu1  ;;  %v527_v8 = vpop.f32.mrf.mxu0 }
 0x2ff   :  { %v332_v57 = vadd.f32 %v3397_v55, %v331_v56  ;;  %v569_v9 = vmul.f32 %v3400_v58, %v533_v5  ;;  %v4771_v10 = vadd.f32 %v3399_v1, %v527_v8  ;;  %v561_v11 = vmul.f32 %v3400_v58, %v337_v7 }
 0x300   :  { %v565_v12 = vmul.f32 %v4762_v59, %v337_v7  ;;  %v4781_v16 = vmul.f32 %v4762_v59, %v533_v5  ;;  %v563_v17 = vmul.f32 %v3401_v13, %v337_v7  ;;  %v571_v20 = vmul.f32 %v3401_v13, %v533_v5 }
 0x301   :  { %v560_v60 = vmul.f32 %v3400_v58, %v332_v57  ;;  %v564_v61 = vmul.f32 %v4762_v59, %v332_v57  ;;  %v562_v14 = vmul.f32 %v3401_v13, %v332_v57  ;;  %v568_v15 = vmul.f32 %v3400_v58, %v4771_v10 }
 0x302   :  { %v566_v19 = vmul.f32 %v4788_v18, %v332_v57  ;;  %v567_v21 = vmul.f32 %v4788_v18, %v337_v7  ;;  %v570_v22 = vmul.f32 %v3401_v13, %v4771_v10  ;;  %v4796_v23 = vmul.f32 %v4788_v18, %v533_v5 }
 0x303   :  { %3917 = vmatprep.mubr.f32.mxu1 %v560_v60  ;;  %3931 = vmatprep.mubr.f32.mxu0 %v564_v61 }
 0x31c   :  { %v3877_v2 = vpop.f32.mrf.mxu1 }
 0x31d   :  { %v435_v3 = vadd.f32 %v3877_v2, %v3398_v62 }
 0x31e   :  { %v429_v4 = vpop.f32.mrf.mxu1 }
 0x31f   :  { %v430_v6 = vadd.f32 %v3398_v62, %v429_v4  ;;  %3913 = vmatprep.subr.mxu1 %v435_v3  ;;  %3927 = vmatprep.subr.mxu0 %v435_v3 }
 0x320   :  { %3914 = vmatpush3.xpose.msra.mxu1 %v435_v3  ;;  %3928 = vmatpush3.xpose.msra.mxu0 %v435_v3 }
 0x321   :  { %3915 = vmatprep.subr.mxu1 %v430_v6  ;;  %3929 = vmatprep.subr.mxu0 %v430_v6 }
 0x324   :  { %3916 = vmatpush3.xpose.msra.mxu1 %v430_v6  ;;  %3930 = vmatpush3.xpose.msra.mxu0 %v430_v6 }
 0x325   :  { %3920 = vmatprep.subr.mxu1 %v435_v3  ;;  %3941 = vmatprep.subr.msk.mxu0 %vm196_vm1, %v569_v9 }
 0x327   :  { %3918 = vmatmul.mubr.f32.vlgmr.msra.gmra.mxu1 %v561_v11  ;;  %3932 = vmatmul.mubr.f32.vlgmr.msra.gmra.mxu0 %v565_v12 }
 0x328   :  { %3921 = vmatpush3.xpose.msra.mxu1 %v435_v3  ;;  %3924 = vmatprep.mubr.f32.mxu1 %v562_v14 }
 0x329   :  { %3942 = vmatpush3.msk.msra.mxu0 %vm196_vm1, %v569_v9  ;;  %3922 = vmatprep.subr.mxu1 %v430_v6 }
 0x32a   :  { %3943 = vmatprep.subr.mxu0 %v568_v15 }
 0x32b   :  { %3944 = vmatpush3.msra.mxu0 %v568_v15 }
 0x32c   :  { %3955 = vmatprep.subr.msk.mxu0 %vm196_vm1, %v4781_v16  ;;  %3923 = vmatpush3.xpose.msra.mxu1 %v430_v6 }
 0x32d   :  { %3934 = vmatprep.subr.mxu1 %v435_v3 }
 0x32f   :  { %3925 = vmatmul.mubr.f32.vlgmr.msra.gmra.mxu1 %v563_v17 }
 0x330   :  { %3935 = vmatpush3.xpose.msra.mxu1 %v435_v3  ;;  %3938 = vmatprep.mubr.f32.mxu1 %v566_v19 }
 0x331   :  { %3936 = vmatprep.subr.mxu1 %v430_v6 }
 0x334   :  { %3937 = vmatpush3.xpose.msra.mxu1 %v430_v6 }
 0x335   :  { %3948 = vmatprep.subr.msk.mxu1 %vm196_vm1, %v571_v20 }
 0x337   :  { %3939 = vmatmul.mubr.f32.vlgmr.msra.gmra.mxu1 %v567_v21 }
 0x338   :  { %3949 = vmatpush3.msk.msra.mxu1 %vm196_vm1, %v571_v20 }
 0x339   :  { %3950 = vmatprep.subr.mxu1 %v570_v22 }
 0x33a   :  { %3951 = vmatpush3.msra.mxu1 %v570_v22 }
 0x33b   :  { %3962 = vmatprep.subr.msk.mxu1 %vm196_vm1, %v4796_v23 }
 0x3e7   :  { %v3919_v24 = vpop.f32.mrf.mxu1  ;;  %v3933_v25 = vpop.f32.mrf.mxu0 }
 0x3e8   :  { %v877_v27 = vmul.f32 0.35355338, %v3919_v24  ;;  %v881_v28 = vmul.f32 0.35355338, %v3933_v25 }
 0x3e9   :  { %v642_v29 = vpop.f32.mrf.mxu1  ;;  %v792_v30 = vpop.f32.mrf.mxu0 }
 0x3ea   :  { %v876_v33 = vmul.f32 0.35355338, %v642_v29  ;;  %v880_v34 = vmul.f32 0.35355338, %v792_v30  ;;  %v885_v36 = vadd.f32 %v877_v27, %v62_v26  ;;  %v889_v39 = vadd.f32 %v881_v28, %v62_v26 }
 0x3ec   :  { %v897_v37 = vsel %vm896_vm2, %v885_v36, -inf  ;;  %v884_v38 = vadd.f32 %v876_v33, %v61_v32  ;;  %v888_v41 = vadd.f32 %v880_v34, %v61_v32  ;;  %v909_v45 = vsel %vm896_vm2, %v889_v39, -inf }
 0x3ed   :  { %898 = vmax.xlane.f32.xlu1 %v897_v37 }
 0x3ee   :  { %v893_v40 = vsel %vm892_vm3, %v884_v38, -inf  ;;  %v906_v48 = vsel %vm892_vm3, %v888_v41, -inf }
 0x3ef   :  { %894 = vmax.xlane.f32.xlu0 %v893_v40  ;;  %v3926_v42 = vpop.f32.mrf.mxu1 }
 0x3f0   :  { %v879_v44 = vmul.f32 0.35355338, %v3926_v42 }
 0x3f1   :  { %910 = vmax.xlane.f32.xlu1 %v909_v45  ;;  %v717_v46 = vpop.f32.mrf.mxu1 }
 0x3f2   :  { %v878_v47 = vmul.f32 0.35355338, %v717_v46  ;;  %v887_v49 = vadd.f32 %v879_v44, %v62_v26 }
 0x3f3   :  { %907 = vmax.xlane.f32.xlu0 %v906_v48 }
 0x3f4   :  { %v903_v50 = vsel %vm896_vm2, %v887_v49, -inf  ;;  %v886_v51 = vadd.f32 %v878_v47, %v61_v32 }
 0x3f5   :  { %904 = vmax.xlane.f32.xlu1 %v903_v50 }
 0x3f6   :  { %v900_v52 = vsel %vm892_vm3, %v886_v51, -inf }
 0x3f7   :  { %901 = vmax.xlane.f32.xlu0 %v900_v52  ;;  %v3940_v53 = vpop.f32.mrf.mxu1 }
 0x3f8   :  { %v883_v54 = vmul.f32 0.35355338, %v3940_v53 }
 0x3f9   :  { %v867_v55 = vpop.f32.mrf.mxu1 }
 0x3fa   :  { %v882_v56 = vmul.f32 0.35355338, %v867_v55  ;;  %v891_v57 = vadd.f32 %v883_v54, %v62_v26 }
 0x3fc   :  { %v915_v58 = vsel %vm896_vm2, %v891_v57, -inf  ;;  %v890_v60 = vadd.f32 %v882_v56, %v61_v32 }
 0x3fd   :  { %916 = vmax.xlane.f32.xlu1 %v915_v58 }
 0x3fe   :  { %v912_v61 = vsel %vm892_vm3, %v890_v60, -inf }
 0x3ff   :  { %913 = vmax.xlane.f32.xlu0 %v912_v61  ;;  %v572_v61 = vmul.f32 %v4762_v59, %v4771_v10 }
 0x476   :  { %v899_v62 = vpop.xlane.xlu1 %898 }
 0x477   :  { %v919_v63 = vsub.f32 %v885_v36, %v899_v62 }
 0x478   :  { %v895_v1 = vpop.xlane.xlu0 %894 }
 0x479   :  { %v928_v2 = vmul.f32 1.442695, %v919_v63  ;;  %v918_v3 = vsub.f32 %v884_v38, %v895_v1  ;;  %v1344_v63 = vld [vmem:[#allocation2 + $0x1f8] sm:$0xff] }
 0x47a   :  { %v911_v4 = vpop.xlane.xlu1 %910 }
 0x47b   :  { %4392 = vpow2.f32 %v928_v2  ;;  %v926_v5 = vmul.f32 1.442695, %v918_v3  ;;  %v923_v6 = vsub.f32 %v889_v39, %v911_v4  ;;  %v1343_v3 = vld [vmem:[#allocation2 + $0x1f0] sm:$0xff] }
 0x47c   :  { %v908_v7 = vpop.xlane.xlu0 %907 }
 0x47d   :  { %4394 = vpow2.f32 %v926_v5  ;;  %v936_v8 = vmul.f32 1.442695, %v923_v6  ;;  %v922_v9 = vsub.f32 %v888_v41, %v908_v7  ;;  %v1342_v6 = vld [vmem:[#allocation2 + $0x1e8] sm:$0xff]  ;;  %v574_v7 = vmul.f32 %v4788_v18, %v4771_v10  ;;  %v1339_v10 = vld [vmem:[#allocation2 + $0x1d0] sm:$0xff] }
 0x47e   :  { %v905_v11 = vpop.xlane.xlu1 %904  ;;  %v1338_v18 = vld [vmem:[#allocation2 + $0x1c8] sm:$0xff] }
 0x47f   :  { %4396 = vpow2.f32 %v936_v8  ;;  %v934_v12 = vmul.f32 1.442695, %v922_v9  ;;  %v921_v13 = vsub.f32 %v887_v49, %v905_v11  ;;  %v1340_v8 = vld [vmem:[#allocation2 + $0x1d8] sm:$0xff] }
 0x480   :  { %v902_v14 = vpop.xlane.xlu0 %901 }
 0x481   :  { %4398 = vpow2.f32 %v934_v12  ;;  %v932_v15 = vmul.f32 1.442695, %v921_v13  ;;  %v920_v17 = vsub.f32 %v886_v51, %v902_v14  ;;  %v1336_v14 = vld [vmem:[#allocation2 + $0x1b8] sm:$0xff] }
 0x483   :  { %4400 = vpow2.f32 %v932_v15  ;;  %v930_v19 = vmul.f32 1.442695, %v920_v17  ;;  %v1335_v15 = vld [vmem:[#allocation2 + $0x1b0] sm:$0xff]  ;;  %v1334_v17 = vld [vmem:[#allocation2 + $0x1a8] sm:$0xff] }
 0x485   :  { %4402 = vpow2.f32 %v930_v19  ;;  %v1333_v19 = vld [vmem:[#allocation2 + $0x1a0] sm:$0xff] }
 0x486   :  { %v917_v20 = vpop.xlane.xlu1 %916 }
 0x487   :  { %v925_v21 = vsub.f32 %v891_v57, %v917_v20  ;;  %v1332_v20 = vld [vmem:[#allocation2 + $0x198] sm:$0xff] }
 0x488   :  { %v4393_v22 = vpop.eup %4392  ;;  %v914_v24 = vpop.xlane.xlu0 %913 }
 0x489   :  { %v940_v25 = vmul.f32 1.442695, %v925_v21  ;;  %v924_v26 = vsub.f32 %v890_v60, %v914_v24  ;;  %v945_v27 = vsel %vm896_vm2, %v4393_v22, 0.0  ;;  %v1331_v21 = vld [vmem:[#allocation2 + $0x190] sm:$0xff]  ;;  %v1329_v24 = vld [vmem:[#allocation2 + $0x180] sm:$0xff] }
 0x48a   :  { %v4395_v28 = vpop.eup %4394  ;;  %946 = vadd.xlane.f32.xlu1 %v945_v27 }
 0x48b   :  { %4404 = vpow2.f32 %v940_v25  ;;  %v938_v29 = vmul.f32 1.442695, %v924_v26  ;;  %v942_v30 = vsel %vm892_vm3, %v4395_v28, 0.0 }
 0x48c   :  { %v4397_v32 = vpop.eup %4396  ;;  %943 = vadd.xlane.f32.xlu0 %v942_v30 }
 0x48d   :  { %4406 = vpow2.f32 %v938_v29  ;;  %v957_v33 = vsel %vm896_vm2, %v4397_v32, 0.0 }
 0x48e   :  { %v4399_v34 = vpop.eup %4398  ;;  %958 = vadd.xlane.f32.xlu1 %v957_v33 }
 0x48f   :  { %v954_v36 = vsel %vm892_vm3, %v4399_v34, 0.0 }
 0x490   :  { %v4401_v37 = vpop.eup %4400  ;;  %955 = vadd.xlane.f32.xlu0 %v954_v36 }
 0x491   :  { %v951_v38 = vsel %vm896_vm2, %v4401_v37, 0.0 }
 0x492   :  { %v4403_v39 = vpop.eup %4402  ;;  %952 = vadd.xlane.f32.xlu1 %v951_v38 }
 0x493   :  { %v948_v40 = vsel %vm892_vm3, %v4403_v39, 0.0 }
 0x494   :  { %949 = vadd.xlane.f32.xlu0 %v948_v40 }
 0x498   :  { %v4820_v41 = vpop.eup %4404 }
 0x499   :  { %v963_v42 = vsel %vm896_vm2, %v4820_v41, 0.0 }
 0x49a   :  { %v4407_v44 = vpop.eup %4406  ;;  %964 = vadd.xlane.f32.xlu1 %v963_v42 }
 0x49b   :  { %v960_v45 = vsel %vm892_vm3, %v4407_v44, 0.0 }
 0x49c   :  { %961 = vadd.xlane.f32.xlu0 %v960_v45 }
 0x513   :  { %v947_v46 = vpop.xlane.xlu1 %946 }
 0x514   :  { %4408 = vrcp.f32 %v947_v46  ;;  %v3416_v46 = vld [vmem:[%s5317_s5 + $0x5] ss:$0 sm:$0xff] }
 0x515   :  { %v944_v47 = vpop.xlane.xlu0 %943 }
 0x516   :  { %4410 = vrcp.f32 %v944_v47 }
 0x517   :  { %v959_v48 = vpop.xlane.xlu1 %958 }
 0x518   :  { %4412 = vrcp.f32 %v959_v48 }
 0x519   :  { %v956_v49 = vpop.xlane.xlu0 %955 }
 0x51a   :  { %4414 = vrcp.f32 %v956_v49 }
 0x51b   :  { %v953_v50 = vpop.xlane.xlu1 %952 }
 0x51c   :  { %4416 = vrcp.f32 %v953_v50 }
 0x51d   :  { %v950_v51 = vpop.xlane.xlu0 %949 }
 0x51e   :  { %4418 = vrcp.f32 %v950_v51 }
 0x521   :  { %v4409_v52 = vpop.eup %4408 }
 0x522   :  { %v975_v57 = vmul.f32 %v4409_v52, %v4393_v22  ;;  %v1330_v22 = vld [vmem:[#allocation2 + $0x188] sm:$0xff] }
 0x523   :  { %v4411_v53 = vpop.eup %4410  ;;  %v965_v54 = vpop.xlane.xlu1 %964 }
 0x524   :  { %v974_v55 = vmul.f32 %v4411_v53, %v4395_v28  ;;  %4420 = vrcp.f32 %v965_v54  ;;  %v1485_v54 = vld [vmem:[%s5316_s4 + $0x78] sm:$0xff] }
 0x525   :  { %v962_v56 = vpop.xlane.xlu0 %961  ;;  %v4413_v58 = vpop.eup %4412 }
 0x526   :  { %4422 = vrcp.f32 %v962_v56  ;;  %3945 = vmatprep.mubr.msk.f32.mxu0 %vm892_vm3, %v974_v55  ;;  %v979_v1 = vmul.f32 %v4413_v58, %v4397_v32  ;;  %v1484_v55 = vld [vmem:[%s5316_s4 + $0x70] sm:$0xff] }
 0x527   :  { %v4415_v60 = vpop.eup %4414  ;;  %3946 = vmatmul.mubr.msk.f32.vlgmr.msra.gmra.mxu0 %vm892_vm3, %v975_v57 }
 0x528   :  { %3956 = vmatpush3.msk.msra.mxu0 %vm196_vm1, %v4781_v16  ;;  %v978_v62 = vmul.f32 %v4415_v60, %v4399_v34  ;;  %v1341_v16 = vld [vmem:[#allocation2 + $0x1e0] sm:$0xff] }
 0x529   :  { %3957 = vmatprep.subr.mxu0 %v572_v61  ;;  %v4417_v2 = vpop.eup %4416 }
 0x52a   :  { %3958 = vmatpush3.msra.mxu0 %v572_v61  ;;  %3959 = vmatprep.mubr.msk.f32.mxu0 %vm892_vm3, %v978_v62  ;;  %v977_v59 = vmul.f32 %v4417_v2, %v4401_v37 }
 0x52b   :  { %v4419_v4 = vpop.eup %4418  ;;  %3960 = vmatmul.mubr.msk.f32.vlgmr.msra.gmra.mxu0 %vm892_vm3, %v979_v1  ;;  %3969 = vmatprep.subr.mxu0 %v1344_v63 }
 0x52c   :  { %v976_v5 = vmul.f32 %v4419_v4, %v4403_v39  ;;  %3970 = vmatpush3.msra.mxu0 %v1344_v63 }
 0x52d   :  { %3971 = vmatprep.subr.mxu0 %v1343_v3 }
 0x52e   :  { %3952 = vmatprep.mubr.msk.f32.mxu1 %vm892_vm3, %v976_v5  ;;  %3972 = vmatpush3.msra.mxu0 %v1343_v3  ;;  %v1481_v5 = vld [vmem:[%s5316_s4 + $0x58] sm:$0xff] }
 0x52f   :  { %3953 = vmatmul.mubr.msk.f32.vlgmr.msra.gmra.mxu1 %vm892_vm3, %v977_v59  ;;  %3973 = vmatprep.subr.mxu0 %v1342_v6  ;;  %v1478_v59 = vld [vmem:[%s5316_s4 + $0x40] sm:$0xff] }
 0x530   :  { %3963 = vmatpush3.msk.msra.mxu1 %vm196_vm1, %v4796_v23  ;;  %3974 = vmatpush3.msra.mxu0 %v1342_v6  ;;  %v1337_v23 = vld [vmem:[#allocation2 + $0x1c0] sm:$0xff]  ;;  %v1480_v6 = vld [vmem:[%s5316_s4 + $0x50] sm:$0xff] }
 0x531   :  { %3964 = vmatprep.subr.mxu1 %v574_v7  ;;  %3975 = vmatprep.subr.mxu0 %v1341_v16  ;;  %v4421_v9 = vpop.eup %4420 }
 0x532   :  { %3965 = vmatpush3.msra.mxu1 %v574_v7  ;;  %3976 = vmatpush3.msra.mxu0 %v1341_v16  ;;  %v981_v13 = vmul.f32 %v4421_v9, %v4820_v41  ;;  %v1477_v16 = vld [vmem:[%s5316_s4 + $0x38] sm:$0xff]  ;;  %v1476_v7 = vld [vmem:[%s5316_s4 + $0x30] sm:$0xff]  ;;  %v1474_v9 = vld [vmem:[%s5316_s4 + $0x20] sm:$0xff] }
 0x533   :  { %v4423_v11 = vpop.eup %4422  ;;  %3977 = vmatprep.subr.mxu0 %v1340_v8  ;;  %4004 = vmatprep.subr.mxu1 %v1485_v54 }
 0x534   :  { %v980_v12 = vmul.f32 %v4423_v11, %v4407_v44  ;;  %3978 = vmatpush3.msra.mxu0 %v1340_v8  ;;  %v1475_v8 = vld [vmem:[%s5316_s4 + $0x28] sm:$0xff]  ;;  %v1473_v11 = vld [vmem:[%s5316_s4 + $0x18] sm:$0xff] }
 0x535   :  { %3979 = vmatprep.subr.mxu0 %v1339_v10 }
 0x536   :  { %3966 = vmatprep.mubr.msk.f32.mxu1 %vm892_vm3, %v980_v12  ;;  %3980 = vmatpush3.msra.mxu0 %v1339_v10  ;;  %v1472_v12 = vld [vmem:[%s5316_s4 + $0x10] sm:$0xff]  ;;  %v1470_v10 = vld [vmem:[%s5316_s4] sm:$0xff] }
 0x537   :  { %3967 = vmatmul.mubr.msk.f32.vlgmr.msra.gmra.mxu1 %vm892_vm3, %v981_v13  ;;  %3981 = vmatprep.subr.mxu0 %v1338_v18  ;;  %v1471_v13 = vld [vmem:[%s5316_s4 + $0x8] sm:$0xff] }
 0x538   :  { %3982 = vmatpush3.msra.mxu0 %v1338_v18  ;;  %4005 = vmatpush3.msra.mxu1 %v1485_v54 }
 0x539   :  { %3983 = vmatprep.subr.mxu0 %v1337_v23  ;;  %4006 = vmatprep.subr.mxu1 %v1484_v55 }
 0x53a   :  { %3984 = vmatpush3.msra.mxu0 %v1337_v23  ;;  %4007 = vmatpush3.msra.mxu1 %v1484_v55 }
 0x53b   :  { %3985 = vmatprep.subr.mxu0 %v1336_v14 }
 0x53c   :  { %3986 = vmatpush3.msra.mxu0 %v1336_v14 }
 0x53d   :  { %3987 = vmatprep.subr.mxu0 %v1335_v15 }
 0x53e   :  { %3988 = vmatpush3.msra.mxu0 %v1335_v15 }
 0x53f   :  { %3989 = vmatprep.subr.mxu0 %v1334_v17 }
 0x540   :  { %3990 = vmatpush3.msra.mxu0 %v1334_v17 }
 0x541   :  { %3991 = vmatprep.subr.mxu0 %v1333_v19 }
 0x542   :  { %3992 = vmatpush3.msra.mxu0 %v1333_v19 }
 0x543   :  { %3993 = vmatprep.subr.mxu0 %v1332_v20 }
 0x544   :  { %3994 = vmatpush3.msra.mxu0 %v1332_v20 }
 0x545   :  { %3995 = vmatprep.subr.mxu0 %v1331_v21 }
 0x546   :  { %3996 = vmatpush3.msra.mxu0 %v1331_v21  ;;  %v3417_v21 = vld [vmem:[%s5317_s5 + $0x6] ss:$0 sm:$0xff] }
 0x547   :  { %3997 = vmatprep.subr.mxu0 %v1330_v22 }
 0x548   :  { %3998 = vmatpush3.msra.mxu0 %v1330_v22 }
 0x549   :  { %3999 = vmatprep.subr.mxu0 %v1329_v24 }
 0x54a   :  { %4000 = vmatpush3.msra.mxu0 %v1329_v24 }
 0x5e7   :  { %v3947_v25 = vpop.f32.mrf.mxu0 }
 0x5e8   :  { %v1321_v32 = vsel %vm196_vm1, %v3947_v25, 0.0  ;;  %v3418_v25 = vld [vmem:[%s5317_s5 + $0x7] ss:$0 sm:$0xff] }
 0x5e9   :  { %v1057_v26 = vpop.f32.mrf.mxu0 }
 0x5eb   :  { %v3961_v30 = vpop.f32.mrf.mxu0 }
 0x5ec   :  { %v1324_v38 = vsel %vm196_vm1, %v3961_v30, 0.0 }
 0x5ed   :  { %v1225_v36 = vpop.f32.mrf.mxu0 }
 0x5ef   :  { %v3954_v27 = vpop.f32.mrf.mxu1 }
 0x5f0   :  { %v1322_v29 = vsel %vm196_vm1, %v3954_v27, 0.0 }
 0x5f1   :  { %v1141_v28 = vpop.f32.mrf.mxu1  ;;  %v1323_v34 = vadd.f32 %v1322_v29, %v1321_v32  ;;  %v3435_v32 = vld [vmem:[%s5316_s4 + $0xf8] sm:$0xff] }
 0x5f2   :  { %v1318_v33 = vadd.f32 %v1141_v28, %v1057_v26  ;;  %4039 = vmatprep.subr.mxu0 %v3435_v32 }
 0x5f3   :  { %v1325_v41 = vadd.f32 %v1324_v38, %v1323_v34  ;;  %v3433_v34 = vld [vmem:[%s5316_s4 + $0xe8] sm:$0xff]  ;;  %v3430_v38 = vld [vmem:[%s5316_s4 + $0xd0] sm:$0xff] }
 0x5f4   :  { %v1319_v40 = vadd.f32 %v1318_v33, %v1225_v36  ;;  %v3434_v33 = vld [vmem:[%s5316_s4 + $0xf0] sm:$0xff]  ;;  %v3432_v36 = vld [vmem:[%s5316_s4 + $0xe0] sm:$0xff] }
 0x5f7   :  { %v3968_v37 = vpop.f32.mrf.mxu1 }
 0x5f8   :  { %v1326_v39 = vsel %vm196_vm1, %v3968_v37, 0.0  ;;  %v3431_v37 = vld [vmem:[%s5316_s4 + $0xd8] sm:$0xff] }
 0x5f9   :  { %v1309_v42 = vpop.f32.mrf.mxu1  ;;  %v1327_v45 = vadd.f32 %v1326_v39, %v1325_v41  ;;  %v3429_v39 = vld [vmem:[%s5316_s4 + $0xc8] sm:$0xff]  ;;  %v3427_v41 = vld [vmem:[%s5316_s4 + $0xb8] sm:$0xff] }
 0x5fa   :  { %v1320_v44 = vadd.f32 %v1319_v40, %v1309_v42  ;;  %v3428_v40 = vld [vmem:[%s5316_s4 + $0xc0] sm:$0xff]  ;;  %v3426_v42 = vld [vmem:[%s5316_s4 + $0xb0] sm:$0xff] }
 0x5fc   :  { %4001 = vmatprep.mubr.f32.mxu0 %v1320_v44  ;;  %v3425_v44 = vld [vmem:[%s5316_s4 + $0xa8] sm:$0xff] }
 0x5fd   :  { %4002 = vmatmul.mubr.f32.vlgmr.msra.gmra.mxu0 %v1327_v45  ;;  %v3424_v45 = vld [vmem:[%s5316_s4 + $0xa0] sm:$0xff] }
 0x5fe   :  { %4040 = vmatpush3.msra.mxu0 %v3435_v32 }
 0x5ff   :  { %4041 = vmatprep.subr.mxu0 %v3434_v33 }
 0x600   :  { %4042 = vmatpush3.msra.mxu0 %v3434_v33 }
 0x601   :  { %4043 = vmatprep.subr.mxu0 %v3433_v34 }
 0x602   :  { %4044 = vmatpush3.msra.mxu0 %v3433_v34 }
 0x603   :  { %4045 = vmatprep.subr.mxu0 %v3432_v36 }
 0x604   :  { %4046 = vmatpush3.msra.mxu0 %v3432_v36 }
 0x605   :  { %4047 = vmatprep.subr.mxu0 %v3431_v37 }
 0x606   :  { %4048 = vmatpush3.msra.mxu0 %v3431_v37  ;;  %v1759_v37 = vld [vmem:[#allocation2 + $0x258] sm:$0xff] }
 0x607   :  { %4049 = vmatprep.subr.mxu0 %v3430_v38 }
 0x608   :  { %4050 = vmatpush3.msra.mxu0 %v3430_v38  ;;  %v1857_v38 = vld [vmem:[#allocation2 + $0x2d8] sm:$0xff] }
 0x609   :  { %4051 = vmatprep.subr.mxu0 %v3429_v39 }
 0x60a   :  { %4052 = vmatpush3.msra.mxu0 %v3429_v39  ;;  %v1758_v39 = vld [vmem:[#allocation2 + $0x250] sm:$0xff] }
 0x60b   :  { %4053 = vmatprep.subr.mxu0 %v3428_v40 }
 0x60c   :  { %4054 = vmatpush3.msra.mxu0 %v3428_v40  ;;  %v1856_v40 = vld [vmem:[#allocation2 + $0x2d0] sm:$0xff] }
 0x60d   :  { %4055 = vmatprep.subr.mxu0 %v3427_v41 }
 0x60e   :  { %4056 = vmatpush3.msra.mxu0 %v3427_v41  ;;  %v1757_v41 = vld [vmem:[#allocation2 + $0x248] sm:$0xff] }
 0x60f   :  { %4057 = vmatprep.subr.mxu0 %v3426_v42 }
 0x610   :  { %4058 = vmatpush3.msra.mxu0 %v3426_v42  ;;  %v1855_v42 = vld [vmem:[#allocation2 + $0x2c8] sm:$0xff] }
 0x611   :  { %4059 = vmatprep.subr.mxu0 %v3425_v44 }
 0x612   :  { %4060 = vmatpush3.msra.mxu0 %v3425_v44  ;;  %v1756_v44 = vld [vmem:[#allocation2 + $0x240] sm:$0xff] }
 0x613   :  { %4061 = vmatprep.subr.mxu0 %v3424_v45 }
 0x614   :  { %4062 = vmatpush3.msra.mxu0 %v3424_v45  ;;  %v1854_v45 = vld [vmem:[#allocation2 + $0x2c0] sm:$0xff] }
 0x6bd   :  { %v4003_v47 = vpop.f32.mrf.mxu0 }
 0x6be   :  { %v1423_v48 = vadd.f32 %v4003_v47, %v3416_v46  ;;  %v3422_v47 = vld [vmem:[%s5316_s4 + $0x90] sm:$0xff] }
 0x6bf   :  { %v1417_v49 = vpop.f32.mrf.mxu0 }
 0x6c0   :  { %v4850_v50 = vadd.f32 %v1423_v48, %v4723_v35  ;;  %v1418_v51 = vadd.f32 %v3416_v46, %v1417_v49  ;;  %v1482_v35 = vld [vmem:[%s5316_s4 + $0x60] sm:$0xff]  ;;  %v3423_v46 = vld [vmem:[%s5316_s4 + $0x98] sm:$0xff]  ;;  %v3421_v48 = vld [vmem:[%s5316_s4 + $0x88] sm:$0xff] }
 0x6c1   :  { %4063 = vmatprep.subr.mxu0 %v3423_v46  ;;  %v3420_v49 = vld [vmem:[%s5316_s4 + $0x80] sm:$0xff] }
 0x6c2   :  { %v4853_v52 = vadd.f32 %v1418_v51, %v4717_v31  ;;  %v1430_v53 = vsel %vm196_vm1, %v4850_v50, 0.0  ;;  %v1483_v31 = vld [vmem:[%s5316_s4 + $0x68] sm:$0xff]  ;;  %4064 = vmatpush3.msra.mxu0 %v3423_v46  ;;  %v1755_v46 = vld [vmem:[#allocation2 + $0x238] sm:$0xff] }
 0x6c3   :  { %1431 = vadd.xlane.f32.xlu1 %v1430_v53  ;;  %4008 = vmatprep.subr.mxu1 %v1483_v31  ;;  %v3419_v51 = vld [vmem:[%s5317_s5 + $0x8] ss:$0 sm:$0xff] }
 0x6c4   :  { %1428 = vadd.xlane.f32.xlu0 %v4853_v52  ;;  %4009 = vmatpush3.msra.mxu1 %v1483_v31 }
 0x6c5   :  { %4010 = vmatprep.subr.mxu1 %v1482_v35  ;;  %4065 = vmatprep.subr.mxu0 %v3422_v47 }
 0x6c6   :  { %4011 = vmatpush3.msra.mxu1 %v1482_v35  ;;  %4066 = vmatpush3.msra.mxu0 %v3422_v47  ;;  %v1853_v47 = vld [vmem:[#allocation2 + $0x2b8] sm:$0xff] }
 0x6c7   :  { %4012 = vmatprep.subr.mxu1 %v1481_v5  ;;  %4067 = vmatprep.subr.mxu0 %v3421_v48 }
 0x6c8   :  { %4013 = vmatpush3.msra.mxu1 %v1481_v5  ;;  %4068 = vmatpush3.msra.mxu0 %v3421_v48  ;;  %v1754_v48 = vld [vmem:[#allocation2 + $0x230] sm:$0xff] }
 0x6c9   :  { %4014 = vmatprep.subr.mxu1 %v1480_v6  ;;  %4069 = vmatprep.subr.mxu0 %v3420_v49 }
 0x6ca   :  { %4015 = vmatpush3.msra.mxu1 %v1480_v6  ;;  %4070 = vmatpush3.msra.mxu0 %v3420_v49  ;;  %v1852_v49 = vld [vmem:[#allocation2 + $0x2b0] sm:$0xff] }
 0x74c   :  { %v1432_v56 = vpop.xlane.xlu1 %1431 }
 0x74d   :  { %v1434_v57 = vmul.f32 0.03125, %v1432_v56  ;;  %v1429_v58 = vpop.xlane.xlu0 %1428 }
 0x74e   :  { %v1433_v60 = vmul.f32 0.03125, %v1429_v58 }
 0x74f   :  { %v1436_v61 = vsub.f32 %v4850_v50, %v1434_v57 }
 0x750   :  { %v1435_v62 = vsub.f32 %v4853_v52, %v1433_v60 }
 0x751   :  { %v1438_v63 = vmul.f32 %v4730_v43, %v1436_v61 }
 0x752   :  { %v1437_v1 = vmul.f32 %v4730_v43, %v1435_v62  ;;  %v1479_v43 = vld [vmem:[%s5316_s4 + $0x48] sm:$0xff] }
 0x753   :  { %v1440_v2 = vmul.f32 %v1438_v63, %v1438_v63  ;;  %4016 = vmatprep.subr.mxu1 %v1479_v43 }
 0x754   :  { %v1439_v3 = vmul.f32 %v1437_v1, %v1437_v1  ;;  %4017 = vmatpush3.msra.mxu1 %v1479_v43 }
 0x755   :  { %v1443_v4 = vsel %vm196_vm1, %v1440_v2, 0.0  ;;  %4018 = vmatprep.subr.mxu1 %v1478_v59 }
 0x756   :  { %1444 = vadd.xlane.f32.xlu1 %v1443_v4  ;;  %1441 = vadd.xlane.f32.xlu0 %v1439_v3 }
 0x757   :  { %4019 = vmatpush3.msra.mxu1 %v1478_v59 }
 0x758   :  { %4020 = vmatprep.subr.mxu1 %v1477_v16 }
 0x759   :  { %4021 = vmatpush3.msra.mxu1 %v1477_v16 }
 0x75a   :  { %4022 = vmatprep.subr.mxu1 %v1476_v7 }
 0x75b   :  { %4023 = vmatpush3.msra.mxu1 %v1476_v7 }
 0x75c   :  { %4024 = vmatprep.subr.mxu1 %v1475_v8 }
 0x75d   :  { %4025 = vmatpush3.msra.mxu1 %v1475_v8  ;;  %v3436_v8 = vld [vmem:[%s5317_s5 + $0x9] ss:$0 sm:$0xff] }
 0x75e   :  { %4026 = vmatprep.subr.mxu1 %v1474_v9 }
 0x75f   :  { %4027 = vmatpush3.msra.mxu1 %v1474_v9 }
 0x760   :  { %4028 = vmatprep.subr.mxu1 %v1473_v11 }
 0x761   :  { %4029 = vmatpush3.msra.mxu1 %v1473_v11 }
 0x762   :  { %4030 = vmatprep.subr.mxu1 %v1472_v12 }
 0x763   :  { %4031 = vmatpush3.msra.mxu1 %v1472_v12 }
 0x764   :  { %4032 = vmatprep.subr.mxu1 %v1471_v13 }
 0x765   :  { %4033 = vmatpush3.msra.mxu1 %v1471_v13 }
 0x766   :  { %4034 = vmatprep.subr.mxu1 %v1470_v10 }
 0x767   :  { %4035 = vmatpush3.msra.mxu1 %v1470_v10 }
 0x7df   :  { %v1445_v18 = vpop.xlane.xlu1 %1444  ;;  %v1442_v23 = vpop.xlane.xlu0 %1441 }
 0x7e0   :  { %v1447_v14 = vmul.f32 0.03125, %v1445_v18  ;;  %v1446_v15 = vmul.f32 0.03125, %v1442_v23 }
 0x7e2   :  { %v1449_v17 = vadd.f32 1e-12, %v1447_v14  ;;  %v1448_v19 = vadd.f32 1e-12, %v1446_v15  ;;  %v1763_v14 = vld [vmem:[#allocation2 + $0x278] sm:$0xff] }
 0x7e3   :  { %v1861_v15 = vld [vmem:[#allocation2 + $0x2f8] sm:$0xff]  ;;  %4074 = vmatprep.subr.mxu1 %v1763_v14 }
 0x7e4   :  { %4424 = vrsqrt.f32 %v1449_v17  ;;  %v1762_v17 = vld [vmem:[#allocation2 + $0x270] sm:$0xff]  ;;  %4109 = vmatprep.subr.mxu0 %v1861_v15 }
 0x7e5   :  { %4426 = vrsqrt.f32 %v1448_v19  ;;  %v1860_v19 = vld [vmem:[#allocation2 + $0x2f0] sm:$0xff] }
 0x7f1   :  { %v4425_v20 = vpop.eup %4424 }
 0x7f2   :  { %v4427_v22 = vpop.eup %4426  ;;  %v1453_v24 = vmul.f32 %v4425_v20, %v1438_v63  ;;  %v1859_v20 = vld [vmem:[#allocation2 + $0x2e8] sm:$0xff] }
 0x7f3   :  { %v1452_v26 = vmul.f32 %v4427_v22, %v1437_v1 }
 0x7f4   :  { %v1461_v27 = vmul.f32 %v3417_v21, %v1453_v24 }
 0x7f5   :  { %v1460_v28 = vmul.f32 %v3417_v21, %v1452_v26  ;;  %v1858_v21 = vld [vmem:[#allocation2 + $0x2e0] sm:$0xff] }
 0x7f6   :  { %v1469_v29 = vadd.f32 %v3418_v25, %v1461_v27 }
 0x7f7   :  { %v1468_v30 = vadd.f32 %v3418_v25, %v1460_v28 }
 0x7f9   :  { %4036 = vmatprep.mubr.f32.mxu1 %v1468_v30 }
 0x7fa   :  { %4037 = vmatmul.mubr.f32.vlgmr.msra.gmra.mxu1 %v1469_v29  ;;  %v4985_v29 = vld [vmem:[%s5320_s8] ss:$0 sm:$0xff] }
 0x7fb   :  { %4075 = vmatpush3.msra.mxu1 %v1763_v14  ;;  %v1958_v14 = vld [vmem:[#allocation2 + $0x370] sm:$0xff] }
 0x7fc   :  { %4076 = vmatprep.subr.mxu1 %v1762_v17 }
 0x7fd   :  { %4077 = vmatpush3.msra.mxu1 %v1762_v17  ;;  %v1956_v17 = vld [vmem:[#allocation2 + $0x360] sm:$0xff] }
 0x8ba   :  { %v4038_v53 = vpop.f32.mrf.mxu1 }
 0x8bb   :  { %v1564_v54 = vadd.f32 %v4038_v53, %v3419_v51  ;;  %v1851_v53 = vld [vmem:[#allocation2 + $0x2a8] sm:$0xff] }
 0x8bc   :  { %v1558_v55 = vpop.f32.mrf.mxu1 }
 0x8bd   :  { %v1568_v31 = vmul.f32 %v1564_v54, %v1564_v54  ;;  %v1559_v35 = vadd.f32 %v3419_v51, %v1558_v55  ;;  %v1753_v51 = vld [vmem:[#allocation2 + $0x228] sm:$0xff]  ;;  %v1850_v55 = vld [vmem:[#allocation2 + $0x2a0] sm:$0xff] }
 0x8bf   :  { %v1570_v56 = vmul.f32 %v1568_v31, %v1564_v54  ;;  %v1567_v57 = vmul.f32 %v1559_v35, %v1559_v35  ;;  %v1751_v31 = vld [vmem:[#allocation2 + $0x218] sm:$0xff] }
 0x8c1   :  { %v1572_v58 = vmul.f32 0.044715, %v1570_v56  ;;  %v1569_v60 = vmul.f32 %v1567_v57, %v1559_v35  ;;  %v1750_v56 = vld [vmem:[#allocation2 + $0x210] sm:$0xff] }
 0x8c2   :  { %v1848_v57 = vld [vmem:[#allocation2 + $0x290] sm:$0xff] }
 0x8c3   :  { %v1574_v61 = vadd.f32 %v1572_v58, %v1564_v54  ;;  %v1571_v62 = vmul.f32 0.044715, %v1569_v60  ;;  %v1749_v58 = vld [vmem:[#allocation2 + $0x208] sm:$0xff] }
 0x8c4   :  { %v1847_v60 = vld [vmem:[#allocation2 + $0x288] sm:$0xff] }
 0x8c5   :  { %v1576_v63 = vmul.f32 0.7978846, %v1574_v61  ;;  %v1573_v1 = vadd.f32 %v1571_v62, %v1559_v35  ;;  %v1748_v61 = vld [vmem:[#allocation2 + $0x200] sm:$0xff] }
 0x8c6   :  { %v1846_v62 = vld [vmem:[#allocation2 + $0x280] sm:$0xff] }
 0x8c7   :  { %4428 = vtanh.f32 %v1576_v63  ;;  %v1575_v2 = vmul.f32 0.7978846, %v1573_v1  ;;  %v1959_v63 = vld [vmem:[#allocation2 + $0x378] sm:$0xff] }
 0x8c9   :  { %4430 = vtanh.f32 %v1575_v2 }
 0x8d4   :  { %v4429_v3 = vpop.eup %4428 }
 0x8d5   :  { %v1580_v4 = vadd.f32 1.0, %v4429_v3 }
 0x8d6   :  { %v4431_v5 = vpop.eup %4430 }
 0x8d7   :  { %v1579_v6 = vadd.f32 1.0, %v4431_v5  ;;  %v1582_v43 = vmul.f32 0.5, %v1580_v4 }
 0x8d9   :  { %v1581_v59 = vmul.f32 0.5, %v1579_v6  ;;  %v1584_v7 = vmul.f32 %v1582_v43, %v1564_v54  ;;  %v1752_v54 = vld [vmem:[#allocation2 + $0x220] sm:$0xff] }
 0x8db   :  { %v1583_v16 = vmul.f32 %v1581_v59, %v1559_v35  ;;  %v1849_v35 = vld [vmem:[#allocation2 + $0x298] sm:$0xff]  ;;  %v3447_v59 = vld [vmem:[%s5317_s5 + $0xa] ss:$0 sm:$0xff] }
 0x8dd   :  { %4071 = vmatprep.mubr.f32.mxu0 %v1583_v16 }
 0x8de   :  { %4072 = vmatmul.mubr.f32.vlgmr.msra.gmra.mxu0 %v1584_v7 }
 0x8df   :  { %4110 = vmatpush3.msra.mxu0 %v1861_v15  ;;  %v1957_v15 = vld [vmem:[#allocation2 + $0x368] sm:$0xff] }
 0x8e0   :  { %4111 = vmatprep.subr.mxu0 %v1860_v19 }
 0x8e1   :  { %4112 = vmatpush3.msra.mxu0 %v1860_v19  ;;  %v1955_v19 = vld [vmem:[#allocation2 + $0x358] sm:$0xff] }
 0x8e2   :  { %4113 = vmatprep.subr.mxu0 %v1859_v20 }
 0x8e3   :  { %4114 = vmatpush3.msra.mxu0 %v1859_v20  ;;  %v1953_v20 = vld [vmem:[#allocation2 + $0x348] sm:$0xff] }
 0x8e4   :  { %4115 = vmatprep.subr.mxu0 %v1858_v21 }
 0x8e5   :  { %4116 = vmatpush3.msra.mxu0 %v1858_v21  ;;  %v1951_v21 = vld [vmem:[#allocation2 + $0x338] sm:$0xff] }
 0x8e6   :  { %4117 = vmatprep.subr.mxu0 %v1857_v38 }
 0x8e7   :  { %4118 = vmatpush3.msra.mxu0 %v1857_v38 }
 0x8e8   :  { %4119 = vmatprep.subr.mxu0 %v1856_v40 }
 0x8e9   :  { %4120 = vmatpush3.msra.mxu0 %v1856_v40 }
 0x8ea   :  { %4121 = vmatprep.subr.mxu0 %v1855_v42 }
 0x8eb   :  { %4122 = vmatpush3.msra.mxu0 %v1855_v42 }
 0x8ec   :  { %4123 = vmatprep.subr.mxu0 %v1854_v45 }
 0x8ed   :  { %4124 = vmatpush3.msra.mxu0 %v1854_v45 }
 0x8ee   :  { %4125 = vmatprep.subr.mxu0 %v1853_v47 }
 0x8ef   :  { %4126 = vmatpush3.msra.mxu0 %v1853_v47 }
 0x8f0   :  { %4127 = vmatprep.subr.mxu0 %v1852_v49 }
 0x8f1   :  { %4128 = vmatpush3.msra.mxu0 %v1852_v49 }
 0x8f2   :  { %4129 = vmatprep.subr.mxu0 %v1851_v53 }
 0x8f3   :  { %4130 = vmatpush3.msra.mxu0 %v1851_v53 }
 0x8f4   :  { %4131 = vmatprep.subr.mxu0 %v1850_v55 }
 0x8f5   :  { %4132 = vmatpush3.msra.mxu0 %v1850_v55 }
 0x8f6   :  { %4133 = vmatprep.subr.mxu0 %v1849_v35 }
 0x8f7   :  { %4134 = vmatpush3.msra.mxu0 %v1849_v35 }
 0x8f8   :  { %4135 = vmatprep.subr.mxu0 %v1848_v57 }
 0x8f9   :  { %4136 = vmatpush3.msra.mxu0 %v1848_v57 }
 0x8fa   :  { %4137 = vmatprep.subr.mxu0 %v1847_v60 }
 0x8fb   :  { %4138 = vmatpush3.msra.mxu0 %v1847_v60 }
 0x8fc   :  { %4139 = vmatprep.subr.mxu0 %v1846_v62 }
 0x8fd   :  { %4140 = vmatpush3.msra.mxu0 %v1846_v62 }
 0x99e   :  { %v4073_v9 = vpop.f32.mrf.mxu0 }
 0x99f   :  { %v1680_v11 = vadd.f32 %v4073_v9, %v3436_v8 }
 0x9a0   :  { %v1674_v12 = vpop.f32.mrf.mxu0 }
 0x9a1   :  { %v4972_v13 = vadd.f32 %v1680_v11, %v4850_v50  ;;  %v1675_v10 = vadd.f32 %v3436_v8, %v1674_v12  ;;  %v1761_v50 = vld [vmem:[#allocation2 + $0x268] sm:$0xff] }
 0x9a2   :  { %4078 = vmatprep.subr.mxu1 %v1761_v50  ;;  %v3448_v8 = vld [vmem:[%s5317_s5 + $0xb] ss:$0 sm:$0xff] }
 0x9a3   :  { %v4975_v18 = vadd.f32 %v1675_v10, %v4853_v52  ;;  %v1707_v23 = vsel %vm196_vm1, %v4972_v13, 0.0  ;;  %v1760_v52 = vld [vmem:[#allocation2 + $0x260] sm:$0xff]  ;;  %4079 = vmatpush3.msra.mxu1 %v1761_v50  ;;  %v1954_v50 = vld [vmem:[#allocation2 + $0x350] sm:$0xff] }
 0x9a4   :  { %1708 = vadd.xlane.f32.xlu1 %v1707_v23  ;;  %4080 = vmatprep.subr.mxu1 %v1760_v52 }
 0x9a5   :  { %1705 = vadd.xlane.f32.xlu0 %v4975_v18  ;;  %4081 = vmatpush3.msra.mxu1 %v1760_v52  ;;  %v1952_v52 = vld [vmem:[#allocation2 + $0x340] sm:$0xff] }
 0x9a6   :  { %4082 = vmatprep.subr.mxu1 %v1759_v37 }
 0x9a7   :  { %4083 = vmatpush3.msra.mxu1 %v1759_v37  ;;  %v3449_v37 = vld [vmem:[%s5317_s5 + $0xc] ss:$0 sm:$0xff] }
 0x9a8   :  { %4084 = vmatprep.subr.mxu1 %v1758_v39 }
 0x9a9   :  { %4085 = vmatpush3.msra.mxu1 %v1758_v39 }
 0x9aa   :  { %4086 = vmatprep.subr.mxu1 %v1757_v41 }
 0x9ab   :  { %4087 = vmatpush3.msra.mxu1 %v1757_v41 }
 0x9ac   :  { %4088 = vmatprep.subr.mxu1 %v1756_v44 }
 0x9ad   :  { %4089 = vmatpush3.msra.mxu1 %v1756_v44  ;;  %v4479_v44 = vld [vmem:[%s5321_s9] ss:$0 sm:$0xff] }
 0x9ae   :  { %4090 = vmatprep.subr.mxu1 %v1755_v46 }
 0x9af   :  { %4091 = vmatpush3.msra.mxu1 %v1755_v46  ;;  %v4480_v46 = vld [vmem:[%s5321_s9 + $0x1] ss:$0 sm:$0xff] }
 0x9b0   :  { %4092 = vmatprep.subr.mxu1 %v1754_v48 }
 0x9b1   :  { %4093 = vmatpush3.msra.mxu1 %v1754_v48 }
 0x9b2   :  { %4094 = vmatprep.subr.mxu1 %v1753_v51 }
 0x9b3   :  { %4095 = vmatpush3.msra.mxu1 %v1753_v51  ;;  %v5021_v51 = vld [vmem:[%s5321_s9 + $0x2] ss:$0 sm:$0xff] }
 0x9b4   :  { %4096 = vmatprep.subr.mxu1 %v1752_v54 }
 0x9b5   :  { %4097 = vmatpush3.msra.mxu1 %v1752_v54  ;;  %v5027_v54 = vld [vmem:[%s5321_s9 + $0x3] ss:$0 sm:$0xff] }
 0x9b6   :  { %4098 = vmatprep.subr.mxu1 %v1751_v31 }
 0x9b7   :  { %4099 = vmatpush3.msra.mxu1 %v1751_v31 }
 0x9b8   :  { %4100 = vmatprep.subr.mxu1 %v1750_v56 }
 0x9b9   :  { %4101 = vmatpush3.msra.mxu1 %v1750_v56  ;;  %v3451_v56 = vld [vmem:[%s5317_s5 + $0xe] ss:$0 sm:$0xff] }
 0x9ba   :  { %4102 = vmatprep.subr.mxu1 %v1749_v58 }
 0x9bb   :  { %4103 = vmatpush3.msra.mxu1 %v1749_v58 }
 0x9bc   :  { %4104 = vmatprep.subr.mxu1 %v1748_v61 }
 0x9bd   :  { %4105 = vmatpush3.msra.mxu1 %v1748_v61 }
 0x9be   :  { %4144 = vmatprep.subr.mxu1 %v1959_v63 }
 0xa2d   :  { %v1709_v22 = vpop.xlane.xlu1 %1708 }
 0xa2e   :  { %v1711_v24 = vmul.f32 0.03125, %v1709_v22  ;;  %v1706_v25 = vpop.xlane.xlu0 %1705  ;;  %v1950_v22 = vld [vmem:[#allocation2 + $0x330] sm:$0xff] }
 0xa2f   :  { %v1710_v26 = vmul.f32 0.03125, %v1706_v25  ;;  %v1948_v25 = vld [vmem:[#allocation2 + $0x320] sm:$0xff] }
 0xa30   :  { %v1713_v27 = vsub.f32 %v4972_v13, %v1711_v24  ;;  %v1949_v24 = vld [vmem:[#allocation2 + $0x328] sm:$0xff] }
 0xa31   :  { %v1712_v28 = vsub.f32 %v4975_v18, %v1710_v26  ;;  %v1947_v26 = vld [vmem:[#allocation2 + $0x318] sm:$0xff] }
 0xa32   :  { %v4988_v30 = vmul.f32 %v4985_v29, %v1713_v27  ;;  %v1946_v27 = vld [vmem:[#allocation2 + $0x310] sm:$0xff] }
 0xa33   :  { %v4991_v32 = vmul.f32 %v4985_v29, %v1712_v28  ;;  %v1945_v28 = vld [vmem:[#allocation2 + $0x308] sm:$0xff] }
 0xa34   :  { %v1717_v33 = vmul.f32 %v4988_v30, %v4988_v30 }
 0xa35   :  { %v1716_v34 = vmul.f32 %v4991_v32, %v4991_v32 }
 0xa36   :  { %v1720_v36 = vsel %vm196_vm1, %v1717_v33, 0.0 }
 0xa37   :  { %1721 = vadd.xlane.f32.xlu1 %v1720_v36  ;;  %1718 = vadd.xlane.f32.xlu0 %v1716_v34 }
 0xac0   :  { %v1722_v1 = vpop.xlane.xlu1 %1721  ;;  %v1719_v2 = vpop.xlane.xlu0 %1718 }
 0xac1   :  { %v1724_v3 = vmul.f32 0.03125, %v1722_v1  ;;  %v1723_v4 = vmul.f32 0.03125, %v1719_v2 }
 0xac3   :  { %v1726_v5 = vadd.f32 1e-12, %v1724_v3  ;;  %v1725_v6 = vadd.f32 1e-12, %v1723_v4 }
 0xac5   :  { %4432 = vrsqrt.f32 %v1726_v5 }
 0xac6   :  { %4434 = vrsqrt.f32 %v1725_v6 }
 0xad2   :  { %v4433_v43 = vpop.eup %4432 }
 0xad3   :  { %v4435_v16 = vpop.eup %4434  ;;  %v1730_v7 = vmul.f32 %v4433_v43, %v4988_v30  ;;  %v1944_v30 = vld [vmem:[#allocation2 + $0x300] sm:$0xff] }
 0xad4   :  { %v1729_v9 = vmul.f32 %v4435_v16, %v4991_v32  ;;  %v3450_v32 = vld [vmem:[%s5317_s5 + $0xd] ss:$0 sm:$0xff] }
 0xad5   :  { %v1738_v11 = vmul.f32 %v3447_v59, %v1730_v7 }
 0xad6   :  { %v1737_v12 = vmul.f32 %v3447_v59, %v1729_v9 }
 0xad7   :  { %v1746_v10 = vadd.f32 %v3448_v8, %v1738_v11  ;;  %v4483_v11 = vld [vmem:[%s5322_s10 + $0x8] sm:$0x3] }
 0xad8   :  { %v1745_v23 = vadd.f32 %v3448_v8, %v1737_v12 }
 0xada   :  { %4106 = vmatprep.mubr.f32.mxu1 %v1745_v23  ;;  %4141 = vmatprep.mubr.f32.mxu0 %v1745_v23 }
 0xadb   :  { %4107 = vmatmul.mubr.f32.vlgmr.msra.gmra.mxu1 %v1746_v10  ;;  %4142 = vmatmul.mubr.f32.vlgmr.msra.gmra.mxu0 %v1746_v10 }
 0xadc   :  { %4145 = vmatpush3.msra.mxu1 %v1959_v63  ;;  %4176 = vmatprep.mubr.f32.mxu1 %v1745_v23  ;;  %v4484_v23 = vld [vmem:[%s5322_s10] sm:$0xff] }
 0xadd   :  { %4146 = vmatprep.subr.mxu1 %v1958_v14 }
 0xade   :  { %4147 = vmatpush3.msra.mxu1 %v1958_v14 }
 0xadf   :  { %4148 = vmatprep.subr.mxu1 %v1957_v15 }
 0xae0   :  { %4149 = vmatpush3.msra.mxu1 %v1957_v15 }
 0xae1   :  { %4150 = vmatprep.subr.mxu1 %v1956_v17 }
 0xae2   :  { %4151 = vmatpush3.msra.mxu1 %v1956_v17 }
 0xae3   :  { %4152 = vmatprep.subr.mxu1 %v1955_v19 }
 0xae4   :  { %4153 = vmatpush3.msra.mxu1 %v1955_v19 }
 0xae5   :  { %4154 = vmatprep.subr.mxu1 %v1954_v50 }
 0xae6   :  { %4155 = vmatpush3.msra.mxu1 %v1954_v50 }
 0xae7   :  { %4156 = vmatprep.subr.mxu1 %v1953_v20 }
 0xae8   :  { %4157 = vmatpush3.msra.mxu1 %v1953_v20 }
 0xae9   :  { %4158 = vmatprep.subr.mxu1 %v1952_v52 }
 0xaea   :  { %4159 = vmatpush3.msra.mxu1 %v1952_v52 }
 0xaeb   :  { %4160 = vmatprep.subr.mxu1 %v1951_v21 }
 0xaec   :  { %4161 = vmatpush3.msra.mxu1 %v1951_v21 }
 0xaed   :  { %4162 = vmatprep.subr.mxu1 %v1950_v22 }
 0xaee   :  { %4163 = vmatpush3.msra.mxu1 %v1950_v22 }
 0xaef   :  { %4164 = vmatprep.subr.mxu1 %v1949_v24 }
 0xaf0   :  { %4165 = vmatpush3.msra.mxu1 %v1949_v24 }
 0xaf1   :  { %4166 = vmatprep.subr.mxu1 %v1948_v25 }
 0xaf2   :  { %4167 = vmatpush3.msra.mxu1 %v1948_v25 }
 0xaf3   :  { %4168 = vmatprep.subr.mxu1 %v1947_v26 }
 0xaf4   :  { %4169 = vmatpush3.msra.mxu1 %v1947_v26 }
 0xaf5   :  { %4170 = vmatprep.subr.mxu1 %v1946_v27 }
 0xaf6   :  { %4171 = vmatpush3.msra.mxu1 %v1946_v27 }
 0xaf7   :  { %4172 = vmatprep.subr.mxu1 %v1945_v28 }
 0xaf8   :  { %4173 = vmatpush3.msra.mxu1 %v1945_v28 }
 0xaf9   :  { %4174 = vmatprep.subr.mxu1 %v1944_v30 }
 0xafa   :  { %4175 = vmatpush3.msra.mxu1 %v1944_v30 }
 0xafb   :  { %4177 = vmatmul.mubr.f32.vlgmr.msra.gmra.mxu1 %v1746_v10 }
 0xb9b   :  { %v4108_v33 = vpop.f32.mrf.mxu1  ;;  %v4143_v34 = vpop.f32.mrf.mxu0 }
 0xb9c   :  { %v1940_v36 = vadd.f32 %v4143_v34, %v3450_v32  ;;  %v1842_v42 = vadd.f32 %v4108_v33, %v3449_v37 }
 0xb9d   :  { %v1836_v38 = vpop.f32.mrf.mxu1  ;;  %v1934_v39 = vpop.f32.mrf.mxu0 }
 0xb9e   :  { %v1837_v40 = vadd.f32 %v3449_v37, %v1836_v38  ;;  %v1935_v41 = vadd.f32 %v3450_v32, %v1934_v39  ;;  %4179 = vmatprep.subr.mxu0 %v1940_v36  ;;  %4186 = vmatprep.subr.mxu1 %v1940_v36  ;;  %v2042_v48 = vmul.f32 %v4479_v44, %v1842_v42 }
 0xb9f   :  { %4180 = vmatpush3.xpose.msra.mxu0 %v1940_v36  ;;  %4187 = vmatpush3.xpose.msra.mxu1 %v1940_v36  ;;  %v2044_v49 = vmul.f32 %v4480_v46, %v1842_v42  ;;  %v2046_v31 = vmul.f32 %v5021_v51, %v1842_v42  ;;  %v2048_v35 = vmul.f32 %v5027_v54, %v1842_v42 }
 0xba0   :  { %4181 = vmatprep.subr.mxu0 %v1935_v41  ;;  %4188 = vmatprep.subr.mxu1 %v1935_v41  ;;  %v2041_v45 = vmul.f32 %v4479_v44, %v1837_v40  ;;  %v2043_v47 = vmul.f32 %v4480_v46, %v1837_v40  ;;  %v2045_v53 = vmul.f32 %v5021_v51, %v1837_v40 }
 0xba1   :  { %v2047_v55 = vmul.f32 %v5027_v54, %v1837_v40 }
 0xba2   :  { %4183 = vmatprep.mubr.f32.mxu0 %v2041_v45  ;;  %4190 = vmatprep.mubr.f32.mxu1 %v2043_v47 }
 0xba3   :  { %4182 = vmatpush3.xpose.msra.mxu0 %v1935_v41  ;;  %4189 = vmatpush3.xpose.msra.mxu1 %v1935_v41 }
 0xba4   :  { %4193 = vmatprep.subr.mxu0 %v1940_v36  ;;  %4200 = vmatprep.subr.mxu1 %v1940_v36 }
 0xba6   :  { %4184 = vmatmul.mubr.f32.vlgmr.msra.gmra.mxu0 %v2042_v48  ;;  %4191 = vmatmul.mubr.f32.vlgmr.msra.gmra.mxu1 %v2044_v49 }
 0xba7   :  { %4194 = vmatpush3.xpose.msra.mxu0 %v1940_v36  ;;  %4197 = vmatprep.mubr.f32.mxu0 %v2045_v53 }
 0xba8   :  { %4201 = vmatpush3.xpose.msra.mxu1 %v1940_v36  ;;  %4204 = vmatprep.mubr.f32.mxu1 %v2047_v55 }
 0xba9   :  { %4195 = vmatprep.subr.mxu0 %v1935_v41  ;;  %4202 = vmatprep.subr.mxu1 %v1935_v41 }
 0xbab   :  { %4196 = vmatpush3.xpose.msra.mxu0 %v1935_v41 }
 0xbac   :  { %4203 = vmatpush3.xpose.msra.mxu1 %v1935_v41 }
 0xbae   :  { %4198 = vmatmul.mubr.f32.vlgmr.msra.gmra.mxu0 %v2046_v31 }
 0xbaf   :  { %4205 = vmatmul.mubr.f32.vlgmr.msra.gmra.mxu1 %v2048_v35 }
 0xbbb   :  { %v4178_v57 = vpop.f32.mrf.mxu1 }
 0xbbc   :  { %v2038_v58 = vadd.f32 %v4178_v57, %v3451_v56 }
 0xbbd   :  { %v2032_v60 = vpop.f32.mrf.mxu1 }
 0xbbe   :  { %v5035_v61 = vadd.f32 %v3451_v56, %v2032_v60  ;;  %v2050_v62 = vmul.f32 %v4479_v44, %v2038_v58  ;;  %v2052_v63 = vmul.f32 %v4480_v46, %v2038_v58  ;;  %v5044_v3 = vmul.f32 %v5021_v51, %v2038_v58 }
 0xbbf   :  { %v5047_v4 = vmul.f32 %v5027_v54, %v2038_v58 }
 0xbc0   :  { %4207 = vmatprep.subr.msk.mxu0 %vm196_vm1, %v2050_v62  ;;  %4214 = vmatprep.subr.msk.mxu1 %vm196_vm1, %v2052_v63  ;;  %v2049_v1 = vmul.f32 %v4479_v44, %v5035_v61  ;;  %v2051_v2 = vmul.f32 %v4480_v46, %v5035_v61 }
 0xbc1   :  { %4208 = vmatpush3.msk.msra.mxu0 %vm196_vm1, %v2050_v62  ;;  %4215 = vmatpush3.msk.msra.mxu1 %vm196_vm1, %v2052_v63 }
 0xbc2   :  { %4209 = vmatprep.subr.mxu0 %v2049_v1  ;;  %4216 = vmatprep.subr.mxu1 %v2051_v2 }
 0xbc3   :  { %4210 = vmatpush3.msra.mxu0 %v2049_v1  ;;  %4217 = vmatpush3.msra.mxu1 %v2051_v2 }
 0xbc4   :  { %4221 = vmatprep.subr.msk.mxu0 %vm196_vm1, %v5044_v3  ;;  %4228 = vmatprep.subr.msk.mxu1 %vm196_vm1, %v5047_v4 }
 0xc66   :  { %v4185_v5 = vpop.f32.mrf.mxu0  ;;  %v4192_v6 = vpop.f32.mrf.mxu1 }
 0xc67   :  { %v2358_v43 = vmul.f32 0.35355338, %v4185_v5  ;;  %v2360_v59 = vmul.f32 0.35355338, %v4192_v6 }
 0xc68   :  { %v2123_v16 = vpop.f32.mrf.mxu0  ;;  %v2198_v7 = vpop.f32.mrf.mxu1 }
 0xc69   :  { %v2357_v8 = vmul.f32 0.35355338, %v2123_v16  ;;  %v2359_v9 = vmul.f32 0.35355338, %v2198_v7  ;;  %v2366_v12 = vadd.f32 %v4483_v11, %v2358_v43  ;;  %v2368_v15 = vadd.f32 %v4483_v11, %v2360_v59 }
 0xc6b   :  { %v2376_v10 = vsel %vm896_vm2, %v2366_v12, -inf  ;;  %v2365_v14 = vadd.f32 %v4484_v23, %v2357_v8  ;;  %v2367_v19 = vadd.f32 %v4484_v23, %v2359_v9  ;;  %v2382_v21 = vsel %vm896_vm2, %v2368_v15, -inf }
 0xc6c   :  { %2377 = vmax.xlane.f32.xlu1 %v2376_v10 }
 0xc6d   :  { %v2373_v17 = vsel %vm892_vm3, %v2365_v14, -inf  ;;  %v2379_v27 = vsel %vm892_vm3, %v2367_v19, -inf }
 0xc6e   :  { %2374 = vmax.xlane.f32.xlu0 %v2373_v17  ;;  %v4199_v50 = vpop.f32.mrf.mxu0 }
 0xc6f   :  { %v4206_v20 = vpop.f32.mrf.mxu1  ;;  %v2362_v52 = vmul.f32 0.35355338, %v4199_v50 }
 0xc70   :  { %v2364_v22 = vmul.f32 0.35355338, %v4206_v20  ;;  %2383 = vmax.xlane.f32.xlu1 %v2382_v21  ;;  %v2273_v24 = vpop.f32.mrf.mxu0 }
 0xc71   :  { %v2348_v25 = vpop.f32.mrf.mxu1  ;;  %v2361_v26 = vmul.f32 0.35355338, %v2273_v24  ;;  %v2370_v28 = vadd.f32 %v4483_v11, %v2362_v52 }
 0xc72   :  { %v2363_v30 = vmul.f32 0.35355338, %v2348_v25  ;;  %2380 = vmax.xlane.f32.xlu0 %v2379_v27  ;;  %v2372_v34 = vadd.f32 %v4483_v11, %v2364_v22 }
 0xc73   :  { %v2388_v32 = vsel %vm896_vm2, %v2370_v28, -inf  ;;  %v2369_v33 = vadd.f32 %v4484_v23, %v2361_v26 }
 0xc74   :  { %2389 = vmax.xlane.f32.xlu1 %v2388_v32  ;;  %v2371_v37 = vadd.f32 %v4484_v23, %v2363_v30  ;;  %v2394_v38 = vsel %vm896_vm2, %v2372_v34, -inf }
 0xc75   :  { %v2385_v36 = vsel %vm892_vm3, %v2369_v33, -inf }
 0xc76   :  { %2386 = vmax.xlane.f32.xlu0 %v2385_v36  ;;  %v2391_v39 = vsel %vm892_vm3, %v2371_v37, -inf }
 0xc78   :  { %2395 = vmax.xlane.f32.xlu1 %v2394_v38 }
 0xc7a   :  { %2392 = vmax.xlane.f32.xlu0 %v2391_v39  ;;  %v2053_v39 = vmul.f32 %v5021_v51, %v5035_v61 }
 0xcf5   :  { %v2378_v40 = vpop.xlane.xlu1 %2377 }
 0xcf6   :  { %v2398_v41 = vsub.f32 %v2366_v12, %v2378_v40 }
 0xcf7   :  { %v2375_v42 = vpop.xlane.xlu0 %2374 }
 0xcf8   :  { %v2407_v44 = vmul.f32 1.442695, %v2398_v41  ;;  %v2397_v45 = vsub.f32 %v2365_v14, %v2375_v42  ;;  %v2823_v41 = vld [vmem:[#allocation2 + $0x3f8] sm:$0xff] }
 0xcf9   :  { %v2384_v46 = vpop.xlane.xlu1 %2383 }
 0xcfa   :  { %4436 = vpow2.f32 %v2407_v44  ;;  %v2405_v47 = vmul.f32 1.442695, %v2397_v45  ;;  %v2400_v48 = vsub.f32 %v2368_v15, %v2384_v46  ;;  %v2055_v46 = vmul.f32 %v5027_v54, %v5035_v61  ;;  %v2820_v54 = vld [vmem:[#allocation2 + $0x3e0] sm:$0xff]  ;;  %v2819_v61 = vld [vmem:[#allocation2 + $0x3d8] sm:$0xff] }
 0xcfb   :  { %v2381_v49 = vpop.xlane.xlu0 %2380 }
 0xcfc   :  { %4438 = vpow2.f32 %v2405_v47  ;;  %v2411_v53 = vmul.f32 1.442695, %v2400_v48  ;;  %v2399_v55 = vsub.f32 %v2367_v19, %v2381_v49  ;;  %v2822_v48 = vld [vmem:[#allocation2 + $0x3f0] sm:$0xff] }
 0xcfd   :  { %v2390_v31 = vpop.xlane.xlu1 %2389 }
 0xcfe   :  { %4440 = vpow2.f32 %v2411_v53  ;;  %v2409_v35 = vmul.f32 1.442695, %v2399_v55  ;;  %v2402_v56 = vsub.f32 %v2370_v28, %v2390_v31  ;;  %v2821_v55 = vld [vmem:[#allocation2 + $0x3e8] sm:$0xff] }
 0xcff   :  { %v2387_v57 = vpop.xlane.xlu0 %2386 }
 0xd00   :  { %4442 = vpow2.f32 %v2409_v35  ;;  %v2415_v58 = vmul.f32 1.442695, %v2402_v56  ;;  %v2401_v60 = vsub.f32 %v2369_v33, %v2387_v57  ;;  %v2817_v35 = vld [vmem:[#allocation2 + $0x3c8] sm:$0xff]  ;;  %v2816_v56 = vld [vmem:[#allocation2 + $0x3c0] sm:$0xff]  ;;  %v2815_v57 = vld [vmem:[#allocation2 + $0x3b8] sm:$0xff] }
 0xd01   :  { %v2396_v62 = vpop.xlane.xlu1 %2395 }
 0xd02   :  { %4444 = vpow2.f32 %v2415_v58  ;;  %v2413_v63 = vmul.f32 1.442695, %v2401_v60  ;;  %v2404_v1 = vsub.f32 %v2372_v34, %v2396_v62  ;;  %v2814_v58 = vld [vmem:[#allocation2 + $0x3b0] sm:$0xff]  ;;  %v2813_v60 = vld [vmem:[#allocation2 + $0x3a8] sm:$0xff]  ;;  %v2812_v62 = vld [vmem:[#allocation2 + $0x3a0] sm:$0xff] }
 0xd03   :  { %v2393_v2 = vpop.xlane.xlu0 %2392 }
 0xd04   :  { %4446 = vpow2.f32 %v2413_v63  ;;  %v2419_v5 = vmul.f32 1.442695, %v2404_v1  ;;  %v2403_v6 = vsub.f32 %v2371_v37, %v2393_v2  ;;  %v2811_v63 = vld [vmem:[#allocation2 + $0x398] sm:$0xff]  ;;  %v2810_v1 = vld [vmem:[#allocation2 + $0x390] sm:$0xff]  ;;  %v2809_v2 = vld [vmem:[#allocation2 + $0x388] sm:$0xff] }
 0xd06   :  { %4448 = vpow2.f32 %v2419_v5  ;;  %v2417_v43 = vmul.f32 1.442695, %v2403_v6  ;;  %v2808_v5 = vld [vmem:[#allocation2 + $0x380] sm:$0xff] }
 0xd07   :  { %v4437_v59 = vpop.eup %4436 }
 0xd08   :  { %4450 = vpow2.f32 %v2417_v43  ;;  %v2424_v16 = vsel %vm896_vm2, %v4437_v59, 0.0 }
 0xd09   :  { %v4439_v7 = vpop.eup %4438  ;;  %2425 = vadd.xlane.f32.xlu1 %v2424_v16 }
 0xd0a   :  { %v2421_v8 = vsel %vm892_vm3, %v4439_v7, 0.0 }
 0xd0b   :  { %v4441_v9 = vpop.eup %4440  ;;  %2422 = vadd.xlane.f32.xlu0 %v2421_v8 }
 0xd0c   :  { %v2430_v11 = vsel %vm896_vm2, %v4441_v9, 0.0 }
 0xd0d   :  { %v4443_v12 = vpop.eup %4442  ;;  %2431 = vadd.xlane.f32.xlu1 %v2430_v11 }
 0xd0e   :  { %v2427_v10 = vsel %vm892_vm3, %v4443_v12, 0.0 }
 0xd0f   :  { %v4445_v23 = vpop.eup %4444  ;;  %2428 = vadd.xlane.f32.xlu0 %v2427_v10 }
 0xd10   :  { %v2436_v14 = vsel %vm896_vm2, %v4445_v23, 0.0 }
 0xd11   :  { %v4447_v15 = vpop.eup %4446  ;;  %2437 = vadd.xlane.f32.xlu1 %v2436_v14 }
 0xd12   :  { %v2433_v17 = vsel %vm892_vm3, %v4447_v15, 0.0 }
 0xd13   :  { %v4449_v19 = vpop.eup %4448  ;;  %2434 = vadd.xlane.f32.xlu0 %v2433_v17 }
 0xd14   :  { %v2442_v50 = vsel %vm896_vm2, %v4449_v19, 0.0 }
 0xd15   :  { %v4451_v20 = vpop.eup %4450  ;;  %2443 = vadd.xlane.f32.xlu1 %v2442_v50 }
 0xd16   :  { %v2439_v52 = vsel %vm892_vm3, %v4451_v20, 0.0 }
 0xd17   :  { %2440 = vadd.xlane.f32.xlu0 %v2439_v52 }
 0xd92   :  { %v2426_v21 = vpop.xlane.xlu1 %2425 }
 0xd93   :  { %4452 = vrcp.f32 %v2426_v21  ;;  %v3464_v21 = vld [vmem:[%s5317_s5 + $0xf] ss:$0 sm:$0xff] }
 0xd94   :  { %v2423_v22 = vpop.xlane.xlu0 %2422 }
 0xd95   :  { %4454 = vrcp.f32 %v2423_v22 }
 0xd96   :  { %v2432_v24 = vpop.xlane.xlu1 %2431 }
 0xd97   :  { %4456 = vrcp.f32 %v2432_v24 }
 0xd98   :  { %v2429_v25 = vpop.xlane.xlu0 %2428 }
 0xd99   :  { %4458 = vrcp.f32 %v2429_v25 }
 0xd9a   :  { %v2438_v26 = vpop.xlane.xlu1 %2437 }
 0xd9b   :  { %4460 = vrcp.f32 %v2438_v26 }
 0xd9c   :  { %v2435_v27 = vpop.xlane.xlu0 %2434 }
 0xd9d   :  { %4462 = vrcp.f32 %v2435_v27 }
 0xd9e   :  { %v2444_v28 = vpop.xlane.xlu1 %2443 }
 0xd9f   :  { %4464 = vrcp.f32 %v2444_v28 }
 0xda0   :  { %v2441_v30 = vpop.xlane.xlu0 %2440  ;;  %v4453_v32 = vpop.eup %4452 }
 0xda1   :  { %4466 = vrcp.f32 %v2441_v30  ;;  %v2454_v36 = vmul.f32 %v4453_v32, %v4437_v59  ;;  %v3482_v32 = vld [vmem:[%s5316_s4 + $0x178] sm:$0xff] }
 0xda2   :  { %v4455_v33 = vpop.eup %4454 }
 0xda3   :  { %v2453_v34 = vmul.f32 %v4455_v33, %v4439_v7  ;;  %v3481_v33 = vld [vmem:[%s5316_s4 + $0x170] sm:$0xff] }
 0xda4   :  { %v4457_v37 = vpop.eup %4456 }
 0xda5   :  { %4211 = vmatprep.mubr.msk.f32.mxu0 %vm892_vm3, %v2453_v34  ;;  %v2456_v42 = vmul.f32 %v4457_v37, %v4441_v9 }
 0xda6   :  { %v4459_v38 = vpop.eup %4458  ;;  %4212 = vmatmul.mubr.msk.f32.vlgmr.msra.gmra.mxu0 %vm892_vm3, %v2454_v36 }
 0xda7   :  { %4222 = vmatpush3.msk.msra.mxu0 %vm196_vm1, %v5044_v3  ;;  %v2455_v40 = vmul.f32 %v4459_v38, %v4443_v12 }
 0xda8   :  { %4223 = vmatprep.subr.mxu0 %v2053_v39  ;;  %v4461_v44 = vpop.eup %4460 }
 0xda9   :  { %4224 = vmatpush3.msra.mxu0 %v2053_v39  ;;  %4218 = vmatprep.mubr.msk.f32.mxu1 %vm892_vm3, %v2455_v40  ;;  %v2458_v3 = vmul.f32 %v4461_v44, %v4445_v23 }
 0xdaa   :  { %v4463_v45 = vpop.eup %4462  ;;  %4219 = vmatmul.mubr.msk.f32.vlgmr.msra.gmra.mxu1 %vm892_vm3, %v2456_v42  ;;  %4235 = vmatprep.subr.mxu0 %v2823_v41 }
 0xdab   :  { %4229 = vmatpush3.msk.msra.mxu1 %vm196_vm1, %v5047_v4  ;;  %v2457_v51 = vmul.f32 %v4463_v45, %v4447_v15  ;;  %v2818_v4 = vld [vmem:[#allocation2 + $0x3d0] sm:$0xff] }
 0xdac   :  { %4230 = vmatprep.subr.mxu1 %v2055_v46  ;;  %v4465_v47 = vpop.eup %4464 }
 0xdad   :  { %4231 = vmatpush3.msra.mxu1 %v2055_v46  ;;  %4225 = vmatprep.mubr.msk.f32.mxu0 %vm892_vm3, %v2457_v51  ;;  %v2460_v31 = vmul.f32 %v4465_v47, %v4449_v19  ;;  %v3478_v51 = vld [vmem:[%s5316_s4 + $0x158] sm:$0xff]  ;;  %v3475_v47 = vld [vmem:[%s5316_s4 + $0x140] sm:$0xff] }
 0xdae   :  { %v4467_v49 = vpop.eup %4466  ;;  %4226 = vmatmul.mubr.msk.f32.vlgmr.msra.gmra.mxu0 %vm892_vm3, %v2458_v3  ;;  %4270 = vmatprep.subr.mxu1 %v3482_v32  ;;  %v3477_v3 = vld [vmem:[%s5316_s4 + $0x150] sm:$0xff] }
 0xdaf   :  { %v2459_v53 = vmul.f32 %v4467_v49, %v4451_v20  ;;  %4236 = vmatpush3.msra.mxu0 %v2823_v41  ;;  %v3473_v49 = vld [vmem:[%s5316_s4 + $0x130] sm:$0xff] }
 0xdb0   :  { %4237 = vmatprep.subr.mxu0 %v2822_v48 }
 0xdb1   :  { %4232 = vmatprep.mubr.msk.f32.mxu1 %vm892_vm3, %v2459_v53  ;;  %4238 = vmatpush3.msra.mxu0 %v2822_v48  ;;  %v3474_v48 = vld [vmem:[%s5316_s4 + $0x138] sm:$0xff]  ;;  %v3472_v53 = vld [vmem:[%s5316_s4 + $0x128] sm:$0xff] }
 0xdb2   :  { %4233 = vmatmul.mubr.msk.f32.vlgmr.msra.gmra.mxu1 %vm892_vm3, %v2460_v31  ;;  %4239 = vmatprep.subr.mxu0 %v2821_v55  ;;  %v3470_v31 = vld [vmem:[%s5316_s4 + $0x118] sm:$0xff] }
 0xdb3   :  { %4240 = vmatpush3.msra.mxu0 %v2821_v55  ;;  %4271 = vmatpush3.msra.mxu1 %v3482_v32  ;;  %v3471_v55 = vld [vmem:[%s5316_s4 + $0x120] sm:$0xff] }
 0xdb4   :  { %4241 = vmatprep.subr.mxu0 %v2820_v54  ;;  %4272 = vmatprep.subr.mxu1 %v3481_v33 }
 0xdb5   :  { %4242 = vmatpush3.msra.mxu0 %v2820_v54  ;;  %4273 = vmatpush3.msra.mxu1 %v3481_v33  ;;  %v3469_v54 = vld [vmem:[%s5316_s4 + $0x110] sm:$0xff] }
 0xdb6   :  { %4243 = vmatprep.subr.mxu0 %v2819_v61 }
 0xdb7   :  { %4244 = vmatpush3.msra.mxu0 %v2819_v61  ;;  %v3468_v61 = vld [vmem:[%s5316_s4 + $0x108] sm:$0xff] }
 0xdb8   :  { %4245 = vmatprep.subr.mxu0 %v2818_v4 }
 0xdb9   :  { %4246 = vmatpush3.msra.mxu0 %v2818_v4  ;;  %v3467_v4 = vld [vmem:[%s5316_s4 + $0x100] sm:$0xff] }
 0xdba   :  { %4247 = vmatprep.subr.mxu0 %v2817_v35 }
 0xdbb   :  { %4248 = vmatpush3.msra.mxu0 %v2817_v35 }
 0xdbc   :  { %4249 = vmatprep.subr.mxu0 %v2816_v56 }
 0xdbd   :  { %4250 = vmatpush3.msra.mxu0 %v2816_v56 }
 0xdbe   :  { %4251 = vmatprep.subr.mxu0 %v2815_v57 }
 0xdbf   :  { %4252 = vmatpush3.msra.mxu0 %v2815_v57 }
 0xdc0   :  { %4253 = vmatprep.subr.mxu0 %v2814_v58 }
 0xdc1   :  { %4254 = vmatpush3.msra.mxu0 %v2814_v58 }
 0xdc2   :  { %4255 = vmatprep.subr.mxu0 %v2813_v60 }
 0xdc3   :  { %4256 = vmatpush3.msra.mxu0 %v2813_v60 }
 0xdc4   :  { %4257 = vmatprep.subr.mxu0 %v2812_v62 }
 0xdc5   :  { %4258 = vmatpush3.msra.mxu0 %v2812_v62 }
 0xdc6   :  { %4259 = vmatprep.subr.mxu0 %v2811_v63 }
 0xdc7   :  { %4260 = vmatpush3.msra.mxu0 %v2811_v63 }
 0xdc8   :  { %4261 = vmatprep.subr.mxu0 %v2810_v1 }
 0xdc9   :  { %4262 = vmatpush3.msra.mxu0 %v2810_v1  ;;  %v3465_v1 = vld [vmem:[%s5317_s5 + $0x10] ss:$0 sm:$0xff] }
 0xdca   :  { %4263 = vmatprep.subr.mxu0 %v2809_v2 }
 0xdcb   :  { %4264 = vmatpush3.msra.mxu0 %v2809_v2 }
 0xdcc   :  { %4265 = vmatprep.subr.mxu0 %v2808_v5 }
 0xdcd   :  { %4266 = vmatpush3.msra.mxu0 %v2808_v5 }
 0xe66   :  { %v4213_v6 = vpop.f32.mrf.mxu0 }
 0xe67   :  { %v2800_v11 = vsel %vm196_vm1, %v4213_v6, 0.0  ;;  %v3466_v6 = vld [vmem:[%s5317_s5 + $0x11] ss:$0 sm:$0xff] }
 0xe68   :  { %v2536_v59 = vpop.f32.mrf.mxu0 }
 0xe6a   :  { %v4220_v43 = vpop.f32.mrf.mxu1 }
 0xe6b   :  { %v2801_v8 = vsel %vm196_vm1, %v4220_v43, 0.0 }
 0xe6c   :  { %v2620_v16 = vpop.f32.mrf.mxu1  ;;  %v2802_v23 = vadd.f32 %v2801_v8, %v2800_v11  ;;  %v3498_v11 = vld [vmem:[%s5316_s4 + $0x1f0] sm:$0xff] }
 0xe6d   :  { %v2797_v12 = vadd.f32 %v2620_v16, %v2536_v59 }
 0xe6e   :  { %v4227_v7 = vpop.f32.mrf.mxu0 }
 0xe6f   :  { %v2803_v10 = vsel %vm196_vm1, %v4227_v7, 0.0 }
 0xe70   :  { %v2704_v9 = vpop.f32.mrf.mxu0  ;;  %v2804_v19 = vadd.f32 %v2803_v10, %v2802_v23  ;;  %v3496_v10 = vld [vmem:[%s5316_s4 + $0x1e0] sm:$0xff]  ;;  %v3495_v23 = vld [vmem:[%s5316_s4 + $0x1d8] sm:$0xff] }
 0xe71   :  { %v2798_v15 = vadd.f32 %v2797_v12, %v2704_v9  ;;  %v3499_v9 = vld [vmem:[%s5316_s4 + $0x1f8] sm:$0xff]  ;;  %v3497_v12 = vld [vmem:[%s5316_s4 + $0x1e8] sm:$0xff] }
 0xe72   :  { %v4234_v14 = vpop.f32.mrf.mxu1  ;;  %4305 = vmatprep.subr.mxu0 %v3499_v9 }
 0xe73   :  { %v2805_v17 = vsel %vm196_vm1, %v4234_v14, 0.0  ;;  %v3494_v14 = vld [vmem:[%s5316_s4 + $0x1d0] sm:$0xff] }
 0xe74   :  { %v2788_v50 = vpop.f32.mrf.mxu1  ;;  %v2806_v52 = vadd.f32 %v2805_v17, %v2804_v19  ;;  %v3492_v17 = vld [vmem:[%s5316_s4 + $0x1c0] sm:$0xff]  ;;  %v3491_v19 = vld [vmem:[%s5316_s4 + $0x1b8] sm:$0xff] }
 0xe75   :  { %v2799_v20 = vadd.f32 %v2798_v15, %v2788_v50  ;;  %v3493_v15 = vld [vmem:[%s5316_s4 + $0x1c8] sm:$0xff]  ;;  %v3490_v50 = vld [vmem:[%s5316_s4 + $0x1b0] sm:$0xff] }
 0xe77   :  { %4267 = vmatprep.mubr.f32.mxu0 %v2799_v20  ;;  %v3489_v20 = vld [vmem:[%s5316_s4 + $0x1a8] sm:$0xff] }
 0xe78   :  { %4268 = vmatmul.mubr.f32.vlgmr.msra.gmra.mxu0 %v2806_v52  ;;  %v3488_v52 = vld [vmem:[%s5316_s4 + $0x1a0] sm:$0xff] }
 0xe79   :  { %4306 = vmatpush3.msra.mxu0 %v3499_v9  ;;  %v3282_v9 = vld [vmem:[%s5319_s7 + $0x48] sm:$0xff] }
 0xe7a   :  { %4307 = vmatprep.subr.mxu0 %v3498_v11 }
 0xe7b   :  { %4308 = vmatpush3.msra.mxu0 %v3498_v11  ;;  %v3281_v11 = vld [vmem:[%s5319_s7 + $0x40] sm:$0xff] }
 0xe7c   :  { %4309 = vmatprep.subr.mxu0 %v3497_v12 }
 0xe7d   :  { %4310 = vmatpush3.msra.mxu0 %v3497_v12  ;;  %v3280_v12 = vld [vmem:[%s5319_s7 + $0x38] sm:$0xff] }
 0xe7e   :  { %4311 = vmatprep.subr.mxu0 %v3496_v10 }
 0xe7f   :  { %4312 = vmatpush3.msra.mxu0 %v3496_v10  ;;  %v3279_v10 = vld [vmem:[%s5319_s7 + $0x30] sm:$0xff] }
 0xe80   :  { %4313 = vmatprep.subr.mxu0 %v3495_v23 }
 0xe81   :  { %4314 = vmatpush3.msra.mxu0 %v3495_v23  ;;  %v3278_v23 = vld [vmem:[%s5319_s7 + $0x28] sm:$0xff] }
 0xe82   :  { %4315 = vmatprep.subr.mxu0 %v3494_v14 }
 0xe83   :  { %4316 = vmatpush3.msra.mxu0 %v3494_v14  ;;  %v3277_v14 = vld [vmem:[%s5319_s7 + $0x20] sm:$0xff] }
 0xe84   :  { %4317 = vmatprep.subr.mxu0 %v3493_v15 }
 0xe85   :  { %4318 = vmatpush3.msra.mxu0 %v3493_v15  ;;  %v3276_v15 = vld [vmem:[%s5319_s7 + $0x18] sm:$0xff] }
 0xe86   :  { %4319 = vmatprep.subr.mxu0 %v3492_v17 }
 0xe87   :  { %4320 = vmatpush3.msra.mxu0 %v3492_v17  ;;  %v3275_v17 = vld [vmem:[%s5319_s7 + $0x10] sm:$0xff] }
 0xe88   :  { %4321 = vmatprep.subr.mxu0 %v3491_v19 }
 0xe89   :  { %4322 = vmatpush3.msra.mxu0 %v3491_v19  ;;  %v3274_v19 = vld [vmem:[%s5319_s7 + $0x8] sm:$0xff] }
 0xe8a   :  { %4323 = vmatprep.subr.mxu0 %v3490_v50 }
 0xe8b   :  { %4324 = vmatpush3.msra.mxu0 %v3490_v50  ;;  %v3273_v50 = vld [vmem:[%s5319_s7] sm:$0xff] }
 0xe8c   :  { %4325 = vmatprep.subr.mxu0 %v3489_v20 }
 0xe8d   :  { %4326 = vmatpush3.msra.mxu0 %v3489_v20 }
 0xe8e   :  { %4327 = vmatprep.subr.mxu0 %v3488_v52 }
 0xe8f   :  { %4328 = vmatpush3.msra.mxu0 %v3488_v52 }
 0xf38   :  { %v4269_v22 = vpop.f32.mrf.mxu0 }
 0xf39   :  { %v2902_v24 = vadd.f32 %v4269_v22, %v3464_v21  ;;  %v3486_v22 = vld [vmem:[%s5316_s4 + $0x190] sm:$0xff] }
 0xf3a   :  { %v2896_v25 = vpop.f32.mrf.mxu0 }
 0xf3b   :  { %v5099_v26 = vadd.f32 %v2902_v24, %v4972_v13  ;;  %v2897_v27 = vadd.f32 %v3464_v21, %v2896_v25  ;;  %v3480_v13 = vld [vmem:[%s5316_s4 + $0x168] sm:$0xff]  ;;  %v3487_v21 = vld [vmem:[%s5316_s4 + $0x198] sm:$0xff]  ;;  %v3484_v25 = vld [vmem:[%s5316_s4 + $0x180] sm:$0xff] }
 0xf3c   :  { %4274 = vmatprep.subr.mxu1 %v3480_v13  ;;  %4329 = vmatprep.subr.mxu0 %v3487_v21  ;;  %v3485_v24 = vld [vmem:[%s5316_s4 + $0x188] sm:$0xff] }
 0xf3d   :  { %v5102_v28 = vadd.f32 %v2897_v27, %v4975_v18  ;;  %v2909_v30 = vsel %vm196_vm1, %v5099_v26, 0.0  ;;  %v3479_v18 = vld [vmem:[%s5316_s4 + $0x160] sm:$0xff]  ;;  %4275 = vmatpush3.msra.mxu1 %v3480_v13  ;;  %4330 = vmatpush3.msra.mxu0 %v3487_v21  ;;  %v3483_v27 = vld [vmem:[%s5317_s5 + $0x12] ss:$0 sm:$0xff] }
 0xf3e   :  { %2910 = vadd.xlane.f32.xlu1 %v2909_v30  ;;  %4276 = vmatprep.subr.mxu1 %v3479_v18 }
 0xf3f   :  { %2907 = vadd.xlane.f32.xlu0 %v5102_v28  ;;  %4277 = vmatpush3.msra.mxu1 %v3479_v18 }
 0xf40   :  { %4278 = vmatprep.subr.mxu1 %v3478_v51  ;;  %4331 = vmatprep.subr.mxu0 %v3486_v22 }
 0xf41   :  { %4279 = vmatpush3.msra.mxu1 %v3478_v51  ;;  %4332 = vmatpush3.msra.mxu0 %v3486_v22 }
 0xf42   :  { %4280 = vmatprep.subr.mxu1 %v3477_v3  ;;  %4333 = vmatprep.subr.mxu0 %v3485_v24 }
 0xf43   :  { %4281 = vmatpush3.msra.mxu1 %v3477_v3  ;;  %4334 = vmatpush3.msra.mxu0 %v3485_v24  ;;  %v3504_v24 = vld [vmem:[%s5318_s6] ss:$0 sm:$0xff] }
 0xf44   :  { %4335 = vmatprep.subr.mxu0 %v3484_v25 }
 0xf45   :  { %4336 = vmatpush3.msra.mxu0 %v3484_v25 }
 0xfc7   :  { %v2911_v34 = vpop.xlane.xlu1 %2910 }
 0xfc8   :  { %v2913_v36 = vmul.f32 0.03125, %v2911_v34  ;;  %v2908_v37 = vpop.xlane.xlu0 %2907 }
 0xfc9   :  { %v2912_v38 = vmul.f32 0.03125, %v2908_v37 }
 0xfca   :  { %v2915_v39 = vsub.f32 %v5099_v26, %v2913_v36 }
 0xfcb   :  { %v2914_v40 = vsub.f32 %v5102_v28, %v2912_v38 }
 0xfcc   :  { %v2917_v41 = vmul.f32 %v4985_v29, %v2915_v39 }
 0xfcd   :  { %v2916_v42 = vmul.f32 %v4985_v29, %v2914_v40  ;;  %v3476_v29 = vld [vmem:[%s5316_s4 + $0x148] sm:$0xff] }
 0xfce   :  { %v2919_v44 = vmul.f32 %v2917_v41, %v2917_v41  ;;  %4282 = vmatprep.subr.mxu1 %v3476_v29 }
 0xfcf   :  { %v2918_v45 = vmul.f32 %v2916_v42, %v2916_v42  ;;  %4283 = vmatpush3.msra.mxu1 %v3476_v29 }
 0xfd0   :  { %v2922_v46 = vsel %vm196_vm1, %v2919_v44, 0.0  ;;  %4284 = vmatprep.subr.mxu1 %v3475_v47 }
 0xfd1   :  { %2923 = vadd.xlane.f32.xlu1 %v2922_v46  ;;  %2920 = vadd.xlane.f32.xlu0 %v2918_v45 }
 0xfd2   :  { %4285 = vmatpush3.msra.mxu1 %v3475_v47 }
 0xfd3   :  { %4286 = vmatprep.subr.mxu1 %v3474_v48 }
 0xfd4   :  { %4287 = vmatpush3.msra.mxu1 %v3474_v48 }
 0xfd5   :  { %4288 = vmatprep.subr.mxu1 %v3473_v49 }
 0xfd6   :  { %4289 = vmatpush3.msra.mxu1 %v3473_v49 }
 0xfd7   :  { %4290 = vmatprep.subr.mxu1 %v3472_v53 }
 0xfd8   :  { %4291 = vmatpush3.msra.mxu1 %v3472_v53  ;;  %v3500_v53 = vld [vmem:[%s5317_s5 + $0x13] ss:$0 sm:$0xff] }
 0xfd9   :  { %4292 = vmatprep.subr.mxu1 %v3471_v55 }
 0xfda   :  { %4293 = vmatpush3.msra.mxu1 %v3471_v55 }
 0xfdb   :  { %4294 = vmatprep.subr.mxu1 %v3470_v31 }
 0xfdc   :  { %4295 = vmatpush3.msra.mxu1 %v3470_v31 }
 0xfdd   :  { %4296 = vmatprep.subr.mxu1 %v3469_v54 }
 0xfde   :  { %4297 = vmatpush3.msra.mxu1 %v3469_v54 }
 0xfdf   :  { %4298 = vmatprep.subr.mxu1 %v3468_v61 }
 0xfe0   :  { %4299 = vmatpush3.msra.mxu1 %v3468_v61 }
 0xfe1   :  { %4300 = vmatprep.subr.mxu1 %v3467_v4 }
 0xfe2   :  { %4301 = vmatpush3.msra.mxu1 %v3467_v4 }
 0xfe3   :  { %4340 = vmatprep.subr.mxu1 %v4533_v0 }
0x105a   :  { %v2924_v35 = vpop.xlane.xlu1 %2923  ;;  %v2921_v56 = vpop.xlane.xlu0 %2920 }
0x105b   :  { %v2926_v57 = vmul.f32 0.03125, %v2924_v35  ;;  %v2925_v58 = vmul.f32 0.03125, %v2921_v56  ;;  %v3165_v56 = vld [vmem:[%s5323_s11] sm:$0x3] }
0x105d   :  { %v2928_v60 = vadd.f32 1e-12, %v2926_v57  ;;  %v2927_v62 = vadd.f32 1e-12, %v2925_v58  ;;  %v3288_v58 = vld [vmem:[%s5319_s7 + $0x78] sm:$0xff] }
0x105f   :  { %4468 = vrsqrt.f32 %v2928_v60  ;;  %v3287_v60 = vld [vmem:[%s5319_s7 + $0x70] sm:$0xff] }
0x1060   :  { %4470 = vrsqrt.f32 %v2927_v62  ;;  %v3286_v62 = vld [vmem:[%s5319_s7 + $0x68] sm:$0xff] }
0x106c   :  { %v4469_v63 = vpop.eup %4468 }
0x106d   :  { %v4471_v2 = vpop.eup %4470  ;;  %v2932_v5 = vmul.f32 %v4469_v63, %v2917_v41  ;;  %v3285_v63 = vld [vmem:[%s5319_s7 + $0x60] sm:$0xff] }
0x106e   :  { %v2931_v43 = vmul.f32 %v4471_v2, %v2916_v42 }
0x106f   :  { %v2940_v59 = vmul.f32 %v3465_v1, %v2932_v5 }
0x1070   :  { %v2939_v16 = vmul.f32 %v3465_v1, %v2931_v43 }
0x1071   :  { %v2948_v7 = vadd.f32 %v3466_v6, %v2940_v59 }
0x1072   :  { %v2947_v8 = vadd.f32 %v3466_v6, %v2939_v16  ;;  %v4485_v6 = vld [vmem:[%s5320_s8] ss:$0 sm:$0xff] }
0x1074   :  { %4302 = vmatprep.mubr.f32.mxu1 %v2947_v8  ;;  %v3283_v8 = vld [vmem:[%s5319_s7 + $0x50] sm:$0xff] }
0x1075   :  { %4303 = vmatmul.mubr.f32.vlgmr.msra.gmra.mxu1 %v2948_v7  ;;  %v3284_v7 = vld [vmem:[%s5319_s7 + $0x58] sm:$0xff] }
0x1076   :  { %4344 = vmatprep.mubr.msk.f32.mxu1 %vm4534_vm4, %v4533_v0 }
0x1135   :  { %v4304_v30 = vpop.f32.mrf.mxu1 }
0x1136   :  { %v3044_v32 = vadd.f32 %v4304_v30, %v3483_v27 }
0x1137   :  { %v3038_v33 = vpop.f32.mrf.mxu1 }
0x1138   :  { %v3048_v13 = vmul.f32 %v3044_v32, %v3044_v32  ;;  %v3039_v18 = vadd.f32 %v3483_v27, %v3038_v33  ;;  %v3505_v27 = vld [vmem:[%s5318_s6 + $0x1] ss:$0 sm:$0xff] }
0x113a   :  { %v3050_v34 = vmul.f32 %v3048_v13, %v3044_v32  ;;  %v3047_v36 = vmul.f32 %v3039_v18, %v3039_v18 }
0x113c   :  { %v3052_v37 = vmul.f32 0.044715, %v3050_v34  ;;  %v3049_v38 = vmul.f32 %v3047_v36, %v3039_v18 }
0x113e   :  { %v3054_v39 = vadd.f32 %v3052_v37, %v3044_v32  ;;  %v3051_v40 = vmul.f32 0.044715, %v3049_v38 }
0x1140   :  { %v3056_v41 = vmul.f32 0.7978846, %v3054_v39  ;;  %v3053_v42 = vadd.f32 %v3051_v40, %v3039_v18 }
0x1142   :  { %4472 = vtanh.f32 %v3056_v41  ;;  %v3055_v44 = vmul.f32 0.7978846, %v3053_v42 }
0x1144   :  { %4474 = vtanh.f32 %v3055_v44 }
0x114f   :  { %v4473_v45 = vpop.eup %4472 }
0x1150   :  { %v3060_v46 = vadd.f32 1.0, %v4473_v45 }
0x1151   :  { %v4475_v51 = vpop.eup %4474 }
0x1152   :  { %v3059_v3 = vadd.f32 1.0, %v4475_v51  ;;  %v3062_v29 = vmul.f32 0.5, %v3060_v46 }
0x1154   :  { %v3061_v47 = vmul.f32 0.5, %v3059_v3  ;;  %v3064_v49 = vmul.f32 %v3062_v29, %v3044_v32 }
0x1156   :  { %v3063_v48 = vmul.f32 %v3061_v47, %v3039_v18 }
0x1158   :  { %4337 = vmatprep.mubr.f32.mxu0 %v3063_v48 }
0x1159   :  { %4338 = vmatmul.mubr.f32.vlgmr.msra.gmra.mxu0 %v3064_v49 }
0x1219   :  { %v4339_v55 = vpop.f32.mrf.mxu0 }
0x121a   :  { %v3160_v31 = vadd.f32 %v4339_v55, %v3500_v53 }
0x121b   :  { %v3154_v54 = vpop.f32.mrf.mxu0 }
0x121c   :  { %v3164_v61 = vadd.f32 %v3160_v31, %v5099_v26  ;;  %v3155_v4 = vadd.f32 %v3500_v53, %v3154_v54 }
0x121e   :  { %v3163_v35 = vadd.f32 %v3155_v4, %v5102_v28  ;;  %4341 = vmatpush3.msk.msra.mxu1 %vm196_vm1, %v3164_v61 }
0x121f   :  { %4342 = vmatprep.subr.mxu1 %v4533_v0 }
0x1220   :  { %4343 = vmatpush3.msra.mxu1 %v3163_v35 }
0x1221   :  { %4345 = vmatmul.mubr.msk.f32.vlgmr.msra.gmra.mxu1 %vm892_vm3, %v3165_v56  ;;  %4347 = vmatprep.subr.mxu1 %v4533_v0 }
0x1222   :  { %4379 = vmatprep.mubr.msk.f32.mxu1 %vm4534_vm4, %v4533_v0  ;;  %4348 = vmatpush3.msra.mxu1 %v3288_v58 }
0x1223   :  { %4349 = vmatprep.subr.mxu1 %v4533_v0 }
0x1224   :  { %4350 = vmatpush3.msra.mxu1 %v3287_v60 }
0x1225   :  { %4351 = vmatprep.subr.mxu1 %v4533_v0 }
0x1226   :  { %4352 = vmatpush3.msra.mxu1 %v3286_v62 }
0x1227   :  { %4353 = vmatprep.subr.mxu1 %v4533_v0 }
0x1228   :  { %4354 = vmatpush3.msra.mxu1 %v3285_v63 }
0x1229   :  { %4355 = vmatprep.subr.mxu1 %v4533_v0 }
0x122a   :  { %4356 = vmatpush3.msra.mxu1 %v3284_v7 }
0x122b   :  { %4357 = vmatprep.subr.mxu1 %v4533_v0 }
0x122c   :  { %4358 = vmatpush3.msra.mxu1 %v3283_v8 }
0x122d   :  { %4359 = vmatprep.subr.mxu1 %v4533_v0 }
0x122e   :  { %4360 = vmatpush3.msra.mxu1 %v3282_v9 }
0x122f   :  { %4361 = vmatprep.subr.mxu1 %v4533_v0 }
0x1230   :  { %4362 = vmatpush3.msra.mxu1 %v3281_v11 }
0x1231   :  { %4363 = vmatprep.subr.mxu1 %v4533_v0 }
0x1232   :  { %4364 = vmatpush3.msra.mxu1 %v3280_v12 }
0x1233   :  { %4365 = vmatprep.subr.mxu1 %v4533_v0 }
0x1234   :  { %4366 = vmatpush3.msra.mxu1 %v3279_v10 }
0x1235   :  { %4367 = vmatprep.subr.mxu1 %v4533_v0 }
0x1236   :  { %4368 = vmatpush3.msra.mxu1 %v3278_v23 }
0x1237   :  { %4369 = vmatprep.subr.mxu1 %v4533_v0 }
0x1238   :  { %4370 = vmatpush3.msra.mxu1 %v3277_v14 }
0x1239   :  { %4371 = vmatprep.subr.mxu1 %v4533_v0 }
0x123a   :  { %4372 = vmatpush3.msra.mxu1 %v3276_v15 }
0x123b   :  { %4373 = vmatprep.subr.mxu1 %v4533_v0 }
0x123c   :  { %4374 = vmatpush3.msra.mxu1 %v3275_v17 }
0x123d   :  { %4375 = vmatprep.subr.mxu1 %v4533_v0 }
0x123e   :  { %4376 = vmatpush3.msra.mxu1 %v3274_v19 }
0x123f   :  { %4377 = vmatprep.subr.mxu1 %v4533_v0  ;;  %v3507_v0 = vld [vmem:[%s5318_s6 + $0x2] ss:$0 sm:$0xff] }
0x1240   :  { %4378 = vmatpush3.msra.mxu1 %v3273_v50 }
0x12e1   :  { %v3238_v57 = vpop.f32.mrf.mxu1 }
0x12e2   :  { %v3245_v26 = vsel %vm196_vm1, %v3238_v57, 0.0 }
0x12e3   :  { %3246 = vadd.xlane.f32.xlu0 %v3245_v26  ;;  %v4346_v28 = vpop.f32.mrf.mxu1 }
0x136c   :  { %v3247_v1 = vpop.xlane.xlu0 %3246 }
0x136d   :  { %v3248_v2 = vmul.f32 0.03125, %v3247_v1 }
0x136f   :  { %v3249_v5 = vsub.f32 %v3238_v57, %v3248_v2 }
0x1371   :  { %v3250_v43 = vmul.f32 %v4485_v6, %v3249_v5 }
0x1373   :  { %v3251_v59 = vmul.f32 %v3250_v43, %v3250_v43 }
0x1375   :  { %v3252_v16 = vsel %vm196_vm1, %v3251_v59, 0.0 }
0x1376   :  { %3253 = vadd.xlane.f32.xlu1 %v3252_v16 }
0x13ff   :  { %v3254_v20 = vpop.xlane.xlu1 %3253 }
0x1400   :  { %v3255_v52 = vmul.f32 0.03125, %v3254_v20 }
0x1402   :  { %v3256_v21 = vadd.f32 1e-12, %v3255_v52 }
0x1404   :  { %4476 = vrsqrt.f32 %v3256_v21 }
0x1411   :  { %v4477_v22 = vpop.eup %4476 }
0x1412   :  { %v3258_v25 = vmul.f32 %v4477_v22, %v3250_v43 }
0x1414   :  { %v3265_v30 = vmul.f32 %v3504_v24, %v3258_v25 }
0x1416   :  { %v3272_v32 = vadd.f32 %v3505_v27, %v3265_v30 }
0x1418   :  { %4380 = vmatmul.mubr.f32.vlgmr.msra.gmra.mxu1 %v3272_v32 }
0x14d8   :  { %v3363_v33 = vpop.f32.mrf.mxu1 }
0x14d9   :  { %v3364_v13 = vadd.f32 %v3507_v0, %v3363_v33 }
0x14da   :  { %v4381_v18 = vpop.f32.mrf.mxu1 }
0x14db   :  { %3367 = vst [vmem:[#allocation5] sm:$0x3] %v3364_v13 }
0x14dc   :  { %4517 = shalt.err (!%p4514_p9)
}
0x14dd   :  { %3377 = dma.vmem_to_hbm [thread:$0]  %s3375_s2, 32, %s5324_s12, [#allocation4]  }
0x14de   :  { %4528 = dma.done.wait [#allocation4], 32  }
0x14df   :  { %4529 = vsyncadd [#allocation4], 4294967264 }
0x14e0   :  { %3381 = vsyncpa [#allocation3], 1 }
0x14e1   :  { %3382 = vsyncpa [#allocation4], 1 }

</bundles_post_ra>
